<compile_context>
chip_gen: v5e
topology: v5e:2x2
jax: 0.10.0
libtpu: 0.0.40
codegen_flags: <defaults>
</compile_context>

<pallas_src>
import functools

import jax
import jax.numpy as jnp
from jax.experimental import pallas as pl
from jax.experimental.pallas import tpu as pltpu


# ----------------------------- Pallas kernel --------------------------------

def _shift(v, d, axis):
    """result[..., i, ...] = v[..., i + d, ...] along `axis`, zero-filled (static d)."""
    if d == 0:
        return v
    pad_shape = list(v.shape)
    pad_shape[axis] = abs(d)
    zeros = jnp.zeros(pad_shape, v.dtype)
    idx = [slice(None)] * v.ndim
    if d > 0:
        idx[axis] = slice(d, None)
        return jnp.concatenate([v[tuple(idx)], zeros], axis=axis)
    idx[axis] = slice(None, d)  # d < 0: drop last |d|
    return jnp.concatenate([zeros, v[tuple(idx)]], axis=axis)


def _spatial_attention_kernel(x_ref, w_ref, o_ref, *, H, W):
    # x_ref/o_ref: (TB, C, H, W) VMEM block.  w_ref: (98,) f32 SMEM (2x7x7 conv taps).
    x = x_ref[...].astype(jnp.float32)            # (TB, C, H, W)
    avg = jnp.mean(x, axis=1)                     # (TB, H, W)  non-minor-axis reduce (VALU only)
    mx = jnp.max(x, axis=1)                       # (TB, H, W)
    tb = x.shape[0]

    # 7x7 cross-correlation with zero padding 3, fully unrolled, register-resident.
    acc = jnp.zeros((tb, H, W), jnp.float32)
    for a in range(7):
        dh = a - 3
        avg_r = _shift(avg, dh, axis=1)           # shared row shift for the whole tap row
        mx_r = _shift(mx, dh, axis=1)
        for b in range(7):
            dw = b - 3
            avg_t = _shift(avg_r, dw, axis=2)
            mx_t = _shift(mx_r, dw, axis=2)
            acc = acc + w_ref[a * 7 + b] * avg_t + w_ref[49 + a * 7 + b] * mx_t

    gate = jax.nn.sigmoid(acc)                    # (TB, H, W), EUP exp
    o_ref[...] = (x * gate[:, None, :, :]).astype(o_ref.dtype)


# ------------------------------- wrapper -------------------------------------

def _pick_block_batch(B, per_image_bytes, budget_bytes=4 << 20):
    """Largest batch tile that divides B, fits the per-block VMEM budget, and
    leaves >= 2 grid steps when B >= 2 (so both v7x TensorCores get work)."""
    best = 1
    for tb in range(1, B + 1):
        if B % tb:
            continue
        if tb * per_image_bytes > budget_bytes:
            continue
        if B // tb >= 2 or B == 1:
            best = tb
    return best


def spatial_attention(x, conv_weight):
    """PyTorch SpatialAttention forward.

    x: (B, C, H, W) NCHW.  conv_weight: (1, 2, 7, 7) Conv2d(2, 1, 7, padding=3, bias=False).
    Returns sigmoid(conv7x7([mean_c(x); max_c(x)])) * x, same shape/dtype as x.
    """
    B, C, H, W = x.shape
    w_flat = conv_weight.reshape(-1).astype(jnp.float32)        # (98,) -> SMEM

    per_image = C * H * W * x.dtype.itemsize
    TB = _pick_block_batch(B, per_image)
    grid = (B // TB,)
    block = (TB, C, H, W)

    # in + out double-buffered blocks + f32 working copies; capped well under v7x's 64 MiB.
    block_f32 = TB * C * H * W * 4
    vmem_limit = int(min(max(6 * block_f32 + (4 << 20), 16 << 20), 48 << 20))

    return pl.pallas_call(
        functools.partial(_spatial_attention_kernel, H=H, W=W),
        out_shape=jax.ShapeDtypeStruct(x.shape, x.dtype),
        grid=grid,
        in_specs=[pl.BlockSpec(block, lambda b: (b, 0, 0, 0)),
                  pl.BlockSpec(memory_space=pltpu.MemorySpace.SMEM)],
        out_specs=pl.BlockSpec(block, lambda b: (b, 0, 0, 0)),
        compiler_params=pltpu.CompilerParams(
            dimension_semantics=("parallel",),
            vmem_limit_bytes=vmem_limit),
    )(x, w_flat)


# ------------------------------ pure-JAX reference ---------------------------

def spatial_attention_ref(x, conv_weight):
    avg = jnp.mean(x, axis=1, keepdims=True)
    mx = jnp.max(x, axis=1, keepdims=True)
    y = jnp.concatenate([avg, mx], axis=1)                      # (B, 2, H, W)
    y = jax.lax.conv_general_dilated(
        y, conv_weight, window_strides=(1, 1), padding=((3, 3), (3, 3)),
        dimension_numbers=('NCHW', 'OIHW', 'NCHW'),
        precision=jax.lax.Precision.HIGHEST)
    return jax.nn.sigmoid(y) * x


# ---------------------------------- main --------------------------------------

if __name__ == "__main__":
    B, C, H, W = 2, 4, 16, 16
    key = jax.random.PRNGKey(0)
    kx, kw = jax.random.split(key)
    x = jax.random.normal(kx, (B, C, H, W), jnp.float32)
    conv_w = 0.1 * jax.random.normal(kw, (1, 2, 7, 7), jnp.float32)

    out = jax.jit(spatial_attention)(x, conv_w)
    jax.block_until_ready(out)

    ref = spatial_attention_ref(x, conv_w)
    assert out.shape == x.shape, out.shape
    assert bool(jnp.all(jnp.isfinite(out)))
    max_err = float(jnp.max(jnp.abs(out - ref)))
    assert max_err < 1e-4, f"max abs err {max_err}"
    print("KERNEL_OK")
</pallas_src>

<mosaic_0001>
module attributes {stable_mosaic.version = 11 : i64} {
  func.func @_spatial_attention_kernel(%arg0: i32, %arg1: memref<1x4x16x16xf32, #tpu.memory_space<vmem>>, %arg2: memref<98xf32, #tpu.memory_space<smem>>, %arg3: memref<1x4x16x16xf32, #tpu.memory_space<vmem>>) attributes {dimension_semantics = [#tpu.dimension_semantics<parallel>], iteration_bounds = array<i64: 2>, scalar_prefetch = 0 : i64, scratch_operands = 0 : i64, tpu.core_type = #tpu.core_type<tc>, window_params = [{transform_indices = @transform_0, window_bounds = array<i64: 1, 4, 16, 16>}, {transform_indices = @transform_1, window_bounds = array<i64: 98>}, {transform_indices = @transform_2, window_bounds = array<i64: 1, 4, 16, 16>}]} {
    %c0 = arith.constant 0 : index
    %c0_0 = arith.constant 0 : index
    %c0_1 = arith.constant 0 : index
    %c0_2 = arith.constant 0 : index
    %0 = vector.load %arg1[%c0, %c0_0, %c0_1, %c0_2] : memref<1x4x16x16xf32, #tpu.memory_space<vmem>>, vector<1x4x16x16xf32>
    %cst = arith.constant dense<0.000000e+00> : vector<1x16x16xf32>
    %1 = vector.multi_reduction <add>, %0, %cst [1] : vector<1x4x16x16xf32> to vector<1x16x16xf32>
    %cst_3 = arith.constant 4.000000e+00 : f32
    %2 = vector.broadcast %cst_3 : f32 to vector<1x16x16xf32>
    %3 = arith.divf %1, %2 : vector<1x16x16xf32>
    %cst_4 = arith.constant dense<0xFF800000> : vector<1x16x16xf32>
    %4 = vector.multi_reduction <maximumf>, %0, %cst_4 [1] : vector<1x4x16x16xf32> to vector<1x16x16xf32>
    %cst_5 = arith.constant 0.000000e+00 : f32
    %5 = vector.broadcast %cst_5 : f32 to vector<1x16x16xf32>
    %cst_6 = arith.constant 0.000000e+00 : f32
    %6 = vector.broadcast %cst_6 : f32 to vector<1x3x16xf32>
    %7 = vector.extract_strided_slice %3 {offsets = [0, 0, 0], sizes = [1, 13, 16], strides = [1, 1, 1]} : vector<1x16x16xf32> to vector<1x13x16xf32>
    %8 = tpu.concatenate %6, %7 in 1 : vector<1x3x16xf32>, vector<1x13x16xf32> -> vector<1x16x16xf32>
    %cst_7 = arith.constant 0.000000e+00 : f32
    %9 = vector.broadcast %cst_7 : f32 to vector<1x3x16xf32>
    %10 = vector.extract_strided_slice %4 {offsets = [0, 0, 0], sizes = [1, 13, 16], strides = [1, 1, 1]} : vector<1x16x16xf32> to vector<1x13x16xf32>
    %11 = tpu.concatenate %9, %10 in 1 : vector<1x3x16xf32>, vector<1x13x16xf32> -> vector<1x16x16xf32>
    %cst_8 = arith.constant 0.000000e+00 : f32
    %12 = vector.broadcast %cst_8 : f32 to vector<1x16x3xf32>
    %13 = vector.extract_strided_slice %8 {offsets = [0, 0, 0], sizes = [1, 16, 13], strides = [1, 1, 1]} : vector<1x16x16xf32> to vector<1x16x13xf32>
    %14 = tpu.concatenate %12, %13 in 2 : vector<1x16x3xf32>, vector<1x16x13xf32> -> vector<1x16x16xf32>
    %cst_9 = arith.constant 0.000000e+00 : f32
    %15 = vector.broadcast %cst_9 : f32 to vector<1x16x3xf32>
    %16 = vector.extract_strided_slice %11 {offsets = [0, 0, 0], sizes = [1, 16, 13], strides = [1, 1, 1]} : vector<1x16x16xf32> to vector<1x16x13xf32>
    %17 = tpu.concatenate %15, %16 in 2 : vector<1x16x3xf32>, vector<1x16x13xf32> -> vector<1x16x16xf32>
    %c0_10 = arith.constant 0 : index
    %18 = memref.load %arg2[%c0_10] : memref<98xf32, #tpu.memory_space<smem>>
    %19 = vector.broadcast %18 : f32 to vector<1x16x16xf32>
    %20 = arith.mulf %19, %14 : vector<1x16x16xf32>
    %21 = arith.addf %5, %20 : vector<1x16x16xf32>
    %c49 = arith.constant 49 : index
    %22 = memref.load %arg2[%c49] : memref<98xf32, #tpu.memory_space<smem>>
    %23 = vector.broadcast %22 : f32 to vector<1x16x16xf32>
    %24 = arith.mulf %23, %17 : vector<1x16x16xf32>
    %25 = arith.addf %21, %24 : vector<1x16x16xf32>
    %cst_11 = arith.constant 0.000000e+00 : f32
    %26 = vector.broadcast %cst_11 : f32 to vector<1x16x2xf32>
    %27 = vector.extract_strided_slice %8 {offsets = [0, 0, 0], sizes = [1, 16, 14], strides = [1, 1, 1]} : vector<1x16x16xf32> to vector<1x16x14xf32>
    %28 = tpu.concatenate %26, %27 in 2 : vector<1x16x2xf32>, vector<1x16x14xf32> -> vector<1x16x16xf32>
    %cst_12 = arith.constant 0.000000e+00 : f32
    %29 = vector.broadcast %cst_12 : f32 to vector<1x16x2xf32>
    %30 = vector.extract_strided_slice %11 {offsets = [0, 0, 0], sizes = [1, 16, 14], strides = [1, 1, 1]} : vector<1x16x16xf32> to vector<1x16x14xf32>
    %31 = tpu.concatenate %29, %30 in 2 : vector<1x16x2xf32>, vector<1x16x14xf32> -> vector<1x16x16xf32>
    %c1 = arith.constant 1 : index
    %32 = memref.load %arg2[%c1] : memref<98xf32, #tpu.memory_space<smem>>
    %33 = vector.broadcast %32 : f32 to vector<1x16x16xf32>
    %34 = arith.mulf %33, %28 : vector<1x16x16xf32>
    %35 = arith.addf %25, %34 : vector<1x16x16xf32>
    %c50 = arith.constant 50 : index
    %36 = memref.load %arg2[%c50] : memref<98xf32, #tpu.memory_space<smem>>
    %37 = vector.broadcast %36 : f32 to vector<1x16x16xf32>
    %38 = arith.mulf %37, %31 : vector<1x16x16xf32>
    %39 = arith.addf %35, %38 : vector<1x16x16xf32>
    %cst_13 = arith.constant 0.000000e+00 : f32
    %40 = vector.broadcast %cst_13 : f32 to vector<1x16x1xf32>
    %41 = vector.extract_strided_slice %8 {offsets = [0, 0, 0], sizes = [1, 16, 15], strides = [1, 1, 1]} : vector<1x16x16xf32> to vector<1x16x15xf32>
    %42 = tpu.concatenate %40, %41 in 2 : vector<1x16x1xf32>, vector<1x16x15xf32> -> vector<1x16x16xf32>
    %cst_14 = arith.constant 0.000000e+00 : f32
    %43 = vector.broadcast %cst_14 : f32 to vector<1x16x1xf32>
    %44 = vector.extract_strided_slice %11 {offsets = [0, 0, 0], sizes = [1, 16, 15], strides = [1, 1, 1]} : vector<1x16x16xf32> to vector<1x16x15xf32>
    %45 = tpu.concatenate %43, %44 in 2 : vector<1x16x1xf32>, vector<1x16x15xf32> -> vector<1x16x16xf32>
    %c2 = arith.constant 2 : index
    %46 = memref.load %arg2[%c2] : memref<98xf32, #tpu.memory_space<smem>>
    %47 = vector.broadcast %46 : f32 to vector<1x16x16xf32>
    %48 = arith.mulf %47, %42 : vector<1x16x16xf32>
    %49 = arith.addf %39, %48 : vector<1x16x16xf32>
    %c51 = arith.constant 51 : index
    %50 = memref.load %arg2[%c51] : memref<98xf32, #tpu.memory_space<smem>>
    %51 = vector.broadcast %50 : f32 to vector<1x16x16xf32>
    %52 = arith.mulf %51, %45 : vector<1x16x16xf32>
    %53 = arith.addf %49, %52 : vector<1x16x16xf32>
    %c3 = arith.constant 3 : index
    %54 = memref.load %arg2[%c3] : memref<98xf32, #tpu.memory_space<smem>>
    %55 = vector.broadcast %54 : f32 to vector<1x16x16xf32>
    %56 = arith.mulf %55, %8 : vector<1x16x16xf32>
    %57 = arith.addf %53, %56 : vector<1x16x16xf32>
    %c52 = arith.constant 52 : index
    %58 = memref.load %arg2[%c52] : memref<98xf32, #tpu.memory_space<smem>>
    %59 = vector.broadcast %58 : f32 to vector<1x16x16xf32>
    %60 = arith.mulf %59, %11 : vector<1x16x16xf32>
    %61 = arith.addf %57, %60 : vector<1x16x16xf32>
    %cst_15 = arith.constant 0.000000e+00 : f32
    %62 = vector.broadcast %cst_15 : f32 to vector<1x16x1xf32>
    %63 = vector.extract_strided_slice %8 {offsets = [0, 0, 1], sizes = [1, 16, 15], strides = [1, 1, 1]} : vector<1x16x16xf32> to vector<1x16x15xf32>
    %64 = tpu.concatenate %63, %62 in 2 : vector<1x16x15xf32>, vector<1x16x1xf32> -> vector<1x16x16xf32>
    %cst_16 = arith.constant 0.000000e+00 : f32
    %65 = vector.broadcast %cst_16 : f32 to vector<1x16x1xf32>
    %66 = vector.extract_strided_slice %11 {offsets = [0, 0, 1], sizes = [1, 16, 15], strides = [1, 1, 1]} : vector<1x16x16xf32> to vector<1x16x15xf32>
    %67 = tpu.concatenate %66, %65 in 2 : vector<1x16x15xf32>, vector<1x16x1xf32> -> vector<1x16x16xf32>
    %c4 = arith.constant 4 : index
    %68 = memref.load %arg2[%c4] : memref<98xf32, #tpu.memory_space<smem>>
    %69 = vector.broadcast %68 : f32 to vector<1x16x16xf32>
    %70 = arith.mulf %69, %64 : vector<1x16x16xf32>
    %71 = arith.addf %61, %70 : vector<1x16x16xf32>
    %c53 = arith.constant 53 : index
    %72 = memref.load %arg2[%c53] : memref<98xf32, #tpu.memory_space<smem>>
    %73 = vector.broadcast %72 : f32 to vector<1x16x16xf32>
    %74 = arith.mulf %73, %67 : vector<1x16x16xf32>
    %75 = arith.addf %71, %74 : vector<1x16x16xf32>
    %cst_17 = arith.constant 0.000000e+00 : f32
    %76 = vector.broadcast %cst_17 : f32 to vector<1x16x2xf32>
    %77 = vector.extract_strided_slice %8 {offsets = [0, 0, 2], sizes = [1, 16, 14], strides = [1, 1, 1]} : vector<1x16x16xf32> to vector<1x16x14xf32>
    %78 = tpu.concatenate %77, %76 in 2 : vector<1x16x14xf32>, vector<1x16x2xf32> -> vector<1x16x16xf32>
    %cst_18 = arith.constant 0.000000e+00 : f32
    %79 = vector.broadcast %cst_18 : f32 to vector<1x16x2xf32>
    %80 = vector.extract_strided_slice %11 {offsets = [0, 0, 2], sizes = [1, 16, 14], strides = [1, 1, 1]} : vector<1x16x16xf32> to vector<1x16x14xf32>
    %81 = tpu.concatenate %80, %79 in 2 : vector<1x16x14xf32>, vector<1x16x2xf32> -> vector<1x16x16xf32>
    %c5 = arith.constant 5 : index
    %82 = memref.load %arg2[%c5] : memref<98xf32, #tpu.memory_space<smem>>
    %83 = vector.broadcast %82 : f32 to vector<1x16x16xf32>
    %84 = arith.mulf %83, %78 : vector<1x16x16xf32>
    %85 = arith.addf %75, %84 : vector<1x16x16xf32>
    %c54 = arith.constant 54 : index
    %86 = memref.load %arg2[%c54] : memref<98xf32, #tpu.memory_space<smem>>
    %87 = vector.broadcast %86 : f32 to vector<1x16x16xf32>
    %88 = arith.mulf %87, %81 : vector<1x16x16xf32>
    %89 = arith.addf %85, %88 : vector<1x16x16xf32>
    %cst_19 = arith.constant 0.000000e+00 : f32
    %90 = vector.broadcast %cst_19 : f32 to vector<1x16x3xf32>
    %91 = vector.extract_strided_slice %8 {offsets = [0, 0, 3], sizes = [1, 16, 13], strides = [1, 1, 1]} : vector<1x16x16xf32> to vector<1x16x13xf32>
    %92 = tpu.concatenate %91, %90 in 2 : vector<1x16x13xf32>, vector<1x16x3xf32> -> vector<1x16x16xf32>
    %cst_20 = arith.constant 0.000000e+00 : f32
    %93 = vector.broadcast %cst_20 : f32 to vector<1x16x3xf32>
    %94 = vector.extract_strided_slice %11 {offsets = [0, 0, 3], sizes = [1, 16, 13], strides = [1, 1, 1]} : vector<1x16x16xf32> to vector<1x16x13xf32>
    %95 = tpu.concatenate %94, %93 in 2 : vector<1x16x13xf32>, vector<1x16x3xf32> -> vector<1x16x16xf32>
    %c6 = arith.constant 6 : index
    %96 = memref.load %arg2[%c6] : memref<98xf32, #tpu.memory_space<smem>>
    %97 = vector.broadcast %96 : f32 to vector<1x16x16xf32>
    %98 = arith.mulf %97, %92 : vector<1x16x16xf32>
    %99 = arith.addf %89, %98 : vector<1x16x16xf32>
    %c55 = arith.constant 55 : index
    %100 = memref.load %arg2[%c55] : memref<98xf32, #tpu.memory_space<smem>>
    %101 = vector.broadcast %100 : f32 to vector<1x16x16xf32>
    %102 = arith.mulf %101, %95 : vector<1x16x16xf32>
    %103 = arith.addf %99, %102 : vector<1x16x16xf32>
    %cst_21 = arith.constant 0.000000e+00 : f32
    %104 = vector.broadcast %cst_21 : f32 to vector<1x2x16xf32>
    %105 = vector.extract_strided_slice %3 {offsets = [0, 0, 0], sizes = [1, 14, 16], strides = [1, 1, 1]} : vector<1x16x16xf32> to vector<1x14x16xf32>
    %106 = tpu.concatenate %104, %105 in 1 : vector<1x2x16xf32>, vector<1x14x16xf32> -> vector<1x16x16xf32>
    %cst_22 = arith.constant 0.000000e+00 : f32
    %107 = vector.broadcast %cst_22 : f32 to vector<1x2x16xf32>
    %108 = vector.extract_strided_slice %4 {offsets = [0, 0, 0], sizes = [1, 14, 16], strides = [1, 1, 1]} : vector<1x16x16xf32> to vector<1x14x16xf32>
    %109 = tpu.concatenate %107, %108 in 1 : vector<1x2x16xf32>, vector<1x14x16xf32> -> vector<1x16x16xf32>
    %cst_23 = arith.constant 0.000000e+00 : f32
    %110 = vector.broadcast %cst_23 : f32 to vector<1x16x3xf32>
    %111 = vector.extract_strided_slice %106 {offsets = [0, 0, 0], sizes = [1, 16, 13], strides = [1, 1, 1]} : vector<1x16x16xf32> to vector<1x16x13xf32>
    %112 = tpu.concatenate %110, %111 in 2 : vector<1x16x3xf32>, vector<1x16x13xf32> -> vector<1x16x16xf32>
    %cst_24 = arith.constant 0.000000e+00 : f32
    %113 = vector.broadcast %cst_24 : f32 to vector<1x16x3xf32>
    %114 = vector.extract_strided_slice %109 {offsets = [0, 0, 0], sizes = [1, 16, 13], strides = [1, 1, 1]} : vector<1x16x16xf32> to vector<1x16x13xf32>
    %115 = tpu.concatenate %113, %114 in 2 : vector<1x16x3xf32>, vector<1x16x13xf32> -> vector<1x16x16xf32>
    %c7 = arith.constant 7 : index
    %116 = memref.load %arg2[%c7] : memref<98xf32, #tpu.memory_space<smem>>
    %117 = vector.broadcast %116 : f32 to vector<1x16x16xf32>
    %118 = arith.mulf %117, %112 : vector<1x16x16xf32>
    %119 = arith.addf %103, %118 : vector<1x16x16xf32>
    %c56 = arith.constant 56 : index
    %120 = memref.load %arg2[%c56] : memref<98xf32, #tpu.memory_space<smem>>
    %121 = vector.broadcast %120 : f32 to vector<1x16x16xf32>
    %122 = arith.mulf %121, %115 : vector<1x16x16xf32>
    %123 = arith.addf %119, %122 : vector<1x16x16xf32>
    %cst_25 = arith.constant 0.000000e+00 : f32
    %124 = vector.broadcast %cst_25 : f32 to vector<1x16x2xf32>
    %125 = vector.extract_strided_slice %106 {offsets = [0, 0, 0], sizes = [1, 16, 14], strides = [1, 1, 1]} : vector<1x16x16xf32> to vector<1x16x14xf32>
    %126 = tpu.concatenate %124, %125 in 2 : vector<1x16x2xf32>, vector<1x16x14xf32> -> vector<1x16x16xf32>
    %cst_26 = arith.constant 0.000000e+00 : f32
    %127 = vector.broadcast %cst_26 : f32 to vector<1x16x2xf32>
    %128 = vector.extract_strided_slice %109 {offsets = [0, 0, 0], sizes = [1, 16, 14], strides = [1, 1, 1]} : vector<1x16x16xf32> to vector<1x16x14xf32>
    %129 = tpu.concatenate %127, %128 in 2 : vector<1x16x2xf32>, vector<1x16x14xf32> -> vector<1x16x16xf32>
    %c8 = arith.constant 8 : index
    %130 = memref.load %arg2[%c8] : memref<98xf32, #tpu.memory_space<smem>>
    %131 = vector.broadcast %130 : f32 to vector<1x16x16xf32>
    %132 = arith.mulf %131, %126 : vector<1x16x16xf32>
    %133 = arith.addf %123, %132 : vector<1x16x16xf32>
    %c57 = arith.constant 57 : index
    %134 = memref.load %arg2[%c57] : memref<98xf32, #tpu.memory_space<smem>>
    %135 = vector.broadcast %134 : f32 to vector<1x16x16xf32>
    %136 = arith.mulf %135, %129 : vector<1x16x16xf32>
    %137 = arith.addf %133, %136 : vector<1x16x16xf32>
    %cst_27 = arith.constant 0.000000e+00 : f32
    %138 = vector.broadcast %cst_27 : f32 to vector<1x16x1xf32>
    %139 = vector.extract_strided_slice %106 {offsets = [0, 0, 0], sizes = [1, 16, 15], strides = [1, 1, 1]} : vector<1x16x16xf32> to vector<1x16x15xf32>
    %140 = tpu.concatenate %138, %139 in 2 : vector<1x16x1xf32>, vector<1x16x15xf32> -> vector<1x16x16xf32>
    %cst_28 = arith.constant 0.000000e+00 : f32
    %141 = vector.broadcast %cst_28 : f32 to vector<1x16x1xf32>
    %142 = vector.extract_strided_slice %109 {offsets = [0, 0, 0], sizes = [1, 16, 15], strides = [1, 1, 1]} : vector<1x16x16xf32> to vector<1x16x15xf32>
    %143 = tpu.concatenate %141, %142 in 2 : vector<1x16x1xf32>, vector<1x16x15xf32> -> vector<1x16x16xf32>
    %c9 = arith.constant 9 : index
    %144 = memref.load %arg2[%c9] : memref<98xf32, #tpu.memory_space<smem>>
    %145 = vector.broadcast %144 : f32 to vector<1x16x16xf32>
    %146 = arith.mulf %145, %140 : vector<1x16x16xf32>
    %147 = arith.addf %137, %146 : vector<1x16x16xf32>
    %c58 = arith.constant 58 : index
    %148 = memref.load %arg2[%c58] : memref<98xf32, #tpu.memory_space<smem>>
    %149 = vector.broadcast %148 : f32 to vector<1x16x16xf32>
    %150 = arith.mulf %149, %143 : vector<1x16x16xf32>
    %151 = arith.addf %147, %150 : vector<1x16x16xf32>
    %c10 = arith.constant 10 : index
    %152 = memref.load %arg2[%c10] : memref<98xf32, #tpu.memory_space<smem>>
    %153 = vector.broadcast %152 : f32 to vector<1x16x16xf32>
    %154 = arith.mulf %153, %106 : vector<1x16x16xf32>
    %155 = arith.addf %151, %154 : vector<1x16x16xf32>
    %c59 = arith.constant 59 : index
    %156 = memref.load %arg2[%c59] : memref<98xf32, #tpu.memory_space<smem>>
    %157 = vector.broadcast %156 : f32 to vector<1x16x16xf32>
    %158 = arith.mulf %157, %109 : vector<1x16x16xf32>
    %159 = arith.addf %155, %158 : vector<1x16x16xf32>
    %cst_29 = arith.constant 0.000000e+00 : f32
    %160 = vector.broadcast %cst_29 : f32 to vector<1x16x1xf32>
    %161 = vector.extract_strided_slice %106 {offsets = [0, 0, 1], sizes = [1, 16, 15], strides = [1, 1, 1]} : vector<1x16x16xf32> to vector<1x16x15xf32>
    %162 = tpu.concatenate %161, %160 in 2 : vector<1x16x15xf32>, vector<1x16x1xf32> -> vector<1x16x16xf32>
    %cst_30 = arith.constant 0.000000e+00 : f32
    %163 = vector.broadcast %cst_30 : f32 to vector<1x16x1xf32>
    %164 = vector.extract_strided_slice %109 {offsets = [0, 0, 1], sizes = [1, 16, 15], strides = [1, 1, 1]} : vector<1x16x16xf32> to vector<1x16x15xf32>
    %165 = tpu.concatenate %164, %163 in 2 : vector<1x16x15xf32>, vector<1x16x1xf32> -> vector<1x16x16xf32>
    %c11 = arith.constant 11 : index
    %166 = memref.load %arg2[%c11] : memref<98xf32, #tpu.memory_space<smem>>
    %167 = vector.broadcast %166 : f32 to vector<1x16x16xf32>
    %168 = arith.mulf %167, %162 : vector<1x16x16xf32>
    %169 = arith.addf %159, %168 : vector<1x16x16xf32>
    %c60 = arith.constant 60 : index
    %170 = memref.load %arg2[%c60] : memref<98xf32, #tpu.memory_space<smem>>
    %171 = vector.broadcast %170 : f32 to vector<1x16x16xf32>
    %172 = arith.mulf %171, %165 : vector<1x16x16xf32>
    %173 = arith.addf %169, %172 : vector<1x16x16xf32>
    %cst_31 = arith.constant 0.000000e+00 : f32
    %174 = vector.broadcast %cst_31 : f32 to vector<1x16x2xf32>
    %175 = vector.extract_strided_slice %106 {offsets = [0, 0, 2], sizes = [1, 16, 14], strides = [1, 1, 1]} : vector<1x16x16xf32> to vector<1x16x14xf32>
    %176 = tpu.concatenate %175, %174 in 2 : vector<1x16x14xf32>, vector<1x16x2xf32> -> vector<1x16x16xf32>
    %cst_32 = arith.constant 0.000000e+00 : f32
    %177 = vector.broadcast %cst_32 : f32 to vector<1x16x2xf32>
    %178 = vector.extract_strided_slice %109 {offsets = [0, 0, 2], sizes = [1, 16, 14], strides = [1, 1, 1]} : vector<1x16x16xf32> to vector<1x16x14xf32>
    %179 = tpu.concatenate %178, %177 in 2 : vector<1x16x14xf32>, vector<1x16x2xf32> -> vector<1x16x16xf32>
    %c12 = arith.constant 12 : index
    %180 = memref.load %arg2[%c12] : memref<98xf32, #tpu.memory_space<smem>>
    %181 = vector.broadcast %180 : f32 to vector<1x16x16xf32>
    %182 = arith.mulf %181, %176 : vector<1x16x16xf32>
    %183 = arith.addf %173, %182 : vector<1x16x16xf32>
    %c61 = arith.constant 61 : index
    %184 = memref.load %arg2[%c61] : memref<98xf32, #tpu.memory_space<smem>>
    %185 = vector.broadcast %184 : f32 to vector<1x16x16xf32>
    %186 = arith.mulf %185, %179 : vector<1x16x16xf32>
    %187 = arith.addf %183, %186 : vector<1x16x16xf32>
    %cst_33 = arith.constant 0.000000e+00 : f32
    %188 = vector.broadcast %cst_33 : f32 to vector<1x16x3xf32>
    %189 = vector.extract_strided_slice %106 {offsets = [0, 0, 3], sizes = [1, 16, 13], strides = [1, 1, 1]} : vector<1x16x16xf32> to vector<1x16x13xf32>
    %190 = tpu.concatenate %189, %188 in 2 : vector<1x16x13xf32>, vector<1x16x3xf32> -> vector<1x16x16xf32>
    %cst_34 = arith.constant 0.000000e+00 : f32
    %191 = vector.broadcast %cst_34 : f32 to vector<1x16x3xf32>
    %192 = vector.extract_strided_slice %109 {offsets = [0, 0, 3], sizes = [1, 16, 13], strides = [1, 1, 1]} : vector<1x16x16xf32> to vector<1x16x13xf32>
    %193 = tpu.concatenate %192, %191 in 2 : vector<1x16x13xf32>, vector<1x16x3xf32> -> vector<1x16x16xf32>
    %c13 = arith.constant 13 : index
    %194 = memref.load %arg2[%c13] : memref<98xf32, #tpu.memory_space<smem>>
    %195 = vector.broadcast %194 : f32 to vector<1x16x16xf32>
    %196 = arith.mulf %195, %190 : vector<1x16x16xf32>
    %197 = arith.addf %187, %196 : vector<1x16x16xf32>
    %c62 = arith.constant 62 : index
    %198 = memref.load %arg2[%c62] : memref<98xf32, #tpu.memory_space<smem>>
    %199 = vector.broadcast %198 : f32 to vector<1x16x16xf32>
    %200 = arith.mulf %199, %193 : vector<1x16x16xf32>
    %201 = arith.addf %197, %200 : vector<1x16x16xf32>
    %cst_35 = arith.constant 0.000000e+00 : f32
    %202 = vector.broadcast %cst_35 : f32 to vector<1x1x16xf32>
    %203 = vector.extract_strided_slice %3 {offsets = [0, 0, 0], sizes = [1, 15, 16], strides = [1, 1, 1]} : vector<1x16x16xf32> to vector<1x15x16xf32>
    %204 = tpu.concatenate %202, %203 in 1 : vector<1x1x16xf32>, vector<1x15x16xf32> -> vector<1x16x16xf32>
    %cst_36 = arith.constant 0.000000e+00 : f32
    %205 = vector.broadcast %cst_36 : f32 to vector<1x1x16xf32>
    %206 = vector.extract_strided_slice %4 {offsets = [0, 0, 0], sizes = [1, 15, 16], strides = [1, 1, 1]} : vector<1x16x16xf32> to vector<1x15x16xf32>
    %207 = tpu.concatenate %205, %206 in 1 : vector<1x1x16xf32>, vector<1x15x16xf32> -> vector<1x16x16xf32>
    %cst_37 = arith.constant 0.000000e+00 : f32
    %208 = vector.broadcast %cst_37 : f32 to vector<1x16x3xf32>
    %209 = vector.extract_strided_slice %204 {offsets = [0, 0, 0], sizes = [1, 16, 13], strides = [1, 1, 1]} : vector<1x16x16xf32> to vector<1x16x13xf32>
    %210 = tpu.concatenate %208, %209 in 2 : vector<1x16x3xf32>, vector<1x16x13xf32> -> vector<1x16x16xf32>
    %cst_38 = arith.constant 0.000000e+00 : f32
    %211 = vector.broadcast %cst_38 : f32 to vector<1x16x3xf32>
    %212 = vector.extract_strided_slice %207 {offsets = [0, 0, 0], sizes = [1, 16, 13], strides = [1, 1, 1]} : vector<1x16x16xf32> to vector<1x16x13xf32>
    %213 = tpu.concatenate %211, %212 in 2 : vector<1x16x3xf32>, vector<1x16x13xf32> -> vector<1x16x16xf32>
    %c14 = arith.constant 14 : index
    %214 = memref.load %arg2[%c14] : memref<98xf32, #tpu.memory_space<smem>>
    %215 = vector.broadcast %214 : f32 to vector<1x16x16xf32>
    %216 = arith.mulf %215, %210 : vector<1x16x16xf32>
    %217 = arith.addf %201, %216 : vector<1x16x16xf32>
    %c63 = arith.constant 63 : index
    %218 = memref.load %arg2[%c63] : memref<98xf32, #tpu.memory_space<smem>>
    %219 = vector.broadcast %218 : f32 to vector<1x16x16xf32>
    %220 = arith.mulf %219, %213 : vector<1x16x16xf32>
    %221 = arith.addf %217, %220 : vector<1x16x16xf32>
    %cst_39 = arith.constant 0.000000e+00 : f32
    %222 = vector.broadcast %cst_39 : f32 to vector<1x16x2xf32>
    %223 = vector.extract_strided_slice %204 {offsets = [0, 0, 0], sizes = [1, 16, 14], strides = [1, 1, 1]} : vector<1x16x16xf32> to vector<1x16x14xf32>
    %224 = tpu.concatenate %222, %223 in 2 : vector<1x16x2xf32>, vector<1x16x14xf32> -> vector<1x16x16xf32>
    %cst_40 = arith.constant 0.000000e+00 : f32
    %225 = vector.broadcast %cst_40 : f32 to vector<1x16x2xf32>
    %226 = vector.extract_strided_slice %207 {offsets = [0, 0, 0], sizes = [1, 16, 14], strides = [1, 1, 1]} : vector<1x16x16xf32> to vector<1x16x14xf32>
    %227 = tpu.concatenate %225, %226 in 2 : vector<1x16x2xf32>, vector<1x16x14xf32> -> vector<1x16x16xf32>
    %c15 = arith.constant 15 : index
    %228 = memref.load %arg2[%c15] : memref<98xf32, #tpu.memory_space<smem>>
    %229 = vector.broadcast %228 : f32 to vector<1x16x16xf32>
    %230 = arith.mulf %229, %224 : vector<1x16x16xf32>
    %231 = arith.addf %221, %230 : vector<1x16x16xf32>
    %c64 = arith.constant 64 : index
    %232 = memref.load %arg2[%c64] : memref<98xf32, #tpu.memory_space<smem>>
    %233 = vector.broadcast %232 : f32 to vector<1x16x16xf32>
    %234 = arith.mulf %233, %227 : vector<1x16x16xf32>
    %235 = arith.addf %231, %234 : vector<1x16x16xf32>
    %cst_41 = arith.constant 0.000000e+00 : f32
    %236 = vector.broadcast %cst_41 : f32 to vector<1x16x1xf32>
    %237 = vector.extract_strided_slice %204 {offsets = [0, 0, 0], sizes = [1, 16, 15], strides = [1, 1, 1]} : vector<1x16x16xf32> to vector<1x16x15xf32>
    %238 = tpu.concatenate %236, %237 in 2 : vector<1x16x1xf32>, vector<1x16x15xf32> -> vector<1x16x16xf32>
    %cst_42 = arith.constant 0.000000e+00 : f32
    %239 = vector.broadcast %cst_42 : f32 to vector<1x16x1xf32>
    %240 = vector.extract_strided_slice %207 {offsets = [0, 0, 0], sizes = [1, 16, 15], strides = [1, 1, 1]} : vector<1x16x16xf32> to vector<1x16x15xf32>
    %241 = tpu.concatenate %239, %240 in 2 : vector<1x16x1xf32>, vector<1x16x15xf32> -> vector<1x16x16xf32>
    %c16 = arith.constant 16 : index
    %242 = memref.load %arg2[%c16] : memref<98xf32, #tpu.memory_space<smem>>
    %243 = vector.broadcast %242 : f32 to vector<1x16x16xf32>
    %244 = arith.mulf %243, %238 : vector<1x16x16xf32>
    %245 = arith.addf %235, %244 : vector<1x16x16xf32>
    %c65 = arith.constant 65 : index
    %246 = memref.load %arg2[%c65] : memref<98xf32, #tpu.memory_space<smem>>
    %247 = vector.broadcast %246 : f32 to vector<1x16x16xf32>
    %248 = arith.mulf %247, %241 : vector<1x16x16xf32>
    %249 = arith.addf %245, %248 : vector<1x16x16xf32>
    %c17 = arith.constant 17 : index
    %250 = memref.load %arg2[%c17] : memref<98xf32, #tpu.memory_space<smem>>
    %251 = vector.broadcast %250 : f32 to vector<1x16x16xf32>
    %252 = arith.mulf %251, %204 : vector<1x16x16xf32>
    %253 = arith.addf %249, %252 : vector<1x16x16xf32>
    %c66 = arith.constant 66 : index
    %254 = memref.load %arg2[%c66] : memref<98xf32, #tpu.memory_space<smem>>
    %255 = vector.broadcast %254 : f32 to vector<1x16x16xf32>
    %256 = arith.mulf %255, %207 : vector<1x16x16xf32>
    %257 = arith.addf %253, %256 : vector<1x16x16xf32>
    %cst_43 = arith.constant 0.000000e+00 : f32
    %258 = vector.broadcast %cst_43 : f32 to vector<1x16x1xf32>
    %259 = vector.extract_strided_slice %204 {offsets = [0, 0, 1], sizes = [1, 16, 15], strides = [1, 1, 1]} : vector<1x16x16xf32> to vector<1x16x15xf32>
    %260 = tpu.concatenate %259, %258 in 2 : vector<1x16x15xf32>, vector<1x16x1xf32> -> vector<1x16x16xf32>
    %cst_44 = arith.constant 0.000000e+00 : f32
    %261 = vector.broadcast %cst_44 : f32 to vector<1x16x1xf32>
    %262 = vector.extract_strided_slice %207 {offsets = [0, 0, 1], sizes = [1, 16, 15], strides = [1, 1, 1]} : vector<1x16x16xf32> to vector<1x16x15xf32>
    %263 = tpu.concatenate %262, %261 in 2 : vector<1x16x15xf32>, vector<1x16x1xf32> -> vector<1x16x16xf32>
    %c18 = arith.constant 18 : index
    %264 = memref.load %arg2[%c18] : memref<98xf32, #tpu.memory_space<smem>>
    %265 = vector.broadcast %264 : f32 to vector<1x16x16xf32>
    %266 = arith.mulf %265, %260 : vector<1x16x16xf32>
    %267 = arith.addf %257, %266 : vector<1x16x16xf32>
    %c67 = arith.constant 67 : index
    %268 = memref.load %arg2[%c67] : memref<98xf32, #tpu.memory_space<smem>>
    %269 = vector.broadcast %268 : f32 to vector<1x16x16xf32>
    %270 = arith.mulf %269, %263 : vector<1x16x16xf32>
    %271 = arith.addf %267, %270 : vector<1x16x16xf32>
    %cst_45 = arith.constant 0.000000e+00 : f32
    %272 = vector.broadcast %cst_45 : f32 to vector<1x16x2xf32>
    %273 = vector.extract_strided_slice %204 {offsets = [0, 0, 2], sizes = [1, 16, 14], strides = [1, 1, 1]} : vector<1x16x16xf32> to vector<1x16x14xf32>
    %274 = tpu.concatenate %273, %272 in 2 : vector<1x16x14xf32>, vector<1x16x2xf32> -> vector<1x16x16xf32>
    %cst_46 = arith.constant 0.000000e+00 : f32
    %275 = vector.broadcast %cst_46 : f32 to vector<1x16x2xf32>
    %276 = vector.extract_strided_slice %207 {offsets = [0, 0, 2], sizes = [1, 16, 14], strides = [1, 1, 1]} : vector<1x16x16xf32> to vector<1x16x14xf32>
    %277 = tpu.concatenate %276, %275 in 2 : vector<1x16x14xf32>, vector<1x16x2xf32> -> vector<1x16x16xf32>
    %c19 = arith.constant 19 : index
    %278 = memref.load %arg2[%c19] : memref<98xf32, #tpu.memory_space<smem>>
    %279 = vector.broadcast %278 : f32 to vector<1x16x16xf32>
    %280 = arith.mulf %279, %274 : vector<1x16x16xf32>
    %281 = arith.addf %271, %280 : vector<1x16x16xf32>
    %c68 = arith.constant 68 : index
    %282 = memref.load %arg2[%c68] : memref<98xf32, #tpu.memory_space<smem>>
    %283 = vector.broadcast %282 : f32 to vector<1x16x16xf32>
    %284 = arith.mulf %283, %277 : vector<1x16x16xf32>
    %285 = arith.addf %281, %284 : vector<1x16x16xf32>
    %cst_47 = arith.constant 0.000000e+00 : f32
    %286 = vector.broadcast %cst_47 : f32 to vector<1x16x3xf32>
    %287 = vector.extract_strided_slice %204 {offsets = [0, 0, 3], sizes = [1, 16, 13], strides = [1, 1, 1]} : vector<1x16x16xf32> to vector<1x16x13xf32>
    %288 = tpu.concatenate %287, %286 in 2 : vector<1x16x13xf32>, vector<1x16x3xf32> -> vector<1x16x16xf32>
    %cst_48 = arith.constant 0.000000e+00 : f32
    %289 = vector.broadcast %cst_48 : f32 to vector<1x16x3xf32>
    %290 = vector.extract_strided_slice %207 {offsets = [0, 0, 3], sizes = [1, 16, 13], strides = [1, 1, 1]} : vector<1x16x16xf32> to vector<1x16x13xf32>
    %291 = tpu.concatenate %290, %289 in 2 : vector<1x16x13xf32>, vector<1x16x3xf32> -> vector<1x16x16xf32>
    %c20 = arith.constant 20 : index
    %292 = memref.load %arg2[%c20] : memref<98xf32, #tpu.memory_space<smem>>
    %293 = vector.broadcast %292 : f32 to vector<1x16x16xf32>
    %294 = arith.mulf %293, %288 : vector<1x16x16xf32>
    %295 = arith.addf %285, %294 : vector<1x16x16xf32>
    %c69 = arith.constant 69 : index
    %296 = memref.load %arg2[%c69] : memref<98xf32, #tpu.memory_space<smem>>
    %297 = vector.broadcast %296 : f32 to vector<1x16x16xf32>
    %298 = arith.mulf %297, %291 : vector<1x16x16xf32>
    %299 = arith.addf %295, %298 : vector<1x16x16xf32>
    %cst_49 = arith.constant 0.000000e+00 : f32
    %300 = vector.broadcast %cst_49 : f32 to vector<1x16x3xf32>
    %301 = vector.extract_strided_slice %3 {offsets = [0, 0, 0], sizes = [1, 16, 13], strides = [1, 1, 1]} : vector<1x16x16xf32> to vector<1x16x13xf32>
    %302 = tpu.concatenate %300, %301 in 2 : vector<1x16x3xf32>, vector<1x16x13xf32> -> vector<1x16x16xf32>
    %cst_50 = arith.constant 0.000000e+00 : f32
    %303 = vector.broadcast %cst_50 : f32 to vector<1x16x3xf32>
    %304 = vector.extract_strided_slice %4 {offsets = [0, 0, 0], sizes = [1, 16, 13], strides = [1, 1, 1]} : vector<1x16x16xf32> to vector<1x16x13xf32>
    %305 = tpu.concatenate %303, %304 in 2 : vector<1x16x3xf32>, vector<1x16x13xf32> -> vector<1x16x16xf32>
    %c21 = arith.constant 21 : index
    %306 = memref.load %arg2[%c21] : memref<98xf32, #tpu.memory_space<smem>>
    %307 = vector.broadcast %306 : f32 to vector<1x16x16xf32>
    %308 = arith.mulf %307, %302 : vector<1x16x16xf32>
    %309 = arith.addf %299, %308 : vector<1x16x16xf32>
    %c70 = arith.constant 70 : index
    %310 = memref.load %arg2[%c70] : memref<98xf32, #tpu.memory_space<smem>>
    %311 = vector.broadcast %310 : f32 to vector<1x16x16xf32>
    %312 = arith.mulf %311, %305 : vector<1x16x16xf32>
    %313 = arith.addf %309, %312 : vector<1x16x16xf32>
    %cst_51 = arith.constant 0.000000e+00 : f32
    %314 = vector.broadcast %cst_51 : f32 to vector<1x16x2xf32>
    %315 = vector.extract_strided_slice %3 {offsets = [0, 0, 0], sizes = [1, 16, 14], strides = [1, 1, 1]} : vector<1x16x16xf32> to vector<1x16x14xf32>
    %316 = tpu.concatenate %314, %315 in 2 : vector<1x16x2xf32>, vector<1x16x14xf32> -> vector<1x16x16xf32>
    %cst_52 = arith.constant 0.000000e+00 : f32
    %317 = vector.broadcast %cst_52 : f32 to vector<1x16x2xf32>
    %318 = vector.extract_strided_slice %4 {offsets = [0, 0, 0], sizes = [1, 16, 14], strides = [1, 1, 1]} : vector<1x16x16xf32> to vector<1x16x14xf32>
    %319 = tpu.concatenate %317, %318 in 2 : vector<1x16x2xf32>, vector<1x16x14xf32> -> vector<1x16x16xf32>
    %c22 = arith.constant 22 : index
    %320 = memref.load %arg2[%c22] : memref<98xf32, #tpu.memory_space<smem>>
    %321 = vector.broadcast %320 : f32 to vector<1x16x16xf32>
    %322 = arith.mulf %321, %316 : vector<1x16x16xf32>
    %323 = arith.addf %313, %322 : vector<1x16x16xf32>
    %c71 = arith.constant 71 : index
    %324 = memref.load %arg2[%c71] : memref<98xf32, #tpu.memory_space<smem>>
    %325 = vector.broadcast %324 : f32 to vector<1x16x16xf32>
    %326 = arith.mulf %325, %319 : vector<1x16x16xf32>
    %327 = arith.addf %323, %326 : vector<1x16x16xf32>
    %cst_53 = arith.constant 0.000000e+00 : f32
    %328 = vector.broadcast %cst_53 : f32 to vector<1x16x1xf32>
    %329 = vector.extract_strided_slice %3 {offsets = [0, 0, 0], sizes = [1, 16, 15], strides = [1, 1, 1]} : vector<1x16x16xf32> to vector<1x16x15xf32>
    %330 = tpu.concatenate %328, %329 in 2 : vector<1x16x1xf32>, vector<1x16x15xf32> -> vector<1x16x16xf32>
    %cst_54 = arith.constant 0.000000e+00 : f32
    %331 = vector.broadcast %cst_54 : f32 to vector<1x16x1xf32>
    %332 = vector.extract_strided_slice %4 {offsets = [0, 0, 0], sizes = [1, 16, 15], strides = [1, 1, 1]} : vector<1x16x16xf32> to vector<1x16x15xf32>
    %333 = tpu.concatenate %331, %332 in 2 : vector<1x16x1xf32>, vector<1x16x15xf32> -> vector<1x16x16xf32>
    %c23 = arith.constant 23 : index
    %334 = memref.load %arg2[%c23] : memref<98xf32, #tpu.memory_space<smem>>
    %335 = vector.broadcast %334 : f32 to vector<1x16x16xf32>
    %336 = arith.mulf %335, %330 : vector<1x16x16xf32>
    %337 = arith.addf %327, %336 : vector<1x16x16xf32>
    %c72 = arith.constant 72 : index
    %338 = memref.load %arg2[%c72] : memref<98xf32, #tpu.memory_space<smem>>
    %339 = vector.broadcast %338 : f32 to vector<1x16x16xf32>
    %340 = arith.mulf %339, %333 : vector<1x16x16xf32>
    %341 = arith.addf %337, %340 : vector<1x16x16xf32>
    %c24 = arith.constant 24 : index
    %342 = memref.load %arg2[%c24] : memref<98xf32, #tpu.memory_space<smem>>
    %343 = vector.broadcast %342 : f32 to vector<1x16x16xf32>
    %344 = arith.mulf %343, %3 : vector<1x16x16xf32>
    %345 = arith.addf %341, %344 : vector<1x16x16xf32>
    %c73 = arith.constant 73 : index
    %346 = memref.load %arg2[%c73] : memref<98xf32, #tpu.memory_space<smem>>
    %347 = vector.broadcast %346 : f32 to vector<1x16x16xf32>
    %348 = arith.mulf %347, %4 : vector<1x16x16xf32>
    %349 = arith.addf %345, %348 : vector<1x16x16xf32>
    %cst_55 = arith.constant 0.000000e+00 : f32
    %350 = vector.broadcast %cst_55 : f32 to vector<1x16x1xf32>
    %351 = vector.extract_strided_slice %3 {offsets = [0, 0, 1], sizes = [1, 16, 15], strides = [1, 1, 1]} : vector<1x16x16xf32> to vector<1x16x15xf32>
    %352 = tpu.concatenate %351, %350 in 2 : vector<1x16x15xf32>, vector<1x16x1xf32> -> vector<1x16x16xf32>
    %cst_56 = arith.constant 0.000000e+00 : f32
    %353 = vector.broadcast %cst_56 : f32 to vector<1x16x1xf32>
    %354 = vector.extract_strided_slice %4 {offsets = [0, 0, 1], sizes = [1, 16, 15], strides = [1, 1, 1]} : vector<1x16x16xf32> to vector<1x16x15xf32>
    %355 = tpu.concatenate %354, %353 in 2 : vector<1x16x15xf32>, vector<1x16x1xf32> -> vector<1x16x16xf32>
    %c25 = arith.constant 25 : index
    %356 = memref.load %arg2[%c25] : memref<98xf32, #tpu.memory_space<smem>>
    %357 = vector.broadcast %356 : f32 to vector<1x16x16xf32>
    %358 = arith.mulf %357, %352 : vector<1x16x16xf32>
    %359 = arith.addf %349, %358 : vector<1x16x16xf32>
    %c74 = arith.constant 74 : index
    %360 = memref.load %arg2[%c74] : memref<98xf32, #tpu.memory_space<smem>>
    %361 = vector.broadcast %360 : f32 to vector<1x16x16xf32>
    %362 = arith.mulf %361, %355 : vector<1x16x16xf32>
    %363 = arith.addf %359, %362 : vector<1x16x16xf32>
    %cst_57 = arith.constant 0.000000e+00 : f32
    %364 = vector.broadcast %cst_57 : f32 to vector<1x16x2xf32>
    %365 = vector.extract_strided_slice %3 {offsets = [0, 0, 2], sizes = [1, 16, 14], strides = [1, 1, 1]} : vector<1x16x16xf32> to vector<1x16x14xf32>
    %366 = tpu.concatenate %365, %364 in 2 : vector<1x16x14xf32>, vector<1x16x2xf32> -> vector<1x16x16xf32>
    %cst_58 = arith.constant 0.000000e+00 : f32
    %367 = vector.broadcast %cst_58 : f32 to vector<1x16x2xf32>
    %368 = vector.extract_strided_slice %4 {offsets = [0, 0, 2], sizes = [1, 16, 14], strides = [1, 1, 1]} : vector<1x16x16xf32> to vector<1x16x14xf32>
    %369 = tpu.concatenate %368, %367 in 2 : vector<1x16x14xf32>, vector<1x16x2xf32> -> vector<1x16x16xf32>
    %c26 = arith.constant 26 : index
    %370 = memref.load %arg2[%c26] : memref<98xf32, #tpu.memory_space<smem>>
    %371 = vector.broadcast %370 : f32 to vector<1x16x16xf32>
    %372 = arith.mulf %371, %366 : vector<1x16x16xf32>
    %373 = arith.addf %363, %372 : vector<1x16x16xf32>
    %c75 = arith.constant 75 : index
    %374 = memref.load %arg2[%c75] : memref<98xf32, #tpu.memory_space<smem>>
    %375 = vector.broadcast %374 : f32 to vector<1x16x16xf32>
    %376 = arith.mulf %375, %369 : vector<1x16x16xf32>
    %377 = arith.addf %373, %376 : vector<1x16x16xf32>
    %cst_59 = arith.constant 0.000000e+00 : f32
    %378 = vector.broadcast %cst_59 : f32 to vector<1x16x3xf32>
    %379 = vector.extract_strided_slice %3 {offsets = [0, 0, 3], sizes = [1, 16, 13], strides = [1, 1, 1]} : vector<1x16x16xf32> to vector<1x16x13xf32>
    %380 = tpu.concatenate %379, %378 in 2 : vector<1x16x13xf32>, vector<1x16x3xf32> -> vector<1x16x16xf32>
    %cst_60 = arith.constant 0.000000e+00 : f32
    %381 = vector.broadcast %cst_60 : f32 to vector<1x16x3xf32>
    %382 = vector.extract_strided_slice %4 {offsets = [0, 0, 3], sizes = [1, 16, 13], strides = [1, 1, 1]} : vector<1x16x16xf32> to vector<1x16x13xf32>
    %383 = tpu.concatenate %382, %381 in 2 : vector<1x16x13xf32>, vector<1x16x3xf32> -> vector<1x16x16xf32>
    %c27 = arith.constant 27 : index
    %384 = memref.load %arg2[%c27] : memref<98xf32, #tpu.memory_space<smem>>
    %385 = vector.broadcast %384 : f32 to vector<1x16x16xf32>
    %386 = arith.mulf %385, %380 : vector<1x16x16xf32>
    %387 = arith.addf %377, %386 : vector<1x16x16xf32>
    %c76 = arith.constant 76 : index
    %388 = memref.load %arg2[%c76] : memref<98xf32, #tpu.memory_space<smem>>
    %389 = vector.broadcast %388 : f32 to vector<1x16x16xf32>
    %390 = arith.mulf %389, %383 : vector<1x16x16xf32>
    %391 = arith.addf %387, %390 : vector<1x16x16xf32>
    %cst_61 = arith.constant 0.000000e+00 : f32
    %392 = vector.broadcast %cst_61 : f32 to vector<1x1x16xf32>
    %393 = vector.extract_strided_slice %3 {offsets = [0, 1, 0], sizes = [1, 15, 16], strides = [1, 1, 1]} : vector<1x16x16xf32> to vector<1x15x16xf32>
    %394 = tpu.concatenate %393, %392 in 1 : vector<1x15x16xf32>, vector<1x1x16xf32> -> vector<1x16x16xf32>
    %cst_62 = arith.constant 0.000000e+00 : f32
    %395 = vector.broadcast %cst_62 : f32 to vector<1x1x16xf32>
    %396 = vector.extract_strided_slice %4 {offsets = [0, 1, 0], sizes = [1, 15, 16], strides = [1, 1, 1]} : vector<1x16x16xf32> to vector<1x15x16xf32>
    %397 = tpu.concatenate %396, %395 in 1 : vector<1x15x16xf32>, vector<1x1x16xf32> -> vector<1x16x16xf32>
    %cst_63 = arith.constant 0.000000e+00 : f32
    %398 = vector.broadcast %cst_63 : f32 to vector<1x16x3xf32>
    %399 = vector.extract_strided_slice %394 {offsets = [0, 0, 0], sizes = [1, 16, 13], strides = [1, 1, 1]} : vector<1x16x16xf32> to vector<1x16x13xf32>
    %400 = tpu.concatenate %398, %399 in 2 : vector<1x16x3xf32>, vector<1x16x13xf32> -> vector<1x16x16xf32>
    %cst_64 = arith.constant 0.000000e+00 : f32
    %401 = vector.broadcast %cst_64 : f32 to vector<1x16x3xf32>
    %402 = vector.extract_strided_slice %397 {offsets = [0, 0, 0], sizes = [1, 16, 13], strides = [1, 1, 1]} : vector<1x16x16xf32> to vector<1x16x13xf32>
    %403 = tpu.concatenate %401, %402 in 2 : vector<1x16x3xf32>, vector<1x16x13xf32> -> vector<1x16x16xf32>
    %c28 = arith.constant 28 : index
    %404 = memref.load %arg2[%c28] : memref<98xf32, #tpu.memory_space<smem>>
    %405 = vector.broadcast %404 : f32 to vector<1x16x16xf32>
    %406 = arith.mulf %405, %400 : vector<1x16x16xf32>
    %407 = arith.addf %391, %406 : vector<1x16x16xf32>
    %c77 = arith.constant 77 : index
    %408 = memref.load %arg2[%c77] : memref<98xf32, #tpu.memory_space<smem>>
    %409 = vector.broadcast %408 : f32 to vector<1x16x16xf32>
    %410 = arith.mulf %409, %403 : vector<1x16x16xf32>
    %411 = arith.addf %407, %410 : vector<1x16x16xf32>
    %cst_65 = arith.constant 0.000000e+00 : f32
    %412 = vector.broadcast %cst_65 : f32 to vector<1x16x2xf32>
    %413 = vector.extract_strided_slice %394 {offsets = [0, 0, 0], sizes = [1, 16, 14], strides = [1, 1, 1]} : vector<1x16x16xf32> to vector<1x16x14xf32>
    %414 = tpu.concatenate %412, %413 in 2 : vector<1x16x2xf32>, vector<1x16x14xf32> -> vector<1x16x16xf32>
    %cst_66 = arith.constant 0.000000e+00 : f32
    %415 = vector.broadcast %cst_66 : f32 to vector<1x16x2xf32>
    %416 = vector.extract_strided_slice %397 {offsets = [0, 0, 0], sizes = [1, 16, 14], strides = [1, 1, 1]} : vector<1x16x16xf32> to vector<1x16x14xf32>
    %417 = tpu.concatenate %415, %416 in 2 : vector<1x16x2xf32>, vector<1x16x14xf32> -> vector<1x16x16xf32>
    %c29 = arith.constant 29 : index
    %418 = memref.load %arg2[%c29] : memref<98xf32, #tpu.memory_space<smem>>
    %419 = vector.broadcast %418 : f32 to vector<1x16x16xf32>
    %420 = arith.mulf %419, %414 : vector<1x16x16xf32>
    %421 = arith.addf %411, %420 : vector<1x16x16xf32>
    %c78 = arith.constant 78 : index
    %422 = memref.load %arg2[%c78] : memref<98xf32, #tpu.memory_space<smem>>
    %423 = vector.broadcast %422 : f32 to vector<1x16x16xf32>
    %424 = arith.mulf %423, %417 : vector<1x16x16xf32>
    %425 = arith.addf %421, %424 : vector<1x16x16xf32>
    %cst_67 = arith.constant 0.000000e+00 : f32
    %426 = vector.broadcast %cst_67 : f32 to vector<1x16x1xf32>
    %427 = vector.extract_strided_slice %394 {offsets = [0, 0, 0], sizes = [1, 16, 15], strides = [1, 1, 1]} : vector<1x16x16xf32> to vector<1x16x15xf32>
    %428 = tpu.concatenate %426, %427 in 2 : vector<1x16x1xf32>, vector<1x16x15xf32> -> vector<1x16x16xf32>
    %cst_68 = arith.constant 0.000000e+00 : f32
    %429 = vector.broadcast %cst_68 : f32 to vector<1x16x1xf32>
    %430 = vector.extract_strided_slice %397 {offsets = [0, 0, 0], sizes = [1, 16, 15], strides = [1, 1, 1]} : vector<1x16x16xf32> to vector<1x16x15xf32>
    %431 = tpu.concatenate %429, %430 in 2 : vector<1x16x1xf32>, vector<1x16x15xf32> -> vector<1x16x16xf32>
    %c30 = arith.constant 30 : index
    %432 = memref.load %arg2[%c30] : memref<98xf32, #tpu.memory_space<smem>>
    %433 = vector.broadcast %432 : f32 to vector<1x16x16xf32>
    %434 = arith.mulf %433, %428 : vector<1x16x16xf32>
    %435 = arith.addf %425, %434 : vector<1x16x16xf32>
    %c79 = arith.constant 79 : index
    %436 = memref.load %arg2[%c79] : memref<98xf32, #tpu.memory_space<smem>>
    %437 = vector.broadcast %436 : f32 to vector<1x16x16xf32>
    %438 = arith.mulf %437, %431 : vector<1x16x16xf32>
    %439 = arith.addf %435, %438 : vector<1x16x16xf32>
    %c31 = arith.constant 31 : index
    %440 = memref.load %arg2[%c31] : memref<98xf32, #tpu.memory_space<smem>>
    %441 = vector.broadcast %440 : f32 to vector<1x16x16xf32>
    %442 = arith.mulf %441, %394 : vector<1x16x16xf32>
    %443 = arith.addf %439, %442 : vector<1x16x16xf32>
    %c80 = arith.constant 80 : index
    %444 = memref.load %arg2[%c80] : memref<98xf32, #tpu.memory_space<smem>>
    %445 = vector.broadcast %444 : f32 to vector<1x16x16xf32>
    %446 = arith.mulf %445, %397 : vector<1x16x16xf32>
    %447 = arith.addf %443, %446 : vector<1x16x16xf32>
    %cst_69 = arith.constant 0.000000e+00 : f32
    %448 = vector.broadcast %cst_69 : f32 to vector<1x16x1xf32>
    %449 = vector.extract_strided_slice %394 {offsets = [0, 0, 1], sizes = [1, 16, 15], strides = [1, 1, 1]} : vector<1x16x16xf32> to vector<1x16x15xf32>
    %450 = tpu.concatenate %449, %448 in 2 : vector<1x16x15xf32>, vector<1x16x1xf32> -> vector<1x16x16xf32>
    %cst_70 = arith.constant 0.000000e+00 : f32
    %451 = vector.broadcast %cst_70 : f32 to vector<1x16x1xf32>
    %452 = vector.extract_strided_slice %397 {offsets = [0, 0, 1], sizes = [1, 16, 15], strides = [1, 1, 1]} : vector<1x16x16xf32> to vector<1x16x15xf32>
    %453 = tpu.concatenate %452, %451 in 2 : vector<1x16x15xf32>, vector<1x16x1xf32> -> vector<1x16x16xf32>
    %c32 = arith.constant 32 : index
    %454 = memref.load %arg2[%c32] : memref<98xf32, #tpu.memory_space<smem>>
    %455 = vector.broadcast %454 : f32 to vector<1x16x16xf32>
    %456 = arith.mulf %455, %450 : vector<1x16x16xf32>
    %457 = arith.addf %447, %456 : vector<1x16x16xf32>
    %c81 = arith.constant 81 : index
    %458 = memref.load %arg2[%c81] : memref<98xf32, #tpu.memory_space<smem>>
    %459 = vector.broadcast %458 : f32 to vector<1x16x16xf32>
    %460 = arith.mulf %459, %453 : vector<1x16x16xf32>
    %461 = arith.addf %457, %460 : vector<1x16x16xf32>
    %cst_71 = arith.constant 0.000000e+00 : f32
    %462 = vector.broadcast %cst_71 : f32 to vector<1x16x2xf32>
    %463 = vector.extract_strided_slice %394 {offsets = [0, 0, 2], sizes = [1, 16, 14], strides = [1, 1, 1]} : vector<1x16x16xf32> to vector<1x16x14xf32>
    %464 = tpu.concatenate %463, %462 in 2 : vector<1x16x14xf32>, vector<1x16x2xf32> -> vector<1x16x16xf32>
    %cst_72 = arith.constant 0.000000e+00 : f32
    %465 = vector.broadcast %cst_72 : f32 to vector<1x16x2xf32>
    %466 = vector.extract_strided_slice %397 {offsets = [0, 0, 2], sizes = [1, 16, 14], strides = [1, 1, 1]} : vector<1x16x16xf32> to vector<1x16x14xf32>
    %467 = tpu.concatenate %466, %465 in 2 : vector<1x16x14xf32>, vector<1x16x2xf32> -> vector<1x16x16xf32>
    %c33 = arith.constant 33 : index
    %468 = memref.load %arg2[%c33] : memref<98xf32, #tpu.memory_space<smem>>
    %469 = vector.broadcast %468 : f32 to vector<1x16x16xf32>
    %470 = arith.mulf %469, %464 : vector<1x16x16xf32>
    %471 = arith.addf %461, %470 : vector<1x16x16xf32>
    %c82 = arith.constant 82 : index
    %472 = memref.load %arg2[%c82] : memref<98xf32, #tpu.memory_space<smem>>
    %473 = vector.broadcast %472 : f32 to vector<1x16x16xf32>
    %474 = arith.mulf %473, %467 : vector<1x16x16xf32>
    %475 = arith.addf %471, %474 : vector<1x16x16xf32>
    %cst_73 = arith.constant 0.000000e+00 : f32
    %476 = vector.broadcast %cst_73 : f32 to vector<1x16x3xf32>
    %477 = vector.extract_strided_slice %394 {offsets = [0, 0, 3], sizes = [1, 16, 13], strides = [1, 1, 1]} : vector<1x16x16xf32> to vector<1x16x13xf32>
    %478 = tpu.concatenate %477, %476 in 2 : vector<1x16x13xf32>, vector<1x16x3xf32> -> vector<1x16x16xf32>
    %cst_74 = arith.constant 0.000000e+00 : f32
    %479 = vector.broadcast %cst_74 : f32 to vector<1x16x3xf32>
    %480 = vector.extract_strided_slice %397 {offsets = [0, 0, 3], sizes = [1, 16, 13], strides = [1, 1, 1]} : vector<1x16x16xf32> to vector<1x16x13xf32>
    %481 = tpu.concatenate %480, %479 in 2 : vector<1x16x13xf32>, vector<1x16x3xf32> -> vector<1x16x16xf32>
    %c34 = arith.constant 34 : index
    %482 = memref.load %arg2[%c34] : memref<98xf32, #tpu.memory_space<smem>>
    %483 = vector.broadcast %482 : f32 to vector<1x16x16xf32>
    %484 = arith.mulf %483, %478 : vector<1x16x16xf32>
    %485 = arith.addf %475, %484 : vector<1x16x16xf32>
    %c83 = arith.constant 83 : index
    %486 = memref.load %arg2[%c83] : memref<98xf32, #tpu.memory_space<smem>>
    %487 = vector.broadcast %486 : f32 to vector<1x16x16xf32>
    %488 = arith.mulf %487, %481 : vector<1x16x16xf32>
    %489 = arith.addf %485, %488 : vector<1x16x16xf32>
    %cst_75 = arith.constant 0.000000e+00 : f32
    %490 = vector.broadcast %cst_75 : f32 to vector<1x2x16xf32>
    %491 = vector.extract_strided_slice %3 {offsets = [0, 2, 0], sizes = [1, 14, 16], strides = [1, 1, 1]} : vector<1x16x16xf32> to vector<1x14x16xf32>
    %492 = tpu.concatenate %491, %490 in 1 : vector<1x14x16xf32>, vector<1x2x16xf32> -> vector<1x16x16xf32>
    %cst_76 = arith.constant 0.000000e+00 : f32
    %493 = vector.broadcast %cst_76 : f32 to vector<1x2x16xf32>
    %494 = vector.extract_strided_slice %4 {offsets = [0, 2, 0], sizes = [1, 14, 16], strides = [1, 1, 1]} : vector<1x16x16xf32> to vector<1x14x16xf32>
    %495 = tpu.concatenate %494, %493 in 1 : vector<1x14x16xf32>, vector<1x2x16xf32> -> vector<1x16x16xf32>
    %cst_77 = arith.constant 0.000000e+00 : f32
    %496 = vector.broadcast %cst_77 : f32 to vector<1x16x3xf32>
    %497 = vector.extract_strided_slice %492 {offsets = [0, 0, 0], sizes = [1, 16, 13], strides = [1, 1, 1]} : vector<1x16x16xf32> to vector<1x16x13xf32>
    %498 = tpu.concatenate %496, %497 in 2 : vector<1x16x3xf32>, vector<1x16x13xf32> -> vector<1x16x16xf32>
    %cst_78 = arith.constant 0.000000e+00 : f32
    %499 = vector.broadcast %cst_78 : f32 to vector<1x16x3xf32>
    %500 = vector.extract_strided_slice %495 {offsets = [0, 0, 0], sizes = [1, 16, 13], strides = [1, 1, 1]} : vector<1x16x16xf32> to vector<1x16x13xf32>
    %501 = tpu.concatenate %499, %500 in 2 : vector<1x16x3xf32>, vector<1x16x13xf32> -> vector<1x16x16xf32>
    %c35 = arith.constant 35 : index
    %502 = memref.load %arg2[%c35] : memref<98xf32, #tpu.memory_space<smem>>
    %503 = vector.broadcast %502 : f32 to vector<1x16x16xf32>
    %504 = arith.mulf %503, %498 : vector<1x16x16xf32>
    %505 = arith.addf %489, %504 : vector<1x16x16xf32>
    %c84 = arith.constant 84 : index
    %506 = memref.load %arg2[%c84] : memref<98xf32, #tpu.memory_space<smem>>
    %507 = vector.broadcast %506 : f32 to vector<1x16x16xf32>
    %508 = arith.mulf %507, %501 : vector<1x16x16xf32>
    %509 = arith.addf %505, %508 : vector<1x16x16xf32>
    %cst_79 = arith.constant 0.000000e+00 : f32
    %510 = vector.broadcast %cst_79 : f32 to vector<1x16x2xf32>
    %511 = vector.extract_strided_slice %492 {offsets = [0, 0, 0], sizes = [1, 16, 14], strides = [1, 1, 1]} : vector<1x16x16xf32> to vector<1x16x14xf32>
    %512 = tpu.concatenate %510, %511 in 2 : vector<1x16x2xf32>, vector<1x16x14xf32> -> vector<1x16x16xf32>
    %cst_80 = arith.constant 0.000000e+00 : f32
    %513 = vector.broadcast %cst_80 : f32 to vector<1x16x2xf32>
    %514 = vector.extract_strided_slice %495 {offsets = [0, 0, 0], sizes = [1, 16, 14], strides = [1, 1, 1]} : vector<1x16x16xf32> to vector<1x16x14xf32>
    %515 = tpu.concatenate %513, %514 in 2 : vector<1x16x2xf32>, vector<1x16x14xf32> -> vector<1x16x16xf32>
    %c36 = arith.constant 36 : index
    %516 = memref.load %arg2[%c36] : memref<98xf32, #tpu.memory_space<smem>>
    %517 = vector.broadcast %516 : f32 to vector<1x16x16xf32>
    %518 = arith.mulf %517, %512 : vector<1x16x16xf32>
    %519 = arith.addf %509, %518 : vector<1x16x16xf32>
    %c85 = arith.constant 85 : index
    %520 = memref.load %arg2[%c85] : memref<98xf32, #tpu.memory_space<smem>>
    %521 = vector.broadcast %520 : f32 to vector<1x16x16xf32>
    %522 = arith.mulf %521, %515 : vector<1x16x16xf32>
    %523 = arith.addf %519, %522 : vector<1x16x16xf32>
    %cst_81 = arith.constant 0.000000e+00 : f32
    %524 = vector.broadcast %cst_81 : f32 to vector<1x16x1xf32>
    %525 = vector.extract_strided_slice %492 {offsets = [0, 0, 0], sizes = [1, 16, 15], strides = [1, 1, 1]} : vector<1x16x16xf32> to vector<1x16x15xf32>
    %526 = tpu.concatenate %524, %525 in 2 : vector<1x16x1xf32>, vector<1x16x15xf32> -> vector<1x16x16xf32>
    %cst_82 = arith.constant 0.000000e+00 : f32
    %527 = vector.broadcast %cst_82 : f32 to vector<1x16x1xf32>
    %528 = vector.extract_strided_slice %495 {offsets = [0, 0, 0], sizes = [1, 16, 15], strides = [1, 1, 1]} : vector<1x16x16xf32> to vector<1x16x15xf32>
    %529 = tpu.concatenate %527, %528 in 2 : vector<1x16x1xf32>, vector<1x16x15xf32> -> vector<1x16x16xf32>
    %c37 = arith.constant 37 : index
    %530 = memref.load %arg2[%c37] : memref<98xf32, #tpu.memory_space<smem>>
    %531 = vector.broadcast %530 : f32 to vector<1x16x16xf32>
    %532 = arith.mulf %531, %526 : vector<1x16x16xf32>
    %533 = arith.addf %523, %532 : vector<1x16x16xf32>
    %c86 = arith.constant 86 : index
    %534 = memref.load %arg2[%c86] : memref<98xf32, #tpu.memory_space<smem>>
    %535 = vector.broadcast %534 : f32 to vector<1x16x16xf32>
    %536 = arith.mulf %535, %529 : vector<1x16x16xf32>
    %537 = arith.addf %533, %536 : vector<1x16x16xf32>
    %c38 = arith.constant 38 : index
    %538 = memref.load %arg2[%c38] : memref<98xf32, #tpu.memory_space<smem>>
    %539 = vector.broadcast %538 : f32 to vector<1x16x16xf32>
    %540 = arith.mulf %539, %492 : vector<1x16x16xf32>
    %541 = arith.addf %537, %540 : vector<1x16x16xf32>
    %c87 = arith.constant 87 : index
    %542 = memref.load %arg2[%c87] : memref<98xf32, #tpu.memory_space<smem>>
    %543 = vector.broadcast %542 : f32 to vector<1x16x16xf32>
    %544 = arith.mulf %543, %495 : vector<1x16x16xf32>
    %545 = arith.addf %541, %544 : vector<1x16x16xf32>
    %cst_83 = arith.constant 0.000000e+00 : f32
    %546 = vector.broadcast %cst_83 : f32 to vector<1x16x1xf32>
    %547 = vector.extract_strided_slice %492 {offsets = [0, 0, 1], sizes = [1, 16, 15], strides = [1, 1, 1]} : vector<1x16x16xf32> to vector<1x16x15xf32>
    %548 = tpu.concatenate %547, %546 in 2 : vector<1x16x15xf32>, vector<1x16x1xf32> -> vector<1x16x16xf32>
    %cst_84 = arith.constant 0.000000e+00 : f32
    %549 = vector.broadcast %cst_84 : f32 to vector<1x16x1xf32>
    %550 = vector.extract_strided_slice %495 {offsets = [0, 0, 1], sizes = [1, 16, 15], strides = [1, 1, 1]} : vector<1x16x16xf32> to vector<1x16x15xf32>
    %551 = tpu.concatenate %550, %549 in 2 : vector<1x16x15xf32>, vector<1x16x1xf32> -> vector<1x16x16xf32>
    %c39 = arith.constant 39 : index
    %552 = memref.load %arg2[%c39] : memref<98xf32, #tpu.memory_space<smem>>
    %553 = vector.broadcast %552 : f32 to vector<1x16x16xf32>
    %554 = arith.mulf %553, %548 : vector<1x16x16xf32>
    %555 = arith.addf %545, %554 : vector<1x16x16xf32>
    %c88 = arith.constant 88 : index
    %556 = memref.load %arg2[%c88] : memref<98xf32, #tpu.memory_space<smem>>
    %557 = vector.broadcast %556 : f32 to vector<1x16x16xf32>
    %558 = arith.mulf %557, %551 : vector<1x16x16xf32>
    %559 = arith.addf %555, %558 : vector<1x16x16xf32>
    %cst_85 = arith.constant 0.000000e+00 : f32
    %560 = vector.broadcast %cst_85 : f32 to vector<1x16x2xf32>
    %561 = vector.extract_strided_slice %492 {offsets = [0, 0, 2], sizes = [1, 16, 14], strides = [1, 1, 1]} : vector<1x16x16xf32> to vector<1x16x14xf32>
    %562 = tpu.concatenate %561, %560 in 2 : vector<1x16x14xf32>, vector<1x16x2xf32> -> vector<1x16x16xf32>
    %cst_86 = arith.constant 0.000000e+00 : f32
    %563 = vector.broadcast %cst_86 : f32 to vector<1x16x2xf32>
    %564 = vector.extract_strided_slice %495 {offsets = [0, 0, 2], sizes = [1, 16, 14], strides = [1, 1, 1]} : vector<1x16x16xf32> to vector<1x16x14xf32>
    %565 = tpu.concatenate %564, %563 in 2 : vector<1x16x14xf32>, vector<1x16x2xf32> -> vector<1x16x16xf32>
    %c40 = arith.constant 40 : index
    %566 = memref.load %arg2[%c40] : memref<98xf32, #tpu.memory_space<smem>>
    %567 = vector.broadcast %566 : f32 to vector<1x16x16xf32>
    %568 = arith.mulf %567, %562 : vector<1x16x16xf32>
    %569 = arith.addf %559, %568 : vector<1x16x16xf32>
    %c89 = arith.constant 89 : index
    %570 = memref.load %arg2[%c89] : memref<98xf32, #tpu.memory_space<smem>>
    %571 = vector.broadcast %570 : f32 to vector<1x16x16xf32>
    %572 = arith.mulf %571, %565 : vector<1x16x16xf32>
    %573 = arith.addf %569, %572 : vector<1x16x16xf32>
    %cst_87 = arith.constant 0.000000e+00 : f32
    %574 = vector.broadcast %cst_87 : f32 to vector<1x16x3xf32>
    %575 = vector.extract_strided_slice %492 {offsets = [0, 0, 3], sizes = [1, 16, 13], strides = [1, 1, 1]} : vector<1x16x16xf32> to vector<1x16x13xf32>
    %576 = tpu.concatenate %575, %574 in 2 : vector<1x16x13xf32>, vector<1x16x3xf32> -> vector<1x16x16xf32>
    %cst_88 = arith.constant 0.000000e+00 : f32
    %577 = vector.broadcast %cst_88 : f32 to vector<1x16x3xf32>
    %578 = vector.extract_strided_slice %495 {offsets = [0, 0, 3], sizes = [1, 16, 13], strides = [1, 1, 1]} : vector<1x16x16xf32> to vector<1x16x13xf32>
    %579 = tpu.concatenate %578, %577 in 2 : vector<1x16x13xf32>, vector<1x16x3xf32> -> vector<1x16x16xf32>
    %c41 = arith.constant 41 : index
    %580 = memref.load %arg2[%c41] : memref<98xf32, #tpu.memory_space<smem>>
    %581 = vector.broadcast %580 : f32 to vector<1x16x16xf32>
    %582 = arith.mulf %581, %576 : vector<1x16x16xf32>
    %583 = arith.addf %573, %582 : vector<1x16x16xf32>
    %c90 = arith.constant 90 : index
    %584 = memref.load %arg2[%c90] : memref<98xf32, #tpu.memory_space<smem>>
    %585 = vector.broadcast %584 : f32 to vector<1x16x16xf32>
    %586 = arith.mulf %585, %579 : vector<1x16x16xf32>
    %587 = arith.addf %583, %586 : vector<1x16x16xf32>
    %cst_89 = arith.constant 0.000000e+00 : f32
    %588 = vector.broadcast %cst_89 : f32 to vector<1x3x16xf32>
    %589 = vector.extract_strided_slice %3 {offsets = [0, 3, 0], sizes = [1, 13, 16], strides = [1, 1, 1]} : vector<1x16x16xf32> to vector<1x13x16xf32>
    %590 = tpu.concatenate %589, %588 in 1 : vector<1x13x16xf32>, vector<1x3x16xf32> -> vector<1x16x16xf32>
    %cst_90 = arith.constant 0.000000e+00 : f32
    %591 = vector.broadcast %cst_90 : f32 to vector<1x3x16xf32>
    %592 = vector.extract_strided_slice %4 {offsets = [0, 3, 0], sizes = [1, 13, 16], strides = [1, 1, 1]} : vector<1x16x16xf32> to vector<1x13x16xf32>
    %593 = tpu.concatenate %592, %591 in 1 : vector<1x13x16xf32>, vector<1x3x16xf32> -> vector<1x16x16xf32>
    %cst_91 = arith.constant 0.000000e+00 : f32
    %594 = vector.broadcast %cst_91 : f32 to vector<1x16x3xf32>
    %595 = vector.extract_strided_slice %590 {offsets = [0, 0, 0], sizes = [1, 16, 13], strides = [1, 1, 1]} : vector<1x16x16xf32> to vector<1x16x13xf32>
    %596 = tpu.concatenate %594, %595 in 2 : vector<1x16x3xf32>, vector<1x16x13xf32> -> vector<1x16x16xf32>
    %cst_92 = arith.constant 0.000000e+00 : f32
    %597 = vector.broadcast %cst_92 : f32 to vector<1x16x3xf32>
    %598 = vector.extract_strided_slice %593 {offsets = [0, 0, 0], sizes = [1, 16, 13], strides = [1, 1, 1]} : vector<1x16x16xf32> to vector<1x16x13xf32>
    %599 = tpu.concatenate %597, %598 in 2 : vector<1x16x3xf32>, vector<1x16x13xf32> -> vector<1x16x16xf32>
    %c42 = arith.constant 42 : index
    %600 = memref.load %arg2[%c42] : memref<98xf32, #tpu.memory_space<smem>>
    %601 = vector.broadcast %600 : f32 to vector<1x16x16xf32>
    %602 = arith.mulf %601, %596 : vector<1x16x16xf32>
    %603 = arith.addf %587, %602 : vector<1x16x16xf32>
    %c91 = arith.constant 91 : index
    %604 = memref.load %arg2[%c91] : memref<98xf32, #tpu.memory_space<smem>>
    %605 = vector.broadcast %604 : f32 to vector<1x16x16xf32>
    %606 = arith.mulf %605, %599 : vector<1x16x16xf32>
    %607 = arith.addf %603, %606 : vector<1x16x16xf32>
    %cst_93 = arith.constant 0.000000e+00 : f32
    %608 = vector.broadcast %cst_93 : f32 to vector<1x16x2xf32>
    %609 = vector.extract_strided_slice %590 {offsets = [0, 0, 0], sizes = [1, 16, 14], strides = [1, 1, 1]} : vector<1x16x16xf32> to vector<1x16x14xf32>
    %610 = tpu.concatenate %608, %609 in 2 : vector<1x16x2xf32>, vector<1x16x14xf32> -> vector<1x16x16xf32>
    %cst_94 = arith.constant 0.000000e+00 : f32
    %611 = vector.broadcast %cst_94 : f32 to vector<1x16x2xf32>
    %612 = vector.extract_strided_slice %593 {offsets = [0, 0, 0], sizes = [1, 16, 14], strides = [1, 1, 1]} : vector<1x16x16xf32> to vector<1x16x14xf32>
    %613 = tpu.concatenate %611, %612 in 2 : vector<1x16x2xf32>, vector<1x16x14xf32> -> vector<1x16x16xf32>
    %c43 = arith.constant 43 : index
    %614 = memref.load %arg2[%c43] : memref<98xf32, #tpu.memory_space<smem>>
    %615 = vector.broadcast %614 : f32 to vector<1x16x16xf32>
    %616 = arith.mulf %615, %610 : vector<1x16x16xf32>
    %617 = arith.addf %607, %616 : vector<1x16x16xf32>
    %c92 = arith.constant 92 : index
    %618 = memref.load %arg2[%c92] : memref<98xf32, #tpu.memory_space<smem>>
    %619 = vector.broadcast %618 : f32 to vector<1x16x16xf32>
    %620 = arith.mulf %619, %613 : vector<1x16x16xf32>
    %621 = arith.addf %617, %620 : vector<1x16x16xf32>
    %cst_95 = arith.constant 0.000000e+00 : f32
    %622 = vector.broadcast %cst_95 : f32 to vector<1x16x1xf32>
    %623 = vector.extract_strided_slice %590 {offsets = [0, 0, 0], sizes = [1, 16, 15], strides = [1, 1, 1]} : vector<1x16x16xf32> to vector<1x16x15xf32>
    %624 = tpu.concatenate %622, %623 in 2 : vector<1x16x1xf32>, vector<1x16x15xf32> -> vector<1x16x16xf32>
    %cst_96 = arith.constant 0.000000e+00 : f32
    %625 = vector.broadcast %cst_96 : f32 to vector<1x16x1xf32>
    %626 = vector.extract_strided_slice %593 {offsets = [0, 0, 0], sizes = [1, 16, 15], strides = [1, 1, 1]} : vector<1x16x16xf32> to vector<1x16x15xf32>
    %627 = tpu.concatenate %625, %626 in 2 : vector<1x16x1xf32>, vector<1x16x15xf32> -> vector<1x16x16xf32>
    %c44 = arith.constant 44 : index
    %628 = memref.load %arg2[%c44] : memref<98xf32, #tpu.memory_space<smem>>
    %629 = vector.broadcast %628 : f32 to vector<1x16x16xf32>
    %630 = arith.mulf %629, %624 : vector<1x16x16xf32>
    %631 = arith.addf %621, %630 : vector<1x16x16xf32>
    %c93 = arith.constant 93 : index
    %632 = memref.load %arg2[%c93] : memref<98xf32, #tpu.memory_space<smem>>
    %633 = vector.broadcast %632 : f32 to vector<1x16x16xf32>
    %634 = arith.mulf %633, %627 : vector<1x16x16xf32>
    %635 = arith.addf %631, %634 : vector<1x16x16xf32>
    %c45 = arith.constant 45 : index
    %636 = memref.load %arg2[%c45] : memref<98xf32, #tpu.memory_space<smem>>
    %637 = vector.broadcast %636 : f32 to vector<1x16x16xf32>
    %638 = arith.mulf %637, %590 : vector<1x16x16xf32>
    %639 = arith.addf %635, %638 : vector<1x16x16xf32>
    %c94 = arith.constant 94 : index
    %640 = memref.load %arg2[%c94] : memref<98xf32, #tpu.memory_space<smem>>
    %641 = vector.broadcast %640 : f32 to vector<1x16x16xf32>
    %642 = arith.mulf %641, %593 : vector<1x16x16xf32>
    %643 = arith.addf %639, %642 : vector<1x16x16xf32>
    %cst_97 = arith.constant 0.000000e+00 : f32
    %644 = vector.broadcast %cst_97 : f32 to vector<1x16x1xf32>
    %645 = vector.extract_strided_slice %590 {offsets = [0, 0, 1], sizes = [1, 16, 15], strides = [1, 1, 1]} : vector<1x16x16xf32> to vector<1x16x15xf32>
    %646 = tpu.concatenate %645, %644 in 2 : vector<1x16x15xf32>, vector<1x16x1xf32> -> vector<1x16x16xf32>
    %cst_98 = arith.constant 0.000000e+00 : f32
    %647 = vector.broadcast %cst_98 : f32 to vector<1x16x1xf32>
    %648 = vector.extract_strided_slice %593 {offsets = [0, 0, 1], sizes = [1, 16, 15], strides = [1, 1, 1]} : vector<1x16x16xf32> to vector<1x16x15xf32>
    %649 = tpu.concatenate %648, %647 in 2 : vector<1x16x15xf32>, vector<1x16x1xf32> -> vector<1x16x16xf32>
    %c46 = arith.constant 46 : index
    %650 = memref.load %arg2[%c46] : memref<98xf32, #tpu.memory_space<smem>>
    %651 = vector.broadcast %650 : f32 to vector<1x16x16xf32>
    %652 = arith.mulf %651, %646 : vector<1x16x16xf32>
    %653 = arith.addf %643, %652 : vector<1x16x16xf32>
    %c95 = arith.constant 95 : index
    %654 = memref.load %arg2[%c95] : memref<98xf32, #tpu.memory_space<smem>>
    %655 = vector.broadcast %654 : f32 to vector<1x16x16xf32>
    %656 = arith.mulf %655, %649 : vector<1x16x16xf32>
    %657 = arith.addf %653, %656 : vector<1x16x16xf32>
    %cst_99 = arith.constant 0.000000e+00 : f32
    %658 = vector.broadcast %cst_99 : f32 to vector<1x16x2xf32>
    %659 = vector.extract_strided_slice %590 {offsets = [0, 0, 2], sizes = [1, 16, 14], strides = [1, 1, 1]} : vector<1x16x16xf32> to vector<1x16x14xf32>
    %660 = tpu.concatenate %659, %658 in 2 : vector<1x16x14xf32>, vector<1x16x2xf32> -> vector<1x16x16xf32>
    %cst_100 = arith.constant 0.000000e+00 : f32
    %661 = vector.broadcast %cst_100 : f32 to vector<1x16x2xf32>
    %662 = vector.extract_strided_slice %593 {offsets = [0, 0, 2], sizes = [1, 16, 14], strides = [1, 1, 1]} : vector<1x16x16xf32> to vector<1x16x14xf32>
    %663 = tpu.concatenate %662, %661 in 2 : vector<1x16x14xf32>, vector<1x16x2xf32> -> vector<1x16x16xf32>
    %c47 = arith.constant 47 : index
    %664 = memref.load %arg2[%c47] : memref<98xf32, #tpu.memory_space<smem>>
    %665 = vector.broadcast %664 : f32 to vector<1x16x16xf32>
    %666 = arith.mulf %665, %660 : vector<1x16x16xf32>
    %667 = arith.addf %657, %666 : vector<1x16x16xf32>
    %c96 = arith.constant 96 : index
    %668 = memref.load %arg2[%c96] : memref<98xf32, #tpu.memory_space<smem>>
    %669 = vector.broadcast %668 : f32 to vector<1x16x16xf32>
    %670 = arith.mulf %669, %663 : vector<1x16x16xf32>
    %671 = arith.addf %667, %670 : vector<1x16x16xf32>
    %cst_101 = arith.constant 0.000000e+00 : f32
    %672 = vector.broadcast %cst_101 : f32 to vector<1x16x3xf32>
    %673 = vector.extract_strided_slice %590 {offsets = [0, 0, 3], sizes = [1, 16, 13], strides = [1, 1, 1]} : vector<1x16x16xf32> to vector<1x16x13xf32>
    %674 = tpu.concatenate %673, %672 in 2 : vector<1x16x13xf32>, vector<1x16x3xf32> -> vector<1x16x16xf32>
    %cst_102 = arith.constant 0.000000e+00 : f32
    %675 = vector.broadcast %cst_102 : f32 to vector<1x16x3xf32>
    %676 = vector.extract_strided_slice %593 {offsets = [0, 0, 3], sizes = [1, 16, 13], strides = [1, 1, 1]} : vector<1x16x16xf32> to vector<1x16x13xf32>
    %677 = tpu.concatenate %676, %675 in 2 : vector<1x16x13xf32>, vector<1x16x3xf32> -> vector<1x16x16xf32>
    %c48 = arith.constant 48 : index
    %678 = memref.load %arg2[%c48] : memref<98xf32, #tpu.memory_space<smem>>
    %679 = vector.broadcast %678 : f32 to vector<1x16x16xf32>
    %680 = arith.mulf %679, %674 : vector<1x16x16xf32>
    %681 = arith.addf %671, %680 : vector<1x16x16xf32>
    %c97 = arith.constant 97 : index
    %682 = memref.load %arg2[%c97] : memref<98xf32, #tpu.memory_space<smem>>
    %683 = vector.broadcast %682 : f32 to vector<1x16x16xf32>
    %684 = arith.mulf %683, %677 : vector<1x16x16xf32>
    %685 = arith.addf %681, %684 : vector<1x16x16xf32>
    %686 = arith.negf %685 : vector<1x16x16xf32>
    %687 = math.exp %686 : vector<1x16x16xf32>
    %cst_103 = arith.constant 1.000000e+00 : f32
    %688 = vector.broadcast %cst_103 : f32 to vector<1x16x16xf32>
    %689 = arith.addf %688, %687 : vector<1x16x16xf32>
    %690 = arith.divf %688, %689 : vector<1x16x16xf32>
    %691 = vector.shape_cast %690 : vector<1x16x16xf32> to vector<1x1x16x16xf32>
    %692 = vector.broadcast %691 : vector<1x1x16x16xf32> to vector<1x4x16x16xf32>
    %693 = arith.mulf %0, %692 : vector<1x4x16x16xf32>
    %c0_104 = arith.constant 0 : index
    %c0_105 = arith.constant 0 : index
    %c0_106 = arith.constant 0 : index
    %c0_107 = arith.constant 0 : index
    %694 = vector.load %arg3[%c0_104, %c0_105, %c0_106, %c0_107] : memref<1x4x16x16xf32, #tpu.memory_space<vmem>>, vector<1x4x16x16xf32>
    tpu.vector_store %arg3[%c0_104, %c0_105, %c0_106, %c0_107], %693 {strides = array<i32>} : memref<1x4x16x16xf32, #tpu.memory_space<vmem>>, vector<1x4x16x16xf32>,
    return
  }
  func.func @transform_0(%arg0: i32) -> (i32, i32, i32, i32) {
    %c0_i32 = arith.constant 0 : i32
    %c0_i32_0 = arith.constant 0 : i32
    %c0_i32_1 = arith.constant 0 : i32
    %c0_i32_2 = arith.constant 0 : i32
    return %arg0, %c0_i32, %c0_i32_0, %c0_i32_1 : i32, i32, i32, i32
  }
  func.func @transform_1(%arg0: i32) -> i32 {
    %c0_i32 = arith.constant 0 : i32
    %c0_i32_0 = arith.constant 0 : i32
    return %c0_i32 : i32
  }
  func.func @transform_2(%arg0: i32) -> (i32, i32, i32, i32) {
    %c0_i32 = arith.constant 0 : i32
    %c0_i32_0 = arith.constant 0 : i32
    %c0_i32_1 = arith.constant 0 : i32
    %c0_i32_2 = arith.constant 0 : i32
    return %arg0, %c0_i32, %c0_i32_0, %c0_i32_1 : i32, i32, i32, i32
  }
}

</mosaic_0001>

<bundles_post_ra>
// kernel: spatial_attention.1
= control target key start
LH: loop header
LB: loop body
LE: loop exit
PB: predicated region body
PF: predicated region fallthrough
CT: control target
= control target key end

     0   :  { %7 = vsyncpa [#allocation3], 0  ;;  %s3221_s0 = inlined_call_operand.hbm [shape: f32[2,4,16,16], index: 0, kind: input, shape index: {}]   ;;  %s3222_s1 = inlined_call_operand.vmem [shape: f32[98], index: 1, kind: input, shape index: {}]   ;;  %s3223_s2 = inlined_call_operand.hbm [shape: f32[2,4,16,16], index: 2, kind: output, shape index: {}]  }
   0x1   :  { %9 = vsyncpa [#allocation3 + $0x1], 0 }
   0x2   :  { %10 = vsyncpa [#allocation5], 0 }
   0x3   :  { %11 = vsyncpa [#allocation4], 0 }
   0x4   :  { %13 = vsyncpa [#allocation4 + $0x1], 0  ;;  %s2086_s9 = smov 0   ;;  %s2088_s10 = smov 0  }
   0x5   :  { %s2090_s11 = smov 0   ;;  %s2092_s12 = smov 0  }
   0x6 LB: > { %s2107_s13 = sadd.s32 4294967295, %s2057_s12   ;;  %s1739_s14 = sadd.s32 4294967294, %s2057_s12   ;;  %s2057_s12 = sphi %s2092_s12, %s3234_s12   ;;  %s2053_s11 = sphi %s2090_s11, %s3233_s11   ;;  %s2049_s10 = sphi %s2088_s10, %s3232_s10   ;;  %s2045_s9 = sphi %s2086_s9, %s3231_s9  }
   0x7   : > { %s2111_s15 = sadd.s32 1, %s2057_s12   ;;  %s26_s16 = sadd.s32 1, %s2053_s11 }
   0x8   : > { %s23_s17 = ssub.s32 %s2057_s12, %s2111_s15  ;;  %p33_p0 = scmp.ne.s32.totalorder %s2053_s11, %s2049_s10 }
   0x9   : > { %p24_p1 = scmp.eq.s32.totalorder %s23_s17, 0  ;;  %p34_p2 = scmp.eq.s32.totalorder %s2057_s12, 0 }
   0xa   : > { %p39_p3 = scmp.ne.s32.totalorder %s2049_s10, %s2045_s9  ;;  %p40_p4 = scmp.eq.s32.totalorder %s2107_s13, 0 }
   0xb   : > { %s2123_s18 = scalar_select %p24_p1, %s2053_s11, %s26_s16  }
   0xc   : > { %p2125_p5 = por %p34_p2, %p33_p0  ;;  %p2131_p6 = por %p40_p4, %p39_p3 }
   0xd   : > { %p84_p7 = scmp.eq.s32.totalorder %s2107_s13, 1  ;;  %p90_p8 = scmp.eq.s32.totalorder %s1739_s14, 1 }
   0xe   : > { %p1740_p9 = scmp.ge.s32.totalorder %s2057_s12, 1  ;;  %p97_p10 = scmp.lt.s32.totalorder %s2057_s12, 3 }
   0xf   : > { %p2138_p11 = por %p84_p7, %p33_p0  ;;  %p2142_p12 = por %p90_p8, %p39_p3 }
  0x10   : > { %p2146_p13 = pnand %p1740_p9, %p97_p10  ;;  %s109_s26 = sshll.u32 %s3222_s1, 4  ;;  %s110_s26 = int_to_ptr.vmem [resolvable:$true] %s109_s26 }
  0x11   : > { %p1877_p2 = scmp.lt.s32.totalorder %s2057_s12, 2  ;;  %s120_s27 = sand.u32 1, %s2053_s11  }
  0x12   : > { %p1864_p1 = pneg %p2146_p13  ;;  %s1743_s29 = sshll.u32 %s120_s27, 6 }
  0x13   : > { %p2162_p3 = pnand %p1877_p2, %p2125_p5  ;;  %s2059_s30 = smov [#allocation6]  }
  0x14   : > { %p1865_p7 = pnand %p1864_p1, %p40_p4  ;;  %s1854_s3 = sshll.u32 %s2057_s12, 6 }
  0x15   : > { %s124_s4 = scalar_lea.vmem [#allocation2], %s1743_s29  ;;  %s129_s8 = scalar_lea.hbm %s3221_s0, %s1854_s3 }
  0x16   : > { %1867 = dma.vmem_to_smem (!%p1865_p7), %s110_s26, 16, %s2059_s30, [#allocation5]  }
  0x17   : > { %s132_s5 = sshll.u32 %s124_s4, 4  ;;  %s130_s14 = sshll.u32 %s129_s8, 4  ;;  %s133_s5 = int_to_ptr.vmem [resolvable:$true] %s132_s5  ;;  %s131_s14 = int_to_ptr.hbm [resolvable:$true] %s130_s14 }
  0x18   : > { %s121_s16 = scalar_lea.sflag [#allocation3], %s120_s27  ;;  %s1957_s17 = sshra.s32 %s131_s14, 4  ;;  %s1958_s17 = int_to_ptr.hbm [resolvable:$true] %s1957_s17 }
  0x19   : > { %s1959_s19 = scalar_lea.hbm %s1958_s17, 64  ;;  %p1961_p8 = pneg %p2162_p3 }
  0x1a   : > { %p1960_p5 = scmp.ne.s32.totalorder %s1958_s17, %s1959_s19  ;;  %s1964_s26 = scalar_lea.hbm %s3221_s0, 128 }
  0x1b   : > { %p1965_p1 = scmp.lt.s32.totalorder %s1958_s17, %s3221_s0  ;;  %p1966_p2 = scmp.lt.s32.totalorder %s1964_s26, %s1959_s19 }
  0x1c   : > { %p1962_p9 = pnand %p1961_p8, %p1960_p5 }
  0x1d   : > { %p1967_p7 = por %p1966_p2, %p1965_p1 }
  0x1e   : > { %p1963_p10 = pneg %p1962_p9 }
  0x20   : > { %p1968_p0 = pnand %p1967_p7, %p1963_p10 }
  0x22   : > { %1971 = shalt.err (!%p1968_p0)
}
  0x23   : > { %s2060_s27 = smov 128   ;;  %s2061_s3 = smov 8  }
  0x24   : > { %1871 = dma.hbm_to_vmem [thread:$0]  (!%p2162_p3), %s131_s14, 1024, %s133_s5, %s121_s16, %s2060_s27, %s2060_s27, %s2061_s3  }
  0x25   : > { %144 = sbr.rel (%p2146_p13) target bundleno = 661 (0x295), region = 28  ;;  %s2183_s4 = sand.u32 (!%p2146_p13), 1, %s2049_s10  }
  0x26   : > { %s1747_s6 = sshll.u32 (!%p2146_p13), %s2183_s4, 6  ;;  %s147_s7 = scalar_lea.sflag (!%p2146_p13), [#allocation3], %s2183_s4 }
  0x27   : > { %s2189_s8 = scalar_lea.vmem (!%p2146_p13), [#allocation2], %s1747_s6 }
  0x2a   : > { %2032 = dma.done.wait (%p2131_p6), %s147_s7, 1024  }
  0x2b   : > { %2034 = vsyncadd (%p2131_p6), %s147_s7, 4294966272 }
  0x2c   : > { %2036 = dma.done.wait (%p40_p4), [#allocation5], 16  }
  0x2d   : > { %2038 = vsyncadd (%p40_p4), [#allocation5], 4294967280 }
  0x2e   : > { %161 = sfence }
  0x2f   : > { %v178_v0 = vld [vmem:[%s2189_s8] sm:$0xff]  ;;  %v180_v1 = vld [vmem:[%s2189_s8 + $0x10] sm:$0xff]  ;;  %vm186_vm0 = vcmask 130048   ;;  %v179_v7 = vld [vmem:[%s2189_s8 + $0x8] sm:$0xff]  ;;  %vm226_vm1 = vcmask 1042432   ;;  %v2062_v23 = vmov 4.0  }
  0x30   : > { %v182_v2 = vld [vmem:[%s2189_s8 + $0x20] sm:$0xff]  ;;  %v184_v3 = vld [vmem:[%s2189_s8 + $0x30] sm:$0xff]  ;;  %v210_v4 = vsel %vm186_vm0, %v178_v0, -inf  ;;  %v211_v5 = vsel %vm186_vm0, %v180_v1, -inf  ;;  %v181_v10 = vld [vmem:[%s2189_s8 + $0x18] sm:$0xff]  ;;  %v217_v13 = vsel %vm186_vm0, %v179_v7, -inf  ;;  %1924 = vrcp.f32 %v2062_v23 }
  0x31   : > { %v212_v6 = vsel %vm186_vm0, %v182_v2, -inf  ;;  %v214_v9 = vsel %vm186_vm0, %v184_v3, -inf  ;;  %v183_v11 = vld [vmem:[%s2189_s8 + $0x28] sm:$0xff]  ;;  %v185_v12 = vld [vmem:[%s2189_s8 + $0x38] sm:$0xff]  ;;  %v218_v15 = vsel %vm186_vm0, %v181_v10, -inf  ;;  %v187_v25 = vsel %vm186_vm0, %v178_v0, 0.0 }
  0x32   : > { %v213_v8 = vmax.f32 %v210_v4, %v212_v6  ;;  %v215_v14 = vmax.f32 %v211_v5, %v214_v9  ;;  %v219_v16 = vsel %vm186_vm0, %v183_v11, -inf  ;;  %v221_v17 = vsel %vm186_vm0, %v185_v12, -inf  ;;  %s2063_s20 = smov 3   ;;  %s2064_s23 = smov 2  }
  0x33   : > { %v220_v18 = vmax.f32 %v217_v13, %v219_v16  ;;  %v222_v19 = vmax.f32 %v218_v15, %v221_v17  ;;  %v188_v26 = vsel %vm186_vm0, %v180_v1, 0.0  ;;  %v194_v28 = vsel %vm186_vm0, %v179_v7, 0.0  ;;  %s2065_s28 = smov 1   ;;  %s2066_s5 = smov 127  }
  0x34   : > { %v2215_v20 = vmax.f32 %v213_v8, %v215_v14  ;;  %v195_v29 = vsel %vm186_vm0, %v181_v10, 0.0  ;;  %v189_v30 = vadd.f32 %v188_v26, %v187_v25  ;;  %v190_v31 = vsel %vm186_vm0, %v182_v2, 0.0  ;;  %s2067_s14 = smov 126   ;;  %s2068_s16 = smov 125  }
  0x35   : > { %v2218_v22 = vmax.f32 %v220_v18, %v222_v19  ;;  %v196_v33 = vadd.f32 %v195_v29, %v194_v28  ;;  %v197_v35 = vsel %vm186_vm0, %v183_v11, 0.0  ;;  %v192_v38 = vsel %vm186_vm0, %v184_v3, 0.0  ;;  %s260_s17 = sld [smem:[#allocation6]] }
  0x36   : > { %v235_v21 = vrot.slane %v2215_v20, 5  ;;  %v1925_v32 = vpop.eup %1924  ;;  %v191_v37 = vadd.f32 %v190_v31, %v189_v30  ;;  %v199_v41 = vsel %vm186_vm0, %v185_v12, 0.0  ;;  %vm429_vm3 = vcmask 1041408   ;;  %s1750_s19 = sld [smem:[#allocation6 + $0x31]] }
  0x37   : > { %v236_v27 = vrot.slane %v2218_v22, 5  ;;  %v202_v36 = vmul.f32 4.0, %v1925_v32  ;;  %v198_v40 = vadd.f32 %v197_v35, %v196_v33  ;;  %vm206_vm2 = vweird.f32 %v1925_v32  ;;  %s2371_s24 = sld [smem:[#allocation6 + $0x1]] }
  0x38   : > { %v2221_v24 = vsel %vm226_vm1, 0.0, %v235_v21  ;;  %v193_v43 = vadd.f32 %v192_v38, %v191_v37  ;;  %v436_v57 = vrot.slane %v2215_v20, 6  ;;  %v437_v58 = vrot.slane %v2218_v22, 6  ;;  %s2378_s25 = sld [smem:[#allocation6 + $0x32]] }
  0x39   : > { %252 = vrot.lane.b32.xlu1 %v2221_v24, %s2063_s20  ;;  %281 = vrot.lane.b32.xlu0 %v2221_v24, %s2064_s23  ;;  %v2234_v34 = vsel %vm226_vm1, %v235_v21, %v236_v27  ;;  %v203_v39 = vsub.f32 1.0, %v202_v36  ;;  %v200_v45 = vadd.f32 %v199_v41, %v198_v40  ;;  %vm624_vm4 = vcmask 1040384   ;;  %s2384_s26 = sld [smem:[#allocation6 + $0x2]] }
  0x3a   : > { %v2309_v59 = vsel %vm429_vm3, %v436_v57, %v437_v58  ;;  %v2313_v60 = vsel %vm429_vm3, 0.0, %v436_v57  ;;  %v631_v11 = vrot.slane %v2215_v20, 7  ;;  %v632_v12 = vrot.slane %v2218_v22, 7  ;;  %s2398_s29 = sld [smem:[#allocation6 + $0x33]] }
  0x3b   : > { %v204_v42 = vmul.f32 %v1925_v32, %v203_v39  ;;  %vm248_vm5 = vcmask 23552   ;;  %v261_v16 = vstv %s260_s17  ;;  %vm278_vm6 = vcmask 15360   ;;  %s2407_s30 = sld [smem:[#allocation6 + $0x3]] }
  0x3c   : > { %v2381_v21 = vsel %vm624_vm4, %v631_v11, %v632_v12  ;;  %v267_v23 = vstv %s1750_s19  ;;  %v2390_v30 = vsel %vm624_vm4, 0.0, %v631_v11  ;;  %vm307_vm7 = vcmask 7168   ;;  %s2418_s27 = sld [smem:[#allocation6 + $0x34]] }
  0x3d   : > { %v205_v44 = vadd.f32 %v1925_v32, %v204_v42  ;;  %v290_v33 = vstv %s2371_s24  ;;  %s1757_s3 = sld [smem:[#allocation6 + $0x4]]  ;;  %vm348_vm8 = vcmask 121856   ;;  %vm377_vm9 = vcmask 113664  }
  0x3e   : > { %s2427_s7 = sld [smem:[#allocation6 + $0x35]]  ;;  %vm406_vm10 = vcmask 105472   ;;  %vm999_vm11 = vcmask 1046528   ;;  %vm1194_vm12 = vcmask 1045504   ;;  %vm1389_vm13 = vcmask 1044480  }
  0x3f   : > { %v207_v46 = vsel %vm206_vm2, %v1925_v32, %v205_v44  ;;  %v296_v44 = vstv %s2378_s25  ;;  %s2438_s17 = sld [smem:[#allocation6 + $0x5]] }
  0x40   : > { %v2241_v47 = vmul.f32 %v207_v46, %v193_v43  ;;  %v2243_v48 = vmul.f32 %v207_v46, %v200_v45  ;;  %v319_v46 = vstv %s2384_s26  ;;  %s2442_s19 = sld [smem:[#allocation6 + $0x36]] }
  0x41   : > { %254 = vrot.lane.b32.xlu1 %v2234_v34, %s2063_s20  ;;  %v331_v11 = vstv %s2407_s30  ;;  %s2449_s24 = sld [smem:[#allocation6 + $0x6]] }
  0x42   : > { %v227_v49 = vrot.slane %v2241_v47, 5  ;;  %v228_v51 = vrot.slane %v2243_v48, 5  ;;  %v430_v53 = vrot.slane %v2241_v47, 6  ;;  %v431_v54 = vrot.slane %v2243_v48, 6  ;;  %s2457_s25 = sld [smem:[#allocation6 + $0x37]] }
  0x43   : > { %v625_v0 = vrot.slane %v2241_v47, 7  ;;  %v626_v1 = vrot.slane %v2243_v48, 7  ;;  %s2461_s26 = sld [smem:[#allocation6 + $0x7]] }
  0x44   : > { %v2249_v50 = vsel %vm226_vm1, 0.0, %v227_v49  ;;  %v2257_v52 = vsel %vm226_vm1, %v227_v49, %v228_v51  ;;  %v2291_v55 = vsel %vm429_vm3, %v430_v53, %v431_v54  ;;  %v2299_v56 = vsel %vm429_vm3, 0.0, %v430_v53  ;;  %s2482_s30 = sld [smem:[#allocation6 + $0x8]] }
  0x45   : > { %242 = vrot.lane.b32.xlu0 %v2249_v50, %s2063_s20  ;;  %272 = vrot.lane.b32.xlu2 %v2249_v50, %s2064_s23  ;;  %v2352_v4 = vsel %vm624_vm4, %v625_v0, %v626_v1  ;;  %v2361_v9 = vsel %vm624_vm4, 0.0, %v625_v0 }
  0x49   : > { %283 = vrot.lane.b32.xlu1 %v2234_v34, %s2064_s23 }
  0x4d   : > { %244 = vrot.lane.b32.xlu0 %v2257_v52, %s2063_s20  ;;  %274 = vrot.lane.b32.xlu2 %v2257_v52, %s2064_s23 }
  0x51   : > { %310 = vrot.lane.b32.xlu1 %v2221_v24, %s2065_s28 }
  0x55   : > { %303 = vrot.lane.b32.xlu0 %v2257_v52, %s2065_s28  ;;  %301 = vrot.lane.b32.xlu2 %v2249_v50, %s2065_s28 }
  0x59   : > { %344 = vrot.lane.b32.xlu1 %v2257_v52, %s2066_s5 }
  0x5d   : > { %342 = vrot.lane.b32.xlu0 %v2249_v50, %s2066_s5  ;;  %312 = vrot.lane.b32.xlu2 %v2234_v34, %s2065_s28 }
  0x61   : > { %371 = vrot.lane.b32.xlu1 %v2249_v50, %s2067_s14 }
  0x65   : > { %353 = vrot.lane.b32.xlu0 %v2234_v34, %s2066_s5  ;;  %351 = vrot.lane.b32.xlu2 %v2221_v24, %s2066_s5 }
  0x69   : > { %382 = vrot.lane.b32.xlu1 %v2234_v34, %s2067_s14 }
  0x6d   : > { %380 = vrot.lane.b32.xlu0 %v2221_v24, %s2067_s14  ;;  %373 = vrot.lane.b32.xlu2 %v2257_v52, %s2067_s14 }
  0x71   : > { %409 = vrot.lane.b32.xlu1 %v2221_v24, %s2068_s16 }
  0x75   : > { %402 = vrot.lane.b32.xlu0 %v2257_v52, %s2068_s16  ;;  %400 = vrot.lane.b32.xlu2 %v2249_v50, %s2068_s16 }
  0x79   : > { %445 = vrot.lane.b32.xlu1 %v2291_v55, %s2063_s20 }
  0x7d   : > { %443 = vrot.lane.b32.xlu0 %v2299_v56, %s2063_s20  ;;  %411 = vrot.lane.b32.xlu2 %v2234_v34, %s2068_s16 }
  0x81   : > { %472 = vrot.lane.b32.xlu1 %v2299_v56, %s2064_s23 }
  0x85   : > { %454 = vrot.lane.b32.xlu0 %v2309_v59, %s2063_s20  ;;  %452 = vrot.lane.b32.xlu2 %v2313_v60, %s2063_s20 }
  0x89   : > { %482 = vrot.lane.b32.xlu1 %v2309_v59, %s2064_s23 }
  0x8d   : > { %480 = vrot.lane.b32.xlu0 %v2313_v60, %s2064_s23  ;;  %474 = vrot.lane.b32.xlu2 %v2291_v55, %s2064_s23 }
  0x91   : > { %508 = vrot.lane.b32.xlu1 %v2313_v60, %s2065_s28 }
  0x95   : > { %502 = vrot.lane.b32.xlu0 %v2291_v55, %s2065_s28  ;;  %500 = vrot.lane.b32.xlu2 %v2299_v56, %s2065_s28 }
  0x99   : > { %542 = vrot.lane.b32.xlu1 %v2291_v55, %s2066_s5 }
  0x9d   : > { %540 = vrot.lane.b32.xlu0 %v2299_v56, %s2066_s5  ;;  %510 = vrot.lane.b32.xlu2 %v2309_v59, %s2065_s28 }
  0x9f   : > { %v273_v61 = vpop.permute.xlu2 %272 }
  0xa0   : > { %v279_v35 = vsel %vm278_vm6, 0.0, %v273_v61 }
  0xa1   : > { %568 = vrot.lane.b32.xlu1 %v2299_v56, %s2067_s14  ;;  %v291_v42 = vmul.f32 %v290_v33, %v279_v35 }
  0xa5   : > { %550 = vrot.lane.b32.xlu0 %v2309_v59, %s2066_s5  ;;  %548 = vrot.lane.b32.xlu2 %v2313_v60, %s2066_s5 }
  0xa7   : > { %v275_v63 = vpop.permute.xlu2 %274 }
  0xa8   : > { %v280_v28 = vsel %vm278_vm6, 0.0, %v275_v63  ;;  %v325_v63 = vstv %s2398_s29  ;;  %s2476_s29 = sld [smem:[#allocation6 + $0x38]] }
  0xa9   : > { %578 = vrot.lane.b32.xlu1 %v2309_v59, %s2067_s14  ;;  %v292_v36 = vmul.f32 %v290_v33, %v280_v28 }
  0xab   : > { %v253_v62 = vpop.permute.xlu1 %252  ;;  %v282_v3 = vpop.permute.xlu0 %281 }
  0xac   : > { %v258_v25 = vsel %vm248_vm5, 0.0, %v253_v62  ;;  %v287_v45 = vsel %vm278_vm6, 0.0, %v282_v3 }
  0xad   : > { %576 = vrot.lane.b32.xlu0 %v2313_v60, %s2067_s14  ;;  %570 = vrot.lane.b32.xlu2 %v2291_v55, %s2067_s14  ;;  %v268_v31 = vmul.f32 %v267_v23, %v258_v25  ;;  %v297_v61 = vmul.f32 %v296_v44, %v287_v45  ;;  %v389_v45 = vstv %s2438_s17  ;;  %s2520_s17 = sld [smem:[#allocation6 + $0xa]] }
  0xaf   : > { %v302_v5 = vpop.permute.xlu2 %301 }
  0xb0   : > { %v308_v54 = vsel %vm307_vm7, 0.0, %v302_v5 }
  0xb1   : > { %604 = vrot.lane.b32.xlu1 %v2313_v60, %s2068_s16 }
  0xb3   : > { %v255_v2 = vpop.permute.xlu1 %254 }
  0xb4   : > { %v259_v15 = vsel %vm248_vm5, 0.0, %v255_v2  ;;  %v320_v2 = vmul.f32 %v319_v46, %v308_v54 }
  0xb5   : > { %598 = vrot.lane.b32.xlu0 %v2291_v55, %s2068_s16  ;;  %596 = vrot.lane.b32.xlu2 %v2299_v56, %s2068_s16  ;;  %v269_v26 = vmul.f32 %v267_v23, %v259_v15  ;;  %v333_v15 = vmul.f32 %v331_v11, %v2257_v52 }
  0xb7   : > { %v243_v7 = vpop.permute.xlu0 %242  ;;  %v313_v8 = vpop.permute.xlu2 %312 }
  0xb8   : > { %v249_v17 = vsel %vm248_vm5, 0.0, %v243_v7  ;;  %v317_v57 = vsel %vm307_vm7, 0.0, %v313_v8 }
  0xb9   : > { %640 = vrot.lane.b32.xlu1 %v2352_v4, %s2063_s20  ;;  %v262_v27 = vmul.f32 %v261_v16, %v249_v17  ;;  %v327_v5 = vmul.f32 %v325_v63, %v317_v57  ;;  %v332_v17 = vmul.f32 %v331_v11, %v2249_v50 }
  0xbb   : > { %v284_v6 = vpop.permute.xlu1 %283  ;;  %v270_v37 = vadd.f32 %v268_v31, %v262_v27 }
  0xbc   : > { %v288_v40 = vsel %vm278_vm6, 0.0, %v284_v6 }
  0xbd   : > { %638 = vrot.lane.b32.xlu0 %v2361_v9, %s2063_s20  ;;  %606 = vrot.lane.b32.xlu2 %v2309_v59, %s2068_s16  ;;  %v293_v49 = vadd.f32 %v291_v42, %v270_v37  ;;  %v298_v51 = vmul.f32 %v296_v44, %v288_v40 }
  0xbf   : > { %v245_v13 = vpop.permute.xlu0 %244  ;;  %v2373_v14 = vpop.permute.xlu2 %351  ;;  %v299_v1 = vadd.f32 %v297_v61, %v293_v49 }
  0xc0   : > { %v250_v18 = vsel %vm248_vm5, 0.0, %v245_v13 }
  0xc1   : > { %667 = vrot.lane.b32.xlu1 %v2361_v9, %s2064_s23  ;;  %v263_v19 = vmul.f32 %v261_v16, %v250_v18  ;;  %v322_v12 = vadd.f32 %v320_v2, %v299_v1  ;;  %v337_v18 = vstv %s2418_s27  ;;  %s2496_s27 = sld [smem:[#allocation6 + $0x39]] }
  0xc2   : > { %v338_v50 = vmul.f32 %v337_v18, %v2221_v24 }
  0xc3   : > { %v311_v10 = vpop.permute.xlu1 %310  ;;  %v271_v32 = vadd.f32 %v269_v26, %v263_v19  ;;  %v339_v19 = vmul.f32 %v337_v18, %v2234_v34  ;;  %v360_v26 = vstv %s1757_s3  ;;  %s2505_s3 = sld [smem:[#allocation6 + $0x9]] }
  0xc4   : > { %v316_v0 = vsel %vm307_vm7, 0.0, %v311_v10 }
  0xc5   : > { %649 = vrot.lane.b32.xlu0 %v2381_v21, %s2063_s20  ;;  %647 = vrot.lane.b32.xlu2 %v2390_v30, %s2063_s20  ;;  %v294_v43 = vadd.f32 %v292_v36, %v271_v32  ;;  %v326_v8 = vmul.f32 %v325_v63, %v316_v0  ;;  %v366_v36 = vstv %s2427_s7  ;;  %s2510_s7 = sld [smem:[#allocation6 + $0x3a]] }
  0xc7   : > { %v304_v38 = vpop.permute.xlu0 %303  ;;  %v2400_v39 = vpop.permute.xlu2 %373  ;;  %v300_v62 = vadd.f32 %v298_v51, %v294_v43  ;;  %v328_v16 = vadd.f32 %v326_v8, %v322_v12 }
  0xc8   : > { %v309_v41 = vsel %vm307_vm7, 0.0, %v304_v38  ;;  %v379_v40 = vsel %vm377_vm9, %v2400_v39, 0.0 }
  0xc9   : > { %677 = vrot.lane.b32.xlu1 %v2381_v21, %s2064_s23  ;;  %v321_v53 = vmul.f32 %v319_v46, %v309_v41  ;;  %v334_v31 = vadd.f32 %v332_v17, %v328_v16  ;;  %v391_v51 = vmul.f32 %v389_v45, %v379_v40 }
  0xcb   : > { %v345_v29 = vpop.permute.xlu1 %344  ;;  %v323_v3 = vadd.f32 %v321_v53, %v300_v62  ;;  %v340_v24 = vadd.f32 %v338_v50, %v334_v31  ;;  %v395_v53 = vstv %s2442_s19  ;;  %v418_v62 = vstv %s2449_s24  ;;  %s1770_s19 = sld [smem:[#allocation6 + $0x3b]] }
  0xcc   : > { %v350_v27 = vsel %vm348_vm8, %v345_v29, 0.0  ;;  %v357_v29 = vsel %vm348_vm8, %v2373_v14, 0.0  ;;  %v467_v50 = vstv %s2476_s29  ;;  %s2527_s24 = sld [smem:[#allocation6 + $0xb]] }
  0xcd   : > { %675 = vrot.lane.b32.xlu0 %v2390_v30, %s2064_s23  ;;  %669 = vrot.lane.b32.xlu2 %v2352_v4, %s2064_s23  ;;  %v329_v13 = vadd.f32 %v327_v5, %v323_v3  ;;  %v362_v33 = vmul.f32 %v360_v26, %v350_v27  ;;  %v367_v43 = vmul.f32 %v366_v36, %v357_v29  ;;  %s2557_s29 = sld [smem:[#allocation6 + $0x3d]] }
  0xcf   : > { %v343_v6 = vpop.permute.xlu0 %342  ;;  %v2421_v7 = vpop.permute.xlu2 %400  ;;  %v335_v23 = vadd.f32 %v333_v15, %v329_v13  ;;  %v461_v15 = vstv %s2461_s26  ;;  %s2538_s26 = sld [smem:[#allocation6 + $0xc]] }
  0xd0   : > { %v349_v28 = vsel %vm348_vm8, %v343_v6, 0.0  ;;  %v407_v2 = vsel %vm406_vm10, %v2421_v7, 0.0  ;;  %v424_v6 = vstv %s2457_s25  ;;  %s2535_s25 = sld [smem:[#allocation6 + $0x3c]] }
  0xd1   : > { %703 = vrot.lane.b32.xlu1 %v2390_v30, %s2065_s28  ;;  %v341_v34 = vadd.f32 %v339_v19, %v335_v23  ;;  %v361_v35 = vmul.f32 %v360_v26, %v349_v28  ;;  %v419_v12 = vmul.f32 %v418_v62, %v407_v2 }
  0xd3   : > { %v372_v58 = vpop.permute.xlu1 %371  ;;  %v364_v41 = vadd.f32 %v362_v33, %v341_v34  ;;  %v363_v42 = vadd.f32 %v361_v35, %v340_v24 }
  0xd4   : > { %v378_v46 = vsel %vm377_vm9, %v372_v58, 0.0 }
  0xd5   : > { %697 = vrot.lane.b32.xlu0 %v2352_v4, %s2065_s28  ;;  %695 = vrot.lane.b32.xlu2 %v2361_v9, %s2065_s28  ;;  %v369_v57 = vadd.f32 %v367_v43, %v363_v42  ;;  %v390_v61 = vmul.f32 %v389_v45, %v378_v46 }
  0xd7   : > { %v354_v25 = vpop.permute.xlu0 %353  ;;  %v412_v52 = vpop.permute.xlu2 %411  ;;  %v392_v5 = vadd.f32 %v390_v61, %v369_v57 }
  0xd8   : > { %v358_v32 = vsel %vm348_vm8, %v354_v25, 0.0  ;;  %v416_v3 = vsel %vm406_vm10, %v412_v52, 0.0 }
  0xd9   : > { %737 = vrot.lane.b32.xlu1 %v2352_v4, %s2066_s5  ;;  %v368_v38 = vmul.f32 %v366_v36, %v358_v32  ;;  %v426_v18 = vmul.f32 %v424_v6, %v416_v3  ;;  %v489_v36 = vstv %s2482_s30  ;;  %s2566_s30 = sld [smem:[#allocation6 + $0xd]] }
  0xdb   : > { %v383_v10 = vpop.permute.xlu1 %382  ;;  %v370_v49 = vadd.f32 %v368_v38, %v364_v41 }
  0xdc   : > { %v387_v54 = vsel %vm377_vm9, %v383_v10, 0.0 }
  0xdd   : > { %735 = vrot.lane.b32.xlu0 %v2361_v9, %s2066_s5  ;;  %705 = vrot.lane.b32.xlu2 %v2381_v21, %s2065_s28  ;;  %v393_v58 = vadd.f32 %v391_v51, %v370_v49  ;;  %v397_v0 = vmul.f32 %v395_v53, %v387_v54  ;;  %v495_v51 = vstv %s2496_s27  ;;  %s2571_s27 = sld [smem:[#allocation6 + $0x3e]] }
  0xdf   : > { %v381_v14 = vpop.permute.xlu0 %380  ;;  %v453_v44 = vpop.permute.xlu2 %452  ;;  %v399_v10 = vadd.f32 %v397_v0, %v393_v58  ;;  %v517_v58 = vstv %s2505_s3  ;;  %s2584_s3 = sld [smem:[#allocation6 + $0xe]] }
  0xe0   : > { %v386_v39 = vsel %vm377_vm9, %v381_v14, 0.0  ;;  %v458_v31 = vsel %vm248_vm5, 0.0, %v453_v44 }
  0xe1   : > { %763 = vrot.lane.b32.xlu1 %v2361_v9, %s2067_s14  ;;  %v396_v1 = vmul.f32 %v395_v53, %v386_v39  ;;  %v468_v38 = vmul.f32 %v467_v50, %v458_v31 }
  0xe3   : > { %v410_v37 = vpop.permute.xlu1 %409  ;;  %v398_v16 = vadd.f32 %v396_v1, %v392_v5 }
  0xe4   : > { %v415_v19 = vsel %vm406_vm10, %v410_v37, 0.0 }
  0xe5   : > { %745 = vrot.lane.b32.xlu0 %v2381_v21, %s2066_s5  ;;  %743 = vrot.lane.b32.xlu2 %v2390_v30, %s2066_s5  ;;  %v425_v26 = vmul.f32 %v424_v6, %v415_v19  ;;  %v421_v27 = vadd.f32 %v419_v12, %v398_v16  ;;  %v523_v6 = vstv %s2510_s7  ;;  %v529_v16 = vstv %s2520_s17  ;;  %s2593_s7 = sld [smem:[#allocation6 + $0x3f]] }
  0xe6   : > { %v531_v31 = vmul.f32 %v529_v16, %v2291_v55  ;;  %s2598_s17 = sld [smem:[#allocation6 + $0xf]] }
  0xe7   : > { %v403_v8 = vpop.permute.xlu0 %402  ;;  %v475_v11 = vpop.permute.xlu2 %474  ;;  %v427_v37 = vadd.f32 %v425_v26, %v421_v27  ;;  %v535_v26 = vstv %s1770_s19  ;;  %s2615_s19 = sld [smem:[#allocation6 + $0x40]] }
  0xe8   : > { %v408_v13 = vsel %vm406_vm10, %v403_v8, 0.0  ;;  %v479_v14 = vsel %vm278_vm6, 0.0, %v475_v11 }
  0xe9   : > { %773 = vrot.lane.b32.xlu1 %v2381_v21, %s2067_s14  ;;  %v420_v17 = vmul.f32 %v418_v62, %v408_v13  ;;  %v491_v39 = vmul.f32 %v489_v36, %v479_v14 }
  0xeb   : > { %v446_v63 = vpop.permute.xlu1 %445  ;;  %v422_v23 = vadd.f32 %v420_v17, %v399_v10 }
  0xec   : > { %v450_v7 = vsel %vm248_vm5, 0.0, %v446_v63 }
  0xed   : > { %v463_v25 = vmul.f32 %v461_v15, %v450_v7  ;;  %v428_v28 = vadd.f32 %v426_v18, %v422_v23  ;;  %771 = vrot.lane.b32.xlu0 %v2390_v30, %s2067_s14  ;;  %765 = vrot.lane.b32.xlu2 %v2352_v4, %s2067_s14 }
  0xef   : > { %v465_v32 = vadd.f32 %v463_v25, %v428_v28  ;;  %v444_v34 = vpop.permute.xlu0 %443  ;;  %v501_v33 = vpop.permute.xlu2 %500 }
  0xf0   : > { %v449_v35 = vsel %vm248_vm5, 0.0, %v444_v34  ;;  %v506_v0 = vsel %vm307_vm7, 0.0, %v501_v33  ;;  %v557_v34 = vstv %s2527_s24  ;;  %s2625_s24 = sld [smem:[#allocation6 + $0x10]] }
  0xf1   : > { %799 = vrot.lane.b32.xlu1 %v2390_v30, %s2068_s16  ;;  %v462_v24 = vmul.f32 %v461_v15, %v449_v35  ;;  %v518_v12 = vmul.f32 %v517_v58, %v506_v0 }
  0xf3   : > { %v473_v52 = vpop.permute.xlu1 %472  ;;  %v464_v40 = vadd.f32 %v462_v24, %v427_v37  ;;  %v563_v37 = vstv %s2535_s25  ;;  %s2630_s25 = sld [smem:[#allocation6 + $0x41]] }
  0xf4   : > { %v478_v29 = vsel %vm278_vm6, 0.0, %v473_v52  ;;  %v530_v52 = vmul.f32 %v529_v16, %v2299_v56  ;;  %v537_v56 = vmul.f32 %v535_v26, %v2309_v59  ;;  %v619_v16 = vstv %s2571_s27  ;;  %s2668_s27 = sld [smem:[#allocation6 + $0x43]] }
  0xf5   : > { %v490_v41 = vmul.f32 %v489_v36, %v478_v29  ;;  %v470_v43 = vadd.f32 %v468_v38, %v464_v40  ;;  %793 = vrot.lane.b32.xlu0 %v2352_v4, %s2068_s16  ;;  %791 = vrot.lane.b32.xlu2 %v2361_v9, %s2068_s16 }
  0xf7   : > { %v492_v44 = vadd.f32 %v490_v41, %v470_v43  ;;  %v455_v45 = vpop.permute.xlu0 %454  ;;  %v511_v46 = vpop.permute.xlu2 %510 }
  0xf8   : > { %v459_v49 = vsel %vm248_vm5, 0.0, %v455_v45  ;;  %v515_v17 = vsel %vm307_vm7, 0.0, %v511_v46 }
  0xf9   : > { %821 = vrot.lane.b32.xlu1 %v2243_v48, %s2063_s20  ;;  %v469_v54 = vmul.f32 %v467_v50, %v459_v49  ;;  %v525_v28 = vmul.f32 %v523_v6, %v515_v17 }
  0xfb   : > { %v483_v42 = vpop.permute.xlu1 %482  ;;  %v471_v57 = vadd.f32 %v469_v54, %v465_v32  ;;  %v536_v32 = vmul.f32 %v535_v26, %v2313_v60 }
  0xfc   : > { %v487_v53 = vsel %vm278_vm6, 0.0, %v483_v42  ;;  %v585_v42 = vstv %s2538_s26  ;;  %s2644_s26 = sld [smem:[#allocation6 + $0x11]] }
  0xfd   : > { %v497_v61 = vmul.f32 %v495_v51, %v487_v53  ;;  %v493_v63 = vadd.f32 %v491_v39, %v471_v57  ;;  %819 = vrot.lane.b32.xlu0 %v2241_v47, %s2063_s20  ;;  %801 = vrot.lane.b32.xlu2 %v2381_v21, %s2068_s16 }
  0xff   : > { %v499_v1 = vadd.f32 %v497_v61, %v493_v63  ;;  %v481_v2 = vpop.permute.xlu0 %480  ;;  %v549_v3 = vpop.permute.xlu2 %548 }
 0x100   : > { %v486_v5 = vsel %vm278_vm6, 0.0, %v481_v2  ;;  %v554_v55 = vsel %vm348_vm8, %v549_v3, 0.0 }
 0x101   : > { %847 = vrot.lane.b32.xlu1 %v2241_v47, %s2064_s23  ;;  %v496_v11 = vmul.f32 %v495_v51, %v486_v5  ;;  %v564_v45 = vmul.f32 %v563_v37, %v554_v55 }
 0x103   : > { %v509_v62 = vpop.permute.xlu1 %508  ;;  %v498_v13 = vadd.f32 %v496_v11, %v492_v44  ;;  %v613_v11 = vstv %s2566_s30  ;;  %s2657_s30 = sld [smem:[#allocation6 + $0x12]] }
 0x104   : > { %v514_v8 = vsel %vm307_vm7, 0.0, %v509_v62 }
 0x105   : > { %v524_v15 = vmul.f32 %v523_v6, %v514_v8  ;;  %v520_v10 = vadd.f32 %v518_v12, %v498_v13  ;;  %829 = vrot.lane.b32.xlu0 %v2218_v22, %s2063_s20  ;;  %827 = vrot.lane.b32.xlu2 %v2215_v20, %s2063_s20 }
 0x107   : > { %v526_v18 = vadd.f32 %v524_v15, %v520_v10  ;;  %v503_v19 = vpop.permute.xlu0 %502  ;;  %v571_v23 = vpop.permute.xlu2 %570 }
 0x108   : > { %v507_v25 = vsel %vm307_vm7, 0.0, %v503_v19  ;;  %v575_v39 = vsel %vm377_vm9, %v571_v23, 0.0 }
 0x109   : > { %857 = vrot.lane.b32.xlu1 %v2218_v22, %s2064_s23  ;;  %v519_v27 = vmul.f32 %v517_v58, %v507_v25  ;;  %v532_v36 = vadd.f32 %v530_v52, %v526_v18  ;;  %v591_v58 = vstv %s2557_s29  ;;  %v587_v2 = vmul.f32 %v585_v42, %v575_v39  ;;  %s2650_s29 = sld [smem:[#allocation6 + $0x42]] }
 0x10a   : > { %v1000_v39 = vrot.slane %v2241_v47, 1 }
 0x10b   : > { %v543_v7 = vpop.permute.xlu1 %542  ;;  %v521_v50 = vadd.f32 %v519_v27, %v499_v1  ;;  %v538_v59 = vadd.f32 %v536_v32, %v532_v36 }
 0x10c   : > { %v547_v33 = vsel %vm348_vm8, %v543_v7, 0.0 }
 0x10d   : > { %v527_v29 = vadd.f32 %v525_v28, %v521_v50  ;;  %855 = vrot.lane.b32.xlu0 %v2215_v20, %s2064_s23  ;;  %849 = vrot.lane.b32.xlu2 %v2243_v48, %s2064_s23  ;;  %v559_v60 = vmul.f32 %v557_v34, %v547_v33 }
 0x10f   : > { %v533_v24 = vadd.f32 %v531_v31, %v527_v29  ;;  %v541_v38 = vpop.permute.xlu0 %540  ;;  %v597_v40 = vpop.permute.xlu2 %596 }
 0x110   : > { %v546_v41 = vsel %vm348_vm8, %v541_v38, 0.0  ;;  %v602_v12 = vsel %vm406_vm10, %v597_v40, 0.0 }
 0x111   : > { %883 = vrot.lane.b32.xlu1 %v2215_v20, %s2065_s28  ;;  %v539_v14 = vadd.f32 %v537_v56, %v533_v24  ;;  %v558_v44 = vmul.f32 %v557_v34, %v546_v41  ;;  %v614_v19 = vmul.f32 %v613_v11, %v602_v12  ;;  %v656_v34 = vstv %s2584_s3  ;;  %s2671_s3 = sld [smem:[#allocation6 + $0x13]] }
 0x113   : > { %v569_v35 = vpop.permute.xlu1 %568  ;;  %v561_v46 = vadd.f32 %v559_v60, %v539_v14  ;;  %v560_v49 = vadd.f32 %v558_v44, %v538_v59  ;;  %v662_v60 = vstv %s2593_s7  ;;  %v684_v14 = vstv %s2598_s17  ;;  %s2691_s7 = sld [smem:[#allocation6 + $0x44]] }
 0x114   : > { %v574_v43 = vsel %vm377_vm9, %v569_v35, 0.0  ;;  %s2700_s17 = sld [smem:[#allocation6 + $0x14]] }
 0x115   : > { %v586_v51 = vmul.f32 %v585_v42, %v574_v43  ;;  %v566_v54 = vadd.f32 %v564_v45, %v560_v49  ;;  %877 = vrot.lane.b32.xlu0 %v2243_v48, %s2065_s28  ;;  %875 = vrot.lane.b32.xlu2 %v2241_v47, %s2065_s28 }
 0x117   : > { %v588_v57 = vadd.f32 %v586_v51, %v566_v54  ;;  %v551_v61 = vpop.permute.xlu0 %550  ;;  %v607_v62 = vpop.permute.xlu2 %606 }
 0x118   : > { %v555_v63 = vsel %vm348_vm8, %v551_v61, 0.0  ;;  %v611_v27 = vsel %vm406_vm10, %v607_v62, 0.0 }
 0x119   : > { %917 = vrot.lane.b32.xlu1 %v2243_v48, %s2066_s5  ;;  %v565_v1 = vmul.f32 %v563_v37, %v555_v63  ;;  %v621_v36 = vmul.f32 %v619_v16, %v611_v27  ;;  %v1001_v37 = vrot.slane %v2243_v48, 1 }
 0x11b   : > { %v579_v53 = vpop.permute.xlu1 %578  ;;  %v567_v3 = vadd.f32 %v565_v1, %v561_v46  ;;  %v2610_v42 = vsel %vm999_vm11, %v1001_v37, 0.0 }
 0x11c   : > { %v583_v0 = vsel %vm377_vm9, %v579_v53, 0.0 }
 0x11d   : > { %v593_v5 = vmul.f32 %v591_v58, %v583_v0  ;;  %v589_v8 = vadd.f32 %v587_v2, %v567_v3  ;;  %915 = vrot.lane.b32.xlu0 %v2241_v47, %s2066_s5  ;;  %885 = vrot.lane.b32.xlu2 %v2218_v22, %s2065_s28  ;;  %v690_v0 = vstv %s2615_s19  ;;  %s2705_s19 = sld [smem:[#allocation6 + $0x45]] }
 0x11f   : > { %v595_v13 = vadd.f32 %v593_v5, %v589_v8  ;;  %v577_v15 = vpop.permute.xlu0 %576  ;;  %v648_v7 = vpop.permute.xlu2 %647  ;;  %v2633_v5 = vsel %vm999_vm11, %v1000_v39, %v1001_v37 }
 0x120   : > { %v582_v10 = vsel %vm377_vm9, %v577_v15, 0.0  ;;  %v653_v38 = vsel %vm248_vm5, 0.0, %v648_v7  ;;  %v712_v15 = vstv %s2625_s24  ;;  %s2718_s24 = sld [smem:[#allocation6 + $0x15]] }
 0x121   : > { %943 = vrot.lane.b32.xlu1 %v2241_v47, %s2067_s14  ;;  %v592_v18 = vmul.f32 %v591_v58, %v582_v10  ;;  %v663_v46 = vmul.f32 %v662_v60, %v653_v38 }
 0x123   : > { %v605_v6 = vpop.permute.xlu1 %604  ;;  %v594_v23 = vadd.f32 %v592_v18, %v588_v57 }
 0x124   : > { %v610_v17 = vsel %vm406_vm10, %v605_v6, 0.0 }
 0x125   : > { %v620_v25 = vmul.f32 %v619_v16, %v610_v17  ;;  %v616_v26 = vadd.f32 %v614_v19, %v594_v23  ;;  %925 = vrot.lane.b32.xlu0 %v2218_v22, %s2066_s5  ;;  %923 = vrot.lane.b32.xlu2 %v2215_v20, %s2066_s5  ;;  %v718_v19 = vstv %s2630_s25  ;;  %s2727_s25 = sld [smem:[#allocation6 + $0x46]] }
 0x127   : > { %v622_v28 = vadd.f32 %v620_v25, %v616_v26  ;;  %v599_v50 = vpop.permute.xlu0 %598  ;;  %v670_v31 = vpop.permute.xlu2 %669  ;;  %v1006_v25 = vrot.slane %v2215_v20, 1 }
 0x128   : > { %v603_v32 = vsel %vm406_vm10, %v599_v50, 0.0  ;;  %v674_v57 = vsel %vm278_vm6, 0.0, %v670_v31 }
 0x129   : > { %953 = vrot.lane.b32.xlu1 %v2218_v22, %s2067_s14  ;;  %v615_v35 = vmul.f32 %v613_v11, %v603_v32  ;;  %v686_v3 = vmul.f32 %v684_v14, %v674_v57  ;;  %v780_v57 = vstv %s2671_s3  ;;  %s2778_s3 = sld [smem:[#allocation6 + $0x18]] }
 0x12b   : > { %v641_v52 = vpop.permute.xlu1 %640  ;;  %v617_v56 = vadd.f32 %v615_v35, %v595_v13  ;;  %v1007_v13 = vrot.slane %v2218_v22, 1 }
 0x12c   : > { %v645_v33 = vsel %vm248_vm5, 0.0, %v641_v52 }
 0x12d   : > { %v658_v29 = vmul.f32 %v656_v34, %v645_v33  ;;  %v623_v24 = vadd.f32 %v621_v36, %v617_v56  ;;  %951 = vrot.lane.b32.xlu0 %v2215_v20, %s2067_s14  ;;  %945 = vrot.lane.b32.xlu2 %v2243_v48, %s2067_s14  ;;  %v2653_v27 = vsel %vm999_vm11, %v1007_v13, 0.0  ;;  %v2660_v32 = vsel %vm999_vm11, %v1006_v25, %v1007_v13 }
 0x12e   : > { %v724_v33 = vstv %s2644_s26  ;;  %s2732_s26 = sld [smem:[#allocation6 + $0x16]] }
 0x12f   : > { %v660_v40 = vadd.f32 %v658_v29, %v623_v24  ;;  %v639_v41 = vpop.permute.xlu0 %638  ;;  %v696_v43 = vpop.permute.xlu2 %695  ;;  %v730_v24 = vstv %s2650_s29  ;;  %s2749_s29 = sld [smem:[#allocation6 + $0x47]] }
 0x130   : > { %v644_v59 = vsel %vm248_vm5, 0.0, %v639_v41  ;;  %v701_v7 = vsel %vm307_vm7, 0.0, %v696_v43  ;;  %v726_v41 = vmul.f32 %v724_v33, %v2352_v4  ;;  %v731_v43 = vmul.f32 %v730_v24, %v2390_v30 }
 0x131   : > { %979 = vrot.lane.b32.xlu1 %v2215_v20, %s2068_s16  ;;  %v657_v45 = vmul.f32 %v656_v34, %v644_v59  ;;  %v713_v26 = vmul.f32 %v712_v15, %v701_v7  ;;  %v752_v59 = vstv %s2657_s30  ;;  %v786_v7 = vstv %s2691_s7  ;;  %s2759_s30 = sld [smem:[#allocation6 + $0x17]] }
 0x132   : > { %s2784_s7 = sld [smem:[#allocation6 + $0x49]] }
 0x133   : > { %v668_v55 = vpop.permute.xlu1 %667  ;;  %v659_v49 = vadd.f32 %v657_v45, %v622_v28 }
 0x134   : > { %v673_v44 = vsel %vm278_vm6, 0.0, %v668_v55  ;;  %v725_v55 = vmul.f32 %v724_v33, %v2361_v9  ;;  %v732_v9 = vmul.f32 %v730_v24, %v2381_v21  ;;  %v814_v33 = vstv %s2705_s19  ;;  %s2802_s19 = sld [smem:[#allocation6 + $0x4a]] }
 0x135   : > { %v685_v51 = vmul.f32 %v684_v14, %v673_v44  ;;  %v665_v54 = vadd.f32 %v663_v46, %v659_v49  ;;  %973 = vrot.lane.b32.xlu0 %v2243_v48, %s2068_s16  ;;  %971 = vrot.lane.b32.xlu2 %v2241_v47, %s2068_s16  ;;  %v758_v49 = vstv %s2668_s27  ;;  %s2764_s27 = sld [smem:[#allocation6 + $0x48]] }
 0x137   : > { %v687_v61 = vadd.f32 %v685_v51, %v665_v54  ;;  %v650_v62 = vpop.permute.xlu0 %649  ;;  %v706_v63 = vpop.permute.xlu2 %705 }
 0x138   : > { %v654_v58 = vsel %vm248_vm5, 0.0, %v650_v62  ;;  %v710_v35 = vsel %vm307_vm7, 0.0, %v706_v63 }
 0x139   : > { %1015 = vrot.lane.b32.xlu1 %v2610_v42, %s2063_s20  ;;  %v664_v2 = vmul.f32 %v662_v60, %v654_v58  ;;  %v720_v38 = vmul.f32 %v718_v19, %v710_v35 }
 0x13b   : > { %v678_v53 = vpop.permute.xlu1 %677  ;;  %v666_v6 = vadd.f32 %v664_v2, %v660_v40 }
 0x13c   : > { %v682_v1 = vsel %vm278_vm6, 0.0, %v678_v53 }
 0x13d   : > { %v692_v8 = vmul.f32 %v690_v0, %v682_v1  ;;  %v688_v12 = vadd.f32 %v686_v3, %v666_v6  ;;  %1013 = vrot.lane.b32.xlu0 %v2633_v5, %s2063_s20  ;;  %981 = vrot.lane.b32.xlu2 %v2218_v22, %s2068_s16 }
 0x13f   : > { %v694_v10 = vadd.f32 %v692_v8, %v688_v12  ;;  %v676_v16 = vpop.permute.xlu0 %675  ;;  %v744_v17 = vpop.permute.xlu2 %743 }
 0x140   : > { %v681_v18 = vsel %vm278_vm6, 0.0, %v676_v16  ;;  %v749_v4 = vsel %vm348_vm8, %v744_v17, 0.0 }
 0x141   : > { %1042 = vrot.lane.b32.xlu1 %v2633_v5, %s2064_s23  ;;  %v691_v52 = vmul.f32 %v690_v0, %v681_v18  ;;  %v759_v58 = vmul.f32 %v758_v49, %v749_v4 }
 0x143   : > { %v704_v11 = vpop.permute.xlu1 %703  ;;  %v693_v28 = vadd.f32 %v691_v52, %v687_v61  ;;  %v808_v52 = vstv %s2700_s17  ;;  %s2791_s17 = sld [smem:[#allocation6 + $0x19]] }
 0x144   : > { %v709_v23 = vsel %vm307_vm7, 0.0, %v704_v11 }
 0x145   : > { %v719_v50 = vmul.f32 %v718_v19, %v709_v23  ;;  %v715_v34 = vadd.f32 %v713_v26, %v693_v28  ;;  %1024 = vrot.lane.b32.xlu0 %v2653_v27, %s2063_s20  ;;  %1022 = vrot.lane.b32.xlu2 %v2660_v32, %s2063_s20 }
 0x147   : > { %v721_v36 = vadd.f32 %v719_v50, %v715_v34  ;;  %v698_v56 = vpop.permute.xlu0 %697  ;;  %v766_v29 = vpop.permute.xlu2 %765 }
 0x148   : > { %v702_v37 = vsel %vm307_vm7, 0.0, %v698_v56  ;;  %v770_v8 = vsel %vm377_vm9, %v766_v29, 0.0 }
 0x149   : > { %1052 = vrot.lane.b32.xlu1 %v2653_v27, %s2064_s23  ;;  %v714_v60 = vmul.f32 %v712_v15, %v702_v37  ;;  %v727_v45 = vadd.f32 %v725_v55, %v721_v36  ;;  %v782_v17 = vmul.f32 %v780_v57, %v770_v8  ;;  %v1195_v8 = vrot.slane %v2241_v47, 2 }
 0x14b   : > { %v738_v31 = vpop.permute.xlu1 %737  ;;  %v716_v40 = vadd.f32 %v714_v60, %v694_v10  ;;  %v733_v21 = vadd.f32 %v731_v43, %v727_v45 }
 0x14c   : > { %v742_v14 = vsel %vm348_vm8, %v738_v31, 0.0 }
 0x14d   : > { %v722_v46 = vadd.f32 %v720_v38, %v716_v40  ;;  %1050 = vrot.lane.b32.xlu0 %v2660_v32, %s2064_s23  ;;  %1044 = vrot.lane.b32.xlu2 %v2610_v42, %s2064_s23  ;;  %v754_v30 = vmul.f32 %v752_v59, %v742_v14 }
 0x14f   : > { %v728_v51 = vadd.f32 %v726_v41, %v722_v46  ;;  %v736_v53 = vpop.permute.xlu0 %735  ;;  %v792_v54 = vpop.permute.xlu2 %791 }
 0x150   : > { %v741_v39 = vsel %vm348_vm8, %v736_v53, 0.0  ;;  %v797_v26 = vsel %vm406_vm10, %v792_v54, 0.0 }
 0x151   : > { %1078 = vrot.lane.b32.xlu1 %v2660_v32, %s2065_s28  ;;  %v734_v62 = vadd.f32 %v732_v9, %v728_v51  ;;  %v753_v63 = vmul.f32 %v752_v59, %v741_v39  ;;  %v809_v56 = vmul.f32 %v808_v52, %v797_v26  ;;  %v836_v59 = vstv %s2718_s24  ;;  %s2805_s24 = sld [smem:[#allocation6 + $0x1a]] }
 0x153   : > { %v764_v44 = vpop.permute.xlu1 %763  ;;  %v756_v0 = vadd.f32 %v754_v30, %v734_v62  ;;  %v755_v1 = vadd.f32 %v753_v63, %v733_v21  ;;  %v842_v30 = vstv %s2727_s25  ;;  %v864_v62 = vstv %s2732_s26  ;;  %s2825_s25 = sld [smem:[#allocation6 + $0x4b]] }
 0x154   : > { %v769_v61 = vsel %vm377_vm9, %v764_v44, 0.0  ;;  %s2834_s26 = sld [smem:[#allocation6 + $0x1b]] }
 0x155   : > { %v781_v2 = vmul.f32 %v780_v57, %v769_v61  ;;  %v761_v6 = vadd.f32 %v759_v58, %v755_v1  ;;  %1072 = vrot.lane.b32.xlu0 %v2610_v42, %s2065_s28  ;;  %1070 = vrot.lane.b32.xlu2 %v2633_v5, %s2065_s28 }
 0x157   : > { %v783_v11 = vadd.f32 %v781_v2, %v761_v6  ;;  %v746_v12 = vpop.permute.xlu0 %745  ;;  %v802_v13 = vpop.permute.xlu2 %801 }
 0x158   : > { %v750_v15 = vsel %vm348_vm8, %v746_v12, 0.0  ;;  %v806_v60 = vsel %vm406_vm10, %v802_v13, 0.0 }
 0x159   : > { %1112 = vrot.lane.b32.xlu1 %v2610_v42, %s2066_s5  ;;  %v760_v16 = vmul.f32 %v758_v49, %v750_v15  ;;  %v816_v45 = vmul.f32 %v814_v33, %v806_v60  ;;  %v1196_v49 = vrot.slane %v2243_v48, 2 }
 0x15b   : > { %v774_v3 = vpop.permute.xlu1 %773  ;;  %v762_v18 = vadd.f32 %v760_v16, %v756_v0  ;;  %v2744_v57 = vsel %vm1194_vm12, %v1196_v49, 0.0 }
 0x15c   : > { %v778_v10 = vsel %vm377_vm9, %v774_v3, 0.0 }
 0x15d   : > { %v788_v19 = vmul.f32 %v786_v7, %v778_v10  ;;  %v784_v25 = vadd.f32 %v782_v17, %v762_v18  ;;  %1110 = vrot.lane.b32.xlu0 %v2633_v5, %s2066_s5  ;;  %1080 = vrot.lane.b32.xlu2 %v2653_v27, %s2065_s28  ;;  %v870_v10 = vstv %s2749_s29  ;;  %s2839_s29 = sld [smem:[#allocation6 + $0x4c]] }
 0x15f   : > { %v790_v28 = vadd.f32 %v788_v19, %v784_v25  ;;  %v772_v50 = vpop.permute.xlu0 %771  ;;  %v828_v31 = vpop.permute.xlu2 %827  ;;  %v2767_v19 = vsel %vm1194_vm12, %v1195_v8, %v1196_v49 }
 0x160   : > { %v777_v34 = vsel %vm377_vm9, %v772_v50, 0.0  ;;  %v833_v53 = vsel %vm248_vm5, 0.0, %v828_v31  ;;  %v892_v50 = vstv %s2759_s30  ;;  %s2852_s30 = sld [smem:[#allocation6 + $0x1c]] }
 0x161   : > { %1138 = vrot.lane.b32.xlu1 %v2633_v5, %s2067_s14  ;;  %v787_v36 = vmul.f32 %v786_v7, %v777_v34  ;;  %v843_v0 = vmul.f32 %v842_v30, %v833_v53 }
 0x163   : > { %v800_v23 = vpop.permute.xlu1 %799  ;;  %v789_v29 = vadd.f32 %v787_v36, %v783_v11 }
 0x164   : > { %v805_v35 = vsel %vm406_vm10, %v800_v23, 0.0 }
 0x165   : > { %v815_v37 = vmul.f32 %v814_v33, %v805_v35  ;;  %v811_v24 = vadd.f32 %v809_v56, %v789_v29  ;;  %1120 = vrot.lane.b32.xlu0 %v2653_v27, %s2066_s5  ;;  %1118 = vrot.lane.b32.xlu2 %v2660_v32, %s2066_s5  ;;  %v898_v56 = vstv %s2764_s27  ;;  %s2861_s27 = sld [smem:[#allocation6 + $0x4d]] }
 0x167   : > { %v817_v38 = vadd.f32 %v815_v37, %v811_v24  ;;  %v794_v40 = vpop.permute.xlu0 %793  ;;  %v850_v41 = vpop.permute.xlu2 %849  ;;  %v1201_v37 = vrot.slane %v2215_v20, 2 }
 0x168   : > { %v798_v43 = vsel %vm406_vm10, %v794_v40, 0.0  ;;  %v854_v11 = vsel %vm278_vm6, 0.0, %v850_v41 }
 0x169   : > { %1148 = vrot.lane.b32.xlu1 %v2653_v27, %s2067_s14  ;;  %v810_v44 = vmul.f32 %v808_v52, %v798_v43  ;;  %v866_v18 = vmul.f32 %v864_v62, %v854_v11 }
 0x16b   : > { %v822_v55 = vpop.permute.xlu1 %821  ;;  %v812_v9 = vadd.f32 %v810_v44, %v790_v28  ;;  %v1202_v28 = vrot.slane %v2218_v22, 2 }
 0x16c   : > { %v826_v14 = vsel %vm248_vm5, 0.0, %v822_v55 }
 0x16d   : > { %v838_v46 = vmul.f32 %v836_v59, %v826_v14  ;;  %v818_v51 = vadd.f32 %v816_v45, %v812_v9  ;;  %1146 = vrot.lane.b32.xlu0 %v2660_v32, %s2067_s14  ;;  %1140 = vrot.lane.b32.xlu2 %v2610_v42, %s2067_s14  ;;  %v2787_v60 = vsel %vm1194_vm12, %v1202_v28, 0.0  ;;  %v2794_v43 = vsel %vm1194_vm12, %v1201_v37, %v1202_v28 }
 0x16e   : > { %v904_v14 = vstv %s2778_s3  ;;  %s2866_s3 = sld [smem:[#allocation6 + $0x1d]] }
 0x16f   : > { %v840_v54 = vadd.f32 %v838_v46, %v818_v51  ;;  %v820_v39 = vpop.permute.xlu0 %819  ;;  %v876_v61 = vpop.permute.xlu2 %875  ;;  %v910_v51 = vstv %s2784_s7  ;;  %s2883_s7 = sld [smem:[#allocation6 + $0x4e]] }
 0x170   : > { %v825_v21 = vsel %vm248_vm5, 0.0, %v820_v39  ;;  %v881_v31 = vsel %vm307_vm7, 0.0, %v876_v61  ;;  %v906_v39 = vmul.f32 %v904_v14, %v2243_v48  ;;  %v911_v61 = vmul.f32 %v910_v51, %v2215_v20 }
 0x171   : > { %1174 = vrot.lane.b32.xlu1 %v2660_v32, %s2068_s16  ;;  %v837_v58 = vmul.f32 %v836_v59, %v825_v21  ;;  %v893_v24 = vmul.f32 %v892_v50, %v881_v31  ;;  %v932_v21 = vstv %s2791_s17  ;;  %s2893_s17 = sld [smem:[#allocation6 + $0x1e]] }
 0x173   : > { %v848_v4 = vpop.permute.xlu1 %847  ;;  %v839_v1 = vadd.f32 %v837_v58, %v817_v38 }
 0x174   : > { %v853_v63 = vsel %vm278_vm6, 0.0, %v848_v4  ;;  %v905_v4 = vmul.f32 %v904_v14, %v2241_v47 }
 0x175   : > { %v865_v2 = vmul.f32 %v864_v62, %v853_v63  ;;  %v845_v6 = vadd.f32 %v843_v0, %v839_v1  ;;  %1168 = vrot.lane.b32.xlu0 %v2610_v42, %s2068_s16  ;;  %1166 = vrot.lane.b32.xlu2 %v2633_v5, %s2068_s16  ;;  %v912_v0 = vmul.f32 %v910_v51, %v2218_v22 }
 0x177   : > { %v867_v12 = vadd.f32 %v865_v2, %v845_v6  ;;  %v830_v13 = vpop.permute.xlu0 %829  ;;  %v886_v15 = vpop.permute.xlu2 %885  ;;  %v938_v2 = vstv %s2802_s19  ;;  %s2898_s19 = sld [smem:[#allocation6 + $0x4f]] }
 0x178   : > { %v834_v7 = vsel %vm248_vm5, 0.0, %v830_v13  ;;  %v890_v44 = vsel %vm307_vm7, 0.0, %v886_v15  ;;  %v960_v15 = vstv %s2805_s24  ;;  %s2912_s24 = sld [smem:[#allocation6 + $0x1f]] }
 0x179   : > { %1210 = vrot.lane.b32.xlu1 %v2744_v57, %s2063_s20  ;;  %v844_v17 = vmul.f32 %v842_v30, %v834_v7  ;;  %v900_v53 = vmul.f32 %v898_v56, %v890_v44 }
 0x17b   : > { %v858_v3 = vpop.permute.xlu1 %857  ;;  %v846_v23 = vadd.f32 %v844_v17, %v840_v54 }
 0x17c   : > { %v862_v16 = vsel %vm278_vm6, 0.0, %v858_v3 }
 0x17d   : > { %v872_v25 = vmul.f32 %v870_v10, %v862_v16  ;;  %v868_v26 = vadd.f32 %v866_v18, %v846_v23  ;;  %1208 = vrot.lane.b32.xlu0 %v2767_v19, %s2063_s20  ;;  %1176 = vrot.lane.b32.xlu2 %v2653_v27, %s2068_s16 }
 0x17f   : > { %v874_v34 = vadd.f32 %v872_v25, %v868_v26  ;;  %v856_v33 = vpop.permute.xlu0 %855  ;;  %v924_v35 = vpop.permute.xlu2 %923 }
 0x180   : > { %v861_v36 = vsel %vm278_vm6, 0.0, %v856_v33  ;;  %v929_v3 = vsel %vm348_vm8, %v924_v35, 0.0 }
 0x181   : > { %1237 = vrot.lane.b32.xlu1 %v2767_v19, %s2064_s23  ;;  %v871_v55 = vmul.f32 %v870_v10, %v861_v36  ;;  %v939_v18 = vmul.f32 %v938_v2, %v929_v3  ;;  %v966_v36 = vstv %s2825_s25  ;;  %s2921_s25 = sld [smem:[#allocation6 + $0x50]] }
 0x183   : > { %v884_v52 = vpop.permute.xlu1 %883  ;;  %v873_v38 = vadd.f32 %v871_v55, %v867_v12 }
 0x184   : > { %v889_v29 = vsel %vm307_vm7, 0.0, %v884_v52 }
 0x185   : > { %v899_v40 = vmul.f32 %v898_v56, %v889_v29  ;;  %v895_v59 = vadd.f32 %v893_v24, %v873_v38  ;;  %1219 = vrot.lane.b32.xlu0 %v2787_v60, %s2063_s20  ;;  %1217 = vrot.lane.b32.xlu2 %v2794_v43, %s2063_s20 }
 0x187   : > { %v901_v45 = vadd.f32 %v899_v40, %v895_v59  ;;  %v878_v9 = vpop.permute.xlu0 %877  ;;  %v946_v46 = vpop.permute.xlu2 %945 }
 0x188   : > { %v882_v49 = vsel %vm307_vm7, 0.0, %v878_v9 }
 0x189   : > { %1247 = vrot.lane.b32.xlu1 %v2787_v60, %s2064_s23  ;;  %v894_v30 = vmul.f32 %v892_v50, %v882_v49  ;;  %v907_v58 = vadd.f32 %v905_v4, %v901_v45  ;;  %v950_v50 = vsel %vm377_vm9, %v946_v46, 0.0  ;;  %v994_v46 = vstv %s2839_s29  ;;  %s2936_s29 = sld [smem:[#allocation6 + $0x51]] }
 0x18a   : > { %v962_v37 = vmul.f32 %v960_v15, %v950_v50 }
 0x18b   : > { %v918_v41 = vpop.permute.xlu1 %917  ;;  %v896_v54 = vadd.f32 %v894_v30, %v874_v34  ;;  %v913_v10 = vadd.f32 %v911_v61, %v907_v58 }
 0x18c   : > { %v922_v62 = vsel %vm348_vm8, %v918_v41, 0.0  ;;  %v988_v41 = vstv %s2834_s26  ;;  %s2925_s26 = sld [smem:[#allocation6 + $0x20]] }
 0x18d   : > { %v902_v1 = vadd.f32 %v900_v53, %v896_v54  ;;  %1245 = vrot.lane.b32.xlu0 %v2794_v43, %s2064_s23  ;;  %1239 = vrot.lane.b32.xlu2 %v2744_v57, %s2064_s23  ;;  %v934_v8 = vmul.f32 %v932_v21, %v922_v62 }
 0x18f   : > { %v908_v6 = vadd.f32 %v906_v39, %v902_v1  ;;  %v916_v11 = vpop.permute.xlu0 %915  ;;  %v972_v12 = vpop.permute.xlu2 %971 }
 0x190   : > { %v921_v13 = vsel %vm348_vm8, %v916_v11, 0.0  ;;  %v977_v59 = vsel %vm406_vm10, %v972_v12, 0.0  ;;  %v1391_v11 = vrot.slane %v2243_v48, 3 }
 0x191   : > { %1273 = vrot.lane.b32.xlu1 %v2794_v43, %s2065_s28  ;;  %v914_v16 = vadd.f32 %v912_v0, %v908_v6  ;;  %v933_v17 = vmul.f32 %v932_v21, %v921_v13  ;;  %v989_v51 = vmul.f32 %v988_v41, %v977_v59  ;;  %v1031_v0 = vstv %s2852_s30  ;;  %s2939_s30 = sld [smem:[#allocation6 + $0x21]] }
 0x193   : > { %v944_v63 = vpop.permute.xlu1 %943  ;;  %v936_v23 = vadd.f32 %v934_v8, %v914_v16  ;;  %v935_v25 = vadd.f32 %v933_v17, %v913_v10  ;;  %v2878_v17 = vsel %vm1389_vm13, %v1391_v11, 0.0 }
 0x194   : > { %v949_v7 = vsel %vm377_vm9, %v944_v63, 0.0 }
 0x195   : > { %v961_v52 = vmul.f32 %v960_v15, %v949_v7  ;;  %v941_v28 = vadd.f32 %v939_v18, %v935_v25  ;;  %1267 = vrot.lane.b32.xlu0 %v2744_v57, %s2065_s28  ;;  %1265 = vrot.lane.b32.xlu2 %v2767_v19, %s2065_s28  ;;  %v1037_v15 = vstv %s2861_s27  ;;  %s2973_s27 = sld [smem:[#allocation6 + $0x53]] }
 0x197   : > { %v963_v31 = vadd.f32 %v961_v52, %v941_v28  ;;  %v926_v34 = vpop.permute.xlu0 %925  ;;  %v982_v33 = vpop.permute.xlu2 %981 }
 0x198   : > { %v930_v35 = vsel %vm348_vm8, %v926_v34, 0.0  ;;  %v986_v61 = vsel %vm406_vm10, %v982_v33, 0.0  ;;  %v1390_v33 = vrot.slane %v2241_v47, 3 }
 0x199   : > { %1307 = vrot.lane.b32.xlu1 %v2744_v57, %s2066_s5  ;;  %v940_v29 = vmul.f32 %v938_v2, %v930_v35  ;;  %v996_v3 = vmul.f32 %v994_v46, %v986_v61 }
 0x19b   : > { %v954_v26 = vpop.permute.xlu1 %953  ;;  %v942_v55 = vadd.f32 %v940_v29, %v936_v23  ;;  %v1059_v23 = vstv %s2866_s3  ;;  %s2986_s3 = sld [smem:[#allocation6 + $0x23]] }
 0x19c   : > { %v958_v56 = vsel %vm377_vm9, %v954_v26, 0.0 }
 0x19d   : > { %v968_v24 = vmul.f32 %v966_v36, %v958_v56  ;;  %v964_v40 = vadd.f32 %v962_v37, %v942_v55  ;;  %1305 = vrot.lane.b32.xlu0 %v2767_v19, %s2066_s5  ;;  %1275 = vrot.lane.b32.xlu2 %v2787_v60, %s2065_s28  ;;  %v1065_v55 = vstv %s2883_s7  ;;  %s3029_s7 = sld [smem:[#allocation6 + $0x56]] }
 0x19f   : > { %v970_v14 = vadd.f32 %v968_v24, %v964_v40  ;;  %v952_v44 = vpop.permute.xlu0 %951  ;;  %v1023_v45 = vpop.permute.xlu2 %1022  ;;  %v2901_v40 = vsel %vm1389_vm13, %v1390_v33, %v1391_v11 }
 0x1a0   : > { %v957_v9 = vsel %vm377_vm9, %v952_v44, 0.0  ;;  %v1028_v7 = vsel %vm248_vm5, 0.0, %v1023_v45  ;;  %v1397_v45 = vrot.slane %v2218_v22, 3 }
 0x1a1   : > { %1333 = vrot.lane.b32.xlu1 %v2767_v19, %s2067_s14  ;;  %v967_v4 = vmul.f32 %v966_v36, %v957_v9  ;;  %v1038_v26 = vmul.f32 %v1037_v15, %v1028_v7  ;;  %v1087_v9 = vstv %s2893_s17  ;;  %v1105_v7 = vstv %s2921_s25  ;;  %s3035_s17 = sld [smem:[#allocation6 + $0x26]] }
 0x1a2   : > { %s3051_s25 = sld [smem:[#allocation6 + $0x58]] }
 0x1a3   : > { %v980_v38 = vpop.permute.xlu1 %979  ;;  %v969_v30 = vadd.f32 %v967_v4, %v963_v31 }
 0x1a4   : > { %v985_v49 = vsel %vm406_vm10, %v980_v38, 0.0 }
 0x1a5   : > { %v995_v53 = vmul.f32 %v994_v46, %v985_v49  ;;  %v991_v39 = vadd.f32 %v989_v51, %v969_v30  ;;  %1315 = vrot.lane.b32.xlu0 %v2787_v60, %s2066_s5  ;;  %1313 = vrot.lane.b32.xlu2 %v2794_v43, %s2066_s5 }
 0x1a7   : > { %v997_v21 = vadd.f32 %v995_v53, %v991_v39  ;;  %v974_v62 = vpop.permute.xlu0 %973  ;;  %v1045_v63 = vpop.permute.xlu2 %1044  ;;  %v1093_v53 = vstv %s2898_s19  ;;  %v1396_v39 = vrot.slane %v2215_v20, 3  ;;  %s3045_s19 = sld [smem:[#allocation6 + $0x57]] }
 0x1a8   : > { %v978_v58 = vsel %vm406_vm10, %v974_v62, 0.0  ;;  %v1049_v35 = vsel %vm278_vm6, 0.0, %v1045_v63 }
 0x1a9   : > { %1343 = vrot.lane.b32.xlu1 %v2787_v60, %s2067_s14  ;;  %v990_v2 = vmul.f32 %v988_v41, %v978_v58  ;;  %v1061_v47 = vmul.f32 %v1059_v23, %v1049_v35  ;;  %v1155_v35 = vstv %s2939_s30  ;;  %s3075_s30 = sld [smem:[#allocation6 + $0x29]] }
 0x1ab   : > { %v1016_v54 = vpop.permute.xlu1 %1015  ;;  %v992_v6 = vadd.f32 %v990_v2, %v970_v14 }
 0x1ac   : > { %v1020_v1 = vsel %vm248_vm5, 0.0, %v1016_v54 }
 0x1ad   : > { %v1033_v8 = vmul.f32 %v1031_v0, %v1020_v1  ;;  %v998_v13 = vadd.f32 %v996_v3, %v992_v6  ;;  %1341 = vrot.lane.b32.xlu0 %v2794_v43, %s2067_s14  ;;  %1335 = vrot.lane.b32.xlu2 %v2744_v57, %s2067_s14  ;;  %v1099_v1 = vstv %s2912_s24  ;;  %s3047_s24 = sld [smem:[#allocation6 + $0x27]] }
 0x1af   : > { %v1035_v10 = vadd.f32 %v1033_v8, %v998_v13  ;;  %v1014_v16 = vpop.permute.xlu0 %1013  ;;  %v1071_v18 = vpop.permute.xlu2 %1070 }
 0x1b0   : > { %v1019_v48 = vsel %vm248_vm5, 0.0, %v1014_v16  ;;  %v1076_v46 = vsel %vm307_vm7, 0.0, %v1071_v18  ;;  %v1101_v16 = vmul.f32 %v1099_v1, %v2610_v42  ;;  %v1127_v18 = vstv %s2925_s26  ;;  %s3059_s26 = sld [smem:[#allocation6 + $0x28]] }
 0x1b1   : > { %1369 = vrot.lane.b32.xlu1 %v2794_v43, %s2068_s16  ;;  %v1032_v52 = vmul.f32 %v1031_v0, %v1019_v48  ;;  %v1088_v61 = vmul.f32 %v1087_v9, %v1076_v46  ;;  %v2928_v0 = vsel %vm1389_vm13, %v1396_v39, %v1397_v45 }
 0x1b3   : > { %v1043_v12 = vpop.permute.xlu1 %1042  ;;  %v1034_v28 = vadd.f32 %v1032_v52, %v997_v21  ;;  %v2919_v21 = vsel %vm1389_vm13, %v1397_v45, 0.0 }
 0x1b4   : > { %v1048_v25 = vsel %vm278_vm6, 0.0, %v1043_v12  ;;  %v1100_v12 = vmul.f32 %v1099_v1, %v2633_v5  ;;  %v1107_v5 = vmul.f32 %v1105_v7, %v2653_v27  ;;  %v1189_v1 = vstv %s2973_s27  ;;  %s3094_s27 = sld [smem:[#allocation6 + $0x5b]] }
 0x1b5   : > { %v1060_v50 = vmul.f32 %v1059_v23, %v1048_v25  ;;  %v1040_v34 = vadd.f32 %v1038_v26, %v1034_v28  ;;  %1363 = vrot.lane.b32.xlu0 %v2744_v57, %s2068_s16  ;;  %1361 = vrot.lane.b32.xlu2 %v2767_v19, %s2068_s16  ;;  %v1106_v23 = vmul.f32 %v1105_v7, %v2660_v32  ;;  %v1133_v28 = vstv %s2936_s29  ;;  %s3068_s29 = sld [smem:[#allocation6 + $0x59]] }
 0x1b7   : > { %v1062_v36 = vadd.f32 %v1060_v50, %v1040_v34  ;;  %v1025_v56 = vpop.permute.xlu0 %1024  ;;  %v1081_v29 = vpop.permute.xlu2 %1080 }
 0x1b8   : > { %v1029_v37 = vsel %vm248_vm5, 0.0, %v1025_v56  ;;  %v1085_v2 = vsel %vm307_vm7, 0.0, %v1081_v29 }
 0x1b9   : > { %1405 = vrot.lane.b32.xlu1 %v2878_v17, %s2063_s20  ;;  %v1039_v38 = vmul.f32 %v1037_v15, %v1029_v37  ;;  %v1095_v15 = vmul.f32 %v1093_v53, %v1085_v2 }
 0x1bb   : > { %v1053_v31 = vpop.permute.xlu1 %1052  ;;  %v1041_v41 = vadd.f32 %v1039_v38, %v1035_v10 }
 0x1bc   : > { %v1057_v24 = vsel %vm278_vm6, 0.0, %v1053_v31 }
 0x1bd   : > { %v1067_v59 = vmul.f32 %v1065_v55, %v1057_v24  ;;  %v1063_v44 = vadd.f32 %v1061_v47, %v1041_v41  ;;  %1403 = vrot.lane.b32.xlu0 %v2901_v40, %s2063_s20  ;;  %1371 = vrot.lane.b32.xlu2 %v2787_v60, %s2068_s16 }
 0x1bf   : > { %v1069_v49 = vadd.f32 %v1067_v59, %v1063_v44  ;;  %v1051_v4 = vpop.permute.xlu0 %1050  ;;  %v1119_v51 = vpop.permute.xlu2 %1118 }
 0x1c0   : > { %v1056_v30 = vsel %vm278_vm6, 0.0, %v1051_v4  ;;  %v1124_v42 = vsel %vm348_vm8, %v1119_v51, 0.0 }
 0x1c1   : > { %1432 = vrot.lane.b32.xlu1 %v2901_v40, %s2064_s23  ;;  %v1066_v22 = vmul.f32 %v1065_v55, %v1056_v30  ;;  %v1134_v37 = vmul.f32 %v1133_v28, %v1124_v42 }
 0x1c3   : > { %v1079_v14 = vpop.permute.xlu1 %1078  ;;  %v1068_v62 = vadd.f32 %v1066_v22, %v1062_v36 }
 0x1c4   : > { %v1084_v54 = vsel %vm307_vm7, 0.0, %v1079_v14 }
 0x1c5   : > { %v1094_v63 = vmul.f32 %v1093_v53, %v1084_v54  ;;  %v1090_v20 = vadd.f32 %v1088_v61, %v1068_v62  ;;  %1414 = vrot.lane.b32.xlu0 %v2919_v21, %s2063_s20  ;;  %1412 = vrot.lane.b32.xlu2 %v2928_v0, %s2063_s20  ;;  %s2959_s20 = sld [smem:[#allocation6 + $0x52]] }
 0x1c7   : > { %v1096_v3 = vadd.f32 %v1094_v63, %v1090_v20  ;;  %v1073_v6 = vpop.permute.xlu0 %1072  ;;  %v1141_v8 = vpop.permute.xlu2 %1140 }
 0x1c8   : > { %v1077_v11 = vsel %vm307_vm7, 0.0, %v1073_v6  ;;  %v1145_v59 = vsel %vm377_vm9, %v1141_v8, 0.0 }
 0x1c9   : > { %1442 = vrot.lane.b32.xlu1 %v2919_v21, %s2064_s23  ;;  %v1089_v13 = vmul.f32 %v1087_v9, %v1077_v11  ;;  %v1102_v52 = vadd.f32 %v1100_v12, %v1096_v3  ;;  %v1157_v51 = vmul.f32 %v1155_v35, %v1145_v59 }
 0x1cb   : > { %v1113_v58 = vpop.permute.xlu1 %1112  ;;  %v1091_v10 = vadd.f32 %v1089_v13, %v1069_v49  ;;  %v1108_v56 = vadd.f32 %v1106_v23, %v1102_v52  ;;  %v1161_v46 = vstv %s2959_s20  ;;  %s3082_s20 = sld [smem:[#allocation6 + $0x5a]] }
 0x1cc   : > { %v1117_v48 = vsel %vm348_vm8, %v1113_v58, 0.0 }
 0x1cd   : > { %v1097_v26 = vadd.f32 %v1095_v15, %v1091_v10  ;;  %1440 = vrot.lane.b32.xlu0 %v2928_v0, %s2064_s23  ;;  %1434 = vrot.lane.b32.xlu2 %v2878_v17, %s2064_s23  ;;  %v1129_v31 = vmul.f32 %v1127_v18, %v1117_v48  ;;  %s2968_s23 = sld [smem:[#allocation6 + $0x22]]  ;;  %v1226_v48 = vstv %s2986_s3 }
 0x1ce   : > { %s3100_s3 = sld [smem:[#allocation6 + $0x2b]] }
 0x1cf   : > { %v1103_v50 = vadd.f32 %v1101_v16, %v1097_v26  ;;  %v1111_v34 = vpop.permute.xlu0 %1110  ;;  %v1167_v33 = vpop.permute.xlu2 %1166 }
 0x1d0   : > { %v1116_v32 = vsel %vm348_vm8, %v1111_v34, 0.0  ;;  %v1172_v61 = vsel %vm406_vm10, %v1167_v33, 0.0 }
 0x1d1   : > { %1468 = vrot.lane.b32.xlu1 %v2928_v0, %s2065_s28  ;;  %v1109_v27 = vadd.f32 %v1107_v5, %v1103_v50  ;;  %v1128_v29 = vmul.f32 %v1127_v18, %v1116_v32 }
 0x1d3   : > { %v1139_v25 = vpop.permute.xlu1 %1138  ;;  %v1131_v55 = vadd.f32 %v1129_v31, %v1109_v27  ;;  %v1130_v24 = vadd.f32 %v1128_v29, %v1108_v56  ;;  %v1183_v22 = vstv %s2968_s23  ;;  %s3090_s23 = sld [smem:[#allocation6 + $0x2a]] }
 0x1d4   : > { %v1144_v36 = vsel %vm377_vm9, %v1139_v25, 0.0  ;;  %v1184_v6 = vmul.f32 %v1183_v22, %v1172_v61 }
 0x1d5   : > { %v1156_v38 = vmul.f32 %v1155_v35, %v1144_v36  ;;  %v1136_v41 = vadd.f32 %v1134_v37, %v1130_v24  ;;  %1462 = vrot.lane.b32.xlu0 %v2878_v17, %s2065_s28  ;;  %1460 = vrot.lane.b32.xlu2 %v2901_v40, %s2065_s28 }
 0x1d7   : > { %v1158_v14 = vadd.f32 %v1156_v38, %v1136_v41  ;;  %v1121_v44 = vpop.permute.xlu0 %1120  ;;  %v1177_v45 = vpop.permute.xlu2 %1176 }
 0x1d8   : > { %v1125_v9 = vsel %vm348_vm8, %v1121_v44, 0.0  ;;  %v1181_v15 = vsel %vm406_vm10, %v1177_v45, 0.0 }
 0x1d9   : > { %1502 = vrot.lane.b32.xlu1 %v2878_v17, %s2066_s5  ;;  %v1135_v4 = vmul.f32 %v1133_v28, %v1125_v9  ;;  %v1191_v52 = vmul.f32 %v1189_v1, %v1181_v15 }
 0x1db   : > { %v1149_v47 = vpop.permute.xlu1 %1148  ;;  %v1137_v30 = vadd.f32 %v1135_v4, %v1131_v55 }
 0x1dc   : > { %v1153_v49 = vsel %vm377_vm9, %v1149_v47, 0.0 }
 0x1dd   : > { %v1163_v53 = vmul.f32 %v1161_v46, %v1153_v49  ;;  %v1159_v39 = vadd.f32 %v1157_v51, %v1137_v30  ;;  %1500 = vrot.lane.b32.xlu0 %v2901_v40, %s2066_s5  ;;  %1470 = vrot.lane.b32.xlu2 %v2919_v21, %s2065_s28  ;;  %s1820_s28 = sld [smem:[#allocation6 + $0x54]] }
 0x1df   : > { %v1165_v62 = vadd.f32 %v1163_v53, %v1159_v39  ;;  %v1147_v63 = vpop.permute.xlu0 %1146  ;;  %v1218_v58 = vpop.permute.xlu2 %1217 }
 0x1e0   : > { %v1152_v20 = vsel %vm377_vm9, %v1147_v63, 0.0  ;;  %v1223_v41 = vsel %vm248_vm5, 0.0, %v1218_v58 }
 0x1e1   : > { %1528 = vrot.lane.b32.xlu1 %v2901_v40, %s2067_s14  ;;  %v1162_v3 = vmul.f32 %v1161_v46, %v1152_v20 }
 0x1e3   : > { %v1175_v54 = vpop.permute.xlu1 %1174  ;;  %v1164_v8 = vadd.f32 %v1162_v3, %v1158_v14  ;;  %v1232_v47 = vstv %s1820_s28  ;;  %s3108_s28 = sld [smem:[#allocation6 + $0x5c]] }
 0x1e4   : > { %v1180_v2 = vsel %vm406_vm10, %v1175_v54, 0.0  ;;  %v1233_v44 = vmul.f32 %v1232_v47, %v1223_v41  ;;  %v1328_v41 = vstv %s3051_s25  ;;  %s3149_s25 = sld [smem:[#allocation6 + $0x30]] }
 0x1e5   : > { %v1190_v11 = vmul.f32 %v1189_v1, %v1180_v2  ;;  %v1186_v13 = vadd.f32 %v1184_v6, %v1164_v8  ;;  %1510 = vrot.lane.b32.xlu0 %v2919_v21, %s2066_s5  ;;  %1508 = vrot.lane.b32.xlu2 %v2928_v0, %s2066_s5  ;;  %s1821_s5 = sld [smem:[#allocation6 + $0x24]] }
 0x1e7   : > { %v1192_v7 = vadd.f32 %v1190_v11, %v1186_v13  ;;  %v1169_v10 = vpop.permute.xlu0 %1168  ;;  %v1240_v16 = vpop.permute.xlu2 %1239  ;;  %v1288_v13 = vstv %s3029_s7  ;;  %s3131_s7 = sld [smem:[#allocation6 + $0x5e]] }
 0x1e8   : > { %v1173_v18 = vsel %vm406_vm10, %v1169_v10, 0.0  ;;  %v1244_v39 = vsel %vm278_vm6, 0.0, %v1240_v16 }
 0x1e9   : > { %1538 = vrot.lane.b32.xlu1 %v2919_v21, %s2067_s14  ;;  %v1185_v25 = vmul.f32 %v1183_v22, %v1173_v18 }
 0x1eb   : > { %v1211_v12 = vpop.permute.xlu1 %1210  ;;  %v1187_v26 = vadd.f32 %v1185_v25, %v1165_v62  ;;  %v1254_v45 = vstv %s1821_s5  ;;  %v1294_v25 = vstv %s3035_s17  ;;  %s3112_s5 = sld [smem:[#allocation6 + $0x2c]] }
 0x1ec   : > { %v1215_v23 = vsel %vm248_vm5, 0.0, %v1211_v12  ;;  %v1256_v2 = vmul.f32 %v1254_v45, %v1244_v39  ;;  %s3133_s17 = sld [smem:[#allocation6 + $0x2e]] }
 0x1ed   : > { %v1228_v5 = vmul.f32 %v1226_v48, %v1215_v23  ;;  %v1193_v42 = vadd.f32 %v1191_v52, %v1187_v26  ;;  %1536 = vrot.lane.b32.xlu0 %v2928_v0, %s2067_s14  ;;  %1530 = vrot.lane.b32.xlu2 %v2878_v17, %s2067_s14  ;;  %s3018_s14 = sld [smem:[#allocation6 + $0x55]] }
 0x1ef   : > { %v1230_v50 = vadd.f32 %v1228_v5, %v1193_v42  ;;  %v1209_v31 = vpop.permute.xlu0 %1208  ;;  %v1266_v34 = vpop.permute.xlu2 %1265 }
 0x1f0   : > { %v1214_v37 = vsel %vm248_vm5, 0.0, %v1209_v31  ;;  %v1271_v63 = vsel %vm307_vm7, 0.0, %v1266_v34 }
 0x1f1   : > { %1564 = vrot.lane.b32.xlu1 %v2928_v0, %s2068_s16  ;;  %v1227_v38 = vmul.f32 %v1226_v48, %v1214_v37  ;;  %v1296_v37 = vmul.f32 %v1294_v25, %v2744_v57 }
 0x1f3   : > { %v1238_v28 = vpop.permute.xlu1 %1237  ;;  %v1229_v14 = vadd.f32 %v1227_v38, %v1192_v7  ;;  %v1260_v22 = vstv %s3018_s14  ;;  %s3118_s14 = sld [smem:[#allocation6 + $0x5d]] }
 0x1f4   : > { %v1243_v9 = vsel %vm278_vm6, 0.0, %v1238_v28  ;;  %v1295_v28 = vmul.f32 %v1294_v25, %v2767_v19 }
 0x1f5   : > { %1558 = vrot.lane.b32.xlu0 %v2878_v17, %s2068_s16  ;;  %1556 = vrot.lane.b32.xlu2 %v2901_v40, %s2068_s16  ;;  %v1235_v30 = vadd.f32 %v1233_v44, %v1229_v14  ;;  %v1255_v53 = vmul.f32 %v1254_v45, %v1243_v9 }
 0x1f7   : > { %v1220_v32 = vpop.permute.xlu0 %1219  ;;  %v1276_v35 = vpop.permute.xlu2 %1275  ;;  %v1257_v20 = vadd.f32 %v1255_v53, %v1235_v30  ;;  %v1350_v30 = vstv %s3059_s26  ;;  %s3152_s26 = sld [smem:[#allocation6 + $0x60]] }
 0x1f8   : > { %v1224_v46 = vsel %vm248_vm5, 0.0, %v1220_v32  ;;  %v1280_v52 = vsel %vm307_vm7, 0.0, %v1276_v35  ;;  %v1300_v32 = vstv %s3045_s19  ;;  %s3137_s19 = sld [smem:[#allocation6 + $0x5f]] }
 0x1f9   : > { %v1234_v54 = vmul.f32 %v1232_v47, %v1224_v46  ;;  %v1290_v31 = vmul.f32 %v1288_v13, %v1280_v52  ;;  %v1301_v19 = vmul.f32 %v1300_v32, %v2794_v43  ;;  %v1302_v45 = vmul.f32 %v1300_v32, %v2787_v60 }
 0x1fa   : > { %v1427_v32 = vstv %s3094_s27 }
 0x1fb   : > { %v1248_v33 = vpop.permute.xlu1 %1247  ;;  %v1236_v1 = vadd.f32 %v1234_v54, %v1230_v50 }
 0x1fc   : > { %v1252_v3 = vsel %vm278_vm6, 0.0, %v1248_v33 }
 0x1fd   : > { %1566 = vrot.lane.b32.xlu2 %v2919_v21, %s2068_s16  ;;  %s3020_s16 = sld [smem:[#allocation6 + $0x25]]  ;;  %v1258_v10 = vadd.f32 %v1256_v2, %v1236_v1  ;;  %v1262_v16 = vmul.f32 %v1260_v22, %v1252_v3  ;;  %v1378_v3 = vstv %s3075_s30  ;;  %s1855_s30 = sshll.u32 %s2107_s13, 6 }
 0x1fe   : > { %s1650_s13 = scalar_lea.hbm %s3223_s2, %s1855_s30 }
 0x1ff   : > { %v1246_v27 = vpop.permute.xlu0 %1245  ;;  %v3010_v56 = vpop.permute.xlu2 %1313  ;;  %v1264_v5 = vadd.f32 %v1262_v16, %v1258_v10  ;;  %v1384_v16 = vstv %s3082_s20  ;;  %s177_s20 = scalar_lea.vmem [#allocation7], %s1747_s6 }
 0x200   : > { %v1251_v51 = vsel %vm278_vm6, 0.0, %v1246_v27  ;;  %v1319_v14 = vsel %vm348_vm8, %v3010_v56, 0.0  ;;  %s1651_s6 = sshll.u32 %s177_s20, 4  ;;  %s1652_s6 = int_to_ptr.vmem [resolvable:$true] %s1651_s6 }
 0x201   : > { %v1261_v61 = vmul.f32 %v1260_v22, %v1251_v51  ;;  %v1329_v51 = vmul.f32 %v1328_v41, %v1319_v14  ;;  %v1449_v14 = vstv %s3100_s3  ;;  %s1653_s3 = sshll.u32 %s1650_s13, 4  ;;  %s1654_s3 = int_to_ptr.hbm [resolvable:$true] %s1653_s3 }
 0x203   : > { %v1274_v36 = vpop.permute.xlu1 %1273  ;;  %v1282_v62 = vstv %s3020_s16  ;;  %v1263_v6 = vadd.f32 %v1261_v61, %v1257_v20  ;;  %v1356_v20 = vstv %s3068_s29  ;;  %s3125_s16 = sld [smem:[#allocation6 + $0x2d]] }
 0x204   : > { %v1283_v8 = vmul.f32 %v1282_v62, %v1271_v63  ;;  %v1279_v15 = vsel %vm307_vm7, 0.0, %v1274_v36  ;;  %v1322_v36 = vstv %s3047_s24  ;;  %s3143_s24 = sld [smem:[#allocation6 + $0x2f]] }
 0x205   : > { %v1289_v48 = vmul.f32 %v1288_v13, %v1279_v15  ;;  %s3155_s29 = sld [smem:[#allocation6 + $0x61]] }
 0x206   : > { %v1285_v18 = vadd.f32 %v1283_v8, %v1263_v6 }
 0x207   : > { %v1268_v55 = vpop.permute.xlu0 %1267  ;;  %v3015_v24 = vpop.permute.xlu2 %1335 }
 0x208   : > { %v1272_v7 = vsel %vm307_vm7, 0.0, %v1268_v55  ;;  %v1291_v42 = vadd.f32 %v1289_v48, %v1285_v18  ;;  %v1340_v63 = vsel %vm377_vm9, %v3015_v24, 0.0 }
 0x209   : > { %v1284_v23 = vmul.f32 %v1282_v62, %v1272_v7  ;;  %v1352_v13 = vmul.f32 %v1350_v30, %v1340_v63 }
 0x20a   : > { %v1297_v35 = vadd.f32 %v1295_v28, %v1291_v42 }
 0x20b   : > { %v3012_v29 = vpop.permute.xlu1 %1307  ;;  %v1286_v50 = vadd.f32 %v1284_v23, %v1264_v5 }
 0x20c   : > { %v1303_v9 = vadd.f32 %v1301_v19, %v1297_v35  ;;  %v1312_v57 = vsel %vm348_vm8, %v3012_v29, 0.0 }
 0x20d   : > { %v1292_v55 = vadd.f32 %v1290_v31, %v1286_v50  ;;  %v1324_v54 = vmul.f32 %v1322_v36, %v1312_v57  ;;  %v1421_v31 = vstv %s3090_s23 }
 0x20f   : > { %v1306_v49 = vpop.permute.xlu0 %1305  ;;  %v3026_v4 = vpop.permute.xlu2 %1361  ;;  %v1298_v44 = vadd.f32 %v1296_v37, %v1292_v55 }
 0x210   : > { %v1311_v27 = vsel %vm348_vm8, %v1306_v49, 0.0  ;;  %v1367_v6 = vsel %vm406_vm10, %v3026_v4, 0.0 }
 0x211   : > { %v1323_v47 = vmul.f32 %v1322_v36, %v1311_v27  ;;  %v1304_v60 = vadd.f32 %v1302_v45, %v1298_v44  ;;  %v1379_v10 = vmul.f32 %v1378_v3, %v1367_v6 }
 0x213   : > { %v3022_v59 = vpop.permute.xlu1 %1333  ;;  %v1325_v43 = vadd.f32 %v1323_v47, %v1303_v9  ;;  %v1326_v1 = vadd.f32 %v1324_v54, %v1304_v60  ;;  %v1477_v54 = vstv %s3112_s5  ;;  %s2001_s5 = sshra.s32 %s1654_s3, 4  ;;  %s2002_s5 = int_to_ptr.hbm [resolvable:$true] %s2001_s5 }
 0x214   : > { %v1339_v56 = vsel %vm377_vm9, %v3022_v59, 0.0  ;;  %p2008_p0 = scmp.lt.s32.totalorder %s2002_s5, %s3223_s2 }
 0x215   : > { %v1331_v29 = vadd.f32 %v1329_v51, %v1325_v43  ;;  %v1351_v61 = vmul.f32 %v1350_v30, %v1339_v56  ;;  %v1455_v56 = vstv %s3108_s28  ;;  %s1639_s28 = scalar_lea.sflag [#allocation4], %s2183_s4 }
 0x217   : > { %v1316_v11 = vpop.permute.xlu0 %1315  ;;  %v3040_v12 = vpop.permute.xlu2 %1371  ;;  %v1353_v8 = vadd.f32 %v1351_v61, %v1331_v29 }
 0x218   : > { %v1320_v53 = vsel %vm348_vm8, %v1316_v11, 0.0  ;;  %v1376_v50 = vsel %vm406_vm10, %v3040_v12, 0.0 }
 0x219   : > { %v1330_v62 = vmul.f32 %v1328_v41, %v1320_v53  ;;  %v1386_v37 = vmul.f32 %v1384_v16, %v1376_v50 }
 0x21b   : > { %v3037_v58 = vpop.permute.xlu1 %1343  ;;  %v1332_v11 = vadd.f32 %v1330_v62, %v1326_v1 }
 0x21c   : > { %v1348_v7 = vsel %vm377_vm9, %v3037_v58, 0.0 }
 0x21d   : > { %v1354_v23 = vadd.f32 %v1352_v13, %v1332_v11  ;;  %v1358_v25 = vmul.f32 %v1356_v20, %v1348_v7 }
 0x21f   : > { %v1342_v34 = vpop.permute.xlu0 %1341  ;;  %v3054_v33 = vpop.permute.xlu2 %1412 }
 0x220   : > { %v1347_v39 = vsel %vm377_vm9, %v1342_v34, 0.0  ;;  %v1360_v34 = vadd.f32 %v1358_v25, %v1354_v23  ;;  %v1418_v36 = vsel %vm248_vm5, 0.0, %v3054_v33 }
 0x221   : > { %v1357_v2 = vmul.f32 %v1356_v20, %v1347_v39  ;;  %v1428_v41 = vmul.f32 %v1427_v32, %v1418_v36  ;;  %v1523_v36 = vstv %s3137_s19 }
 0x223   : > { %v1370_v26 = vpop.permute.xlu1 %1369  ;;  %v1359_v24 = vadd.f32 %v1357_v2, %v1353_v8 }
 0x224   : > { %v1375_v18 = vsel %vm406_vm10, %v1370_v26, 0.0 }
 0x225   : > { %v1381_v5 = vadd.f32 %v1379_v10, %v1359_v24  ;;  %v1385_v58 = vmul.f32 %v1384_v16, %v1375_v18  ;;  %v1489_v24 = vstv %s3125_s16 }
 0x227   : > { %v1364_v46 = vpop.permute.xlu0 %1363  ;;  %v3071_v49 = vpop.permute.xlu2 %1434  ;;  %v1387_v27 = vadd.f32 %v1385_v58, %v1381_v5  ;;  %v1495_v58 = vstv %s3131_s7  ;;  %s2007_s7 = scalar_lea.hbm %s3223_s2, 128 }
 0x228   : > { %v1368_v4 = vsel %vm406_vm10, %v1364_v46, 0.0  ;;  %v1439_v30 = vsel %vm278_vm6, 0.0, %v3071_v49 }
 0x229   : > { %v1380_v28 = vmul.f32 %v1378_v3, %v1368_v4  ;;  %v1451_v62 = vmul.f32 %v1449_v14, %v1439_v30  ;;  %v1490_v4 = vmul.f32 %v1489_v24, %v2901_v40 }
 0x22b   : > { %v3063_v38 = vpop.permute.xlu1 %1405  ;;  %v1382_v35 = vadd.f32 %v1380_v28, %v1360_v34  ;;  %v1517_v28 = vstv %s3133_s17 }
 0x22c   : > { %v1410_v19 = vsel %vm248_vm5, 0.0, %v3063_v38 }
 0x22d   : > { %v1388_v45 = vadd.f32 %v1386_v37, %v1382_v35  ;;  %v1423_v9 = vmul.f32 %v1421_v31, %v1410_v19  ;;  %v1497_v37 = vmul.f32 %v1495_v58, %v2919_v21 }
 0x22f   : > { %v1404_v59 = vpop.permute.xlu0 %1403  ;;  %v1461_v15 = vpop.permute.xlu2 %1460  ;;  %v1425_v53 = vadd.f32 %v1423_v9, %v1388_v45 }
 0x230   : > { %v1409_v52 = vsel %vm248_vm5, 0.0, %v1404_v59  ;;  %v1466_v39 = vsel %vm307_vm7, 0.0, %v1461_v15  ;;  %v1483_v59 = vstv %s3118_s14  ;;  %s2003_s14 = scalar_lea.hbm %s2002_s5, 64 }
 0x231   : > { %v1422_v26 = vmul.f32 %v1421_v31, %v1409_v52  ;;  %v1478_v2 = vmul.f32 %v1477_v54, %v1466_v39  ;;  %v1491_v31 = vmul.f32 %v1489_v24, %v2878_v17  ;;  %v1579_v39 = vstv %s3155_s29  ;;  %p2004_p4 = scmp.ne.s32.totalorder %s2002_s5, %s2003_s14  ;;  %p2009_p3 = scmp.lt.s32.totalorder %s2007_s7, %s2003_s14 }
 0x233   : > { %v1433_v22 = vpop.permute.xlu1 %1432  ;;  %v1424_v47 = vadd.f32 %v1422_v26, %v1387_v27  ;;  %v1496_v26 = vmul.f32 %v1495_v58, %v2928_v0  ;;  %p2005_p6 = pnand %p2004_p4, %p2138_p11  ;;  %p2010_p5 = por %p2009_p3, %p2008_p0 }
 0x234   : > { %v1438_v44 = vsel %vm278_vm6, 0.0, %v1433_v22 }
 0x235   : > { %v1430_v38 = vadd.f32 %v1428_v41, %v1424_v47  ;;  %v1450_v43 = vmul.f32 %v1449_v14, %v1438_v44  ;;  %v1545_v41 = vstv %s3143_s24  ;;  %p2006_p13 = pneg %p2005_p6 }
 0x237   : > { %v1415_v42 = vpop.permute.xlu0 %1414  ;;  %v1471_v55 = vpop.permute.xlu2 %1470  ;;  %v1452_v29 = vadd.f32 %v1450_v43, %v1430_v38  ;;  %v1573_v43 = vstv %s3149_s25  ;;  %p2011_p8 = pnand %p2010_p5, %p2006_p13 }
 0x238   : > { %v1419_v33 = vsel %vm248_vm5, 0.0, %v1415_v42  ;;  %v1475_v10 = vsel %vm307_vm7, 0.0, %v1471_v55 }
 0x239   : > { %v1429_v51 = vmul.f32 %v1427_v32, %v1419_v33  ;;  %v1485_v25 = vmul.f32 %v1483_v59, %v1475_v10 }
 0x23b   : > { %v1443_v48 = vpop.permute.xlu1 %1442  ;;  %v1431_v61 = vadd.f32 %v1429_v51, %v1425_v53 }
 0x23c   : > { %v1447_v20 = vsel %vm278_vm6, 0.0, %v1443_v48 }
 0x23d   : > { %v1453_v8 = vadd.f32 %v1451_v62, %v1431_v61  ;;  %v1457_v11 = vmul.f32 %v1455_v56, %v1447_v20 }
 0x23f   : > { %v1441_v46 = vpop.permute.xlu0 %1440  ;;  %v1509_v63 = vpop.permute.xlu2 %1508  ;;  %v1459_v18 = vadd.f32 %v1457_v11, %v1453_v8 }
 0x240   : > { %v1446_v57 = vsel %vm278_vm6, 0.0, %v1441_v46  ;;  %v1514_v27 = vsel %vm348_vm8, %v1509_v63, 0.0 }
 0x241   : > { %v1456_v60 = vmul.f32 %v1455_v56, %v1446_v57  ;;  %v1551_v56 = vstv %s3152_s26 }
 0x243   : > { %v1469_v12 = vpop.permute.xlu1 %1468  ;;  %v1458_v1 = vadd.f32 %v1456_v60, %v1452_v29 }
 0x244   : > { %v1474_v3 = vsel %vm307_vm7, 0.0, %v1469_v12  ;;  %v1524_v12 = vmul.f32 %v1523_v36, %v1514_v27 }
 0x245   : > { %v1480_v13 = vadd.f32 %v1478_v2, %v1458_v1  ;;  %v1484_v15 = vmul.f32 %v1483_v59, %v1474_v3 }
 0x247   : > { %v1463_v49 = vpop.permute.xlu0 %1462  ;;  %v1486_v48 = vadd.f32 %v1484_v15, %v1480_v13  ;;  %v1531_v5 = vpop.permute.xlu2 %1530 }
 0x248   : > { %v1467_v6 = vsel %vm307_vm7, 0.0, %v1463_v49  ;;  %v1535_v57 = vsel %vm377_vm9, %v1531_v5, 0.0 }
 0x249   : > { %v1479_v7 = vmul.f32 %v1477_v54, %v1467_v6  ;;  %v1492_v50 = vadd.f32 %v1490_v4, %v1486_v48  ;;  %v1547_v60 = vmul.f32 %v1545_v41, %v1535_v57 }
 0x24b   : > { %v1503_v22 = vpop.permute.xlu1 %1502  ;;  %v1481_v23 = vadd.f32 %v1479_v7, %v1459_v18  ;;  %v1498_v55 = vadd.f32 %v1496_v26, %v1492_v50 }
 0x24c   : > { %v1507_v17 = vsel %vm348_vm8, %v1503_v22, 0.0 }
 0x24d   : > { %v1487_v34 = vadd.f32 %v1485_v25, %v1481_v23  ;;  %v1519_v33 = vmul.f32 %v1517_v28, %v1507_v17  ;;  %v1935_v17 = vld [vmem:[%s2189_s8 + $0x10] sm:$0xff] }
 0x24f   : > { %v1501_v52 = vpop.permute.xlu0 %1500  ;;  %v1493_v35 = vadd.f32 %v1491_v31, %v1487_v34  ;;  %v1557_v47 = vpop.permute.xlu2 %1556 }
 0x250   : > { %v1506_v42 = vsel %vm348_vm8, %v1501_v52, 0.0  ;;  %v1562_v51 = vsel %vm406_vm10, %v1557_v47, 0.0 }
 0x251   : > { %v1518_v32 = vmul.f32 %v1517_v28, %v1506_v42  ;;  %v1499_v21 = vadd.f32 %v1497_v37, %v1493_v35  ;;  %v1574_v63 = vmul.f32 %v1573_v43, %v1562_v51  ;;  %v1939_v51 = vld [vmem:[%s2189_s8 + $0x18] sm:$0xff] }
 0x253   : > { %v1529_v16 = vpop.permute.xlu1 %1528  ;;  %v1520_v0 = vadd.f32 %v1518_v32, %v1498_v55  ;;  %v1521_v30 = vadd.f32 %v1519_v33, %v1499_v21  ;;  %v1934_v55 = vld [vmem:[%s2189_s8] sm:$0xff] }
 0x254   : > { %v1534_v14 = vsel %vm377_vm9, %v1529_v16, 0.0 }
 0x255   : > { %v1526_v45 = vadd.f32 %v1524_v12, %v1520_v0  ;;  %v1546_v9 = vmul.f32 %v1545_v41, %v1534_v14  ;;  %v1936_v12 = vld [vmem:[%s2189_s8 + $0x20] sm:$0xff]  ;;  %v1937_v14 = vld [vmem:[%s2189_s8 + $0x30] sm:$0xff] }
 0x257   : > { %v1511_v19 = vpop.permute.xlu0 %1510  ;;  %v1548_v29 = vadd.f32 %v1546_v9, %v1526_v45  ;;  %v1567_v49 = vpop.permute.xlu2 %1566 }
 0x258   : > { %v1515_v44 = vsel %vm348_vm8, %v1511_v19, 0.0  ;;  %v1571_v8 = vsel %vm406_vm10, %v1567_v49, 0.0 }
 0x259   : > { %v1525_v46 = vmul.f32 %v1523_v36, %v1515_v44  ;;  %v1581_v16 = vmul.f32 %v1579_v39, %v1571_v8 }
 0x25b   : > { %v1539_v40 = vpop.permute.xlu1 %1538  ;;  %v1527_v61 = vadd.f32 %v1525_v46, %v1521_v30 }
 0x25c   : > { %v1543_v20 = vsel %vm377_vm9, %v1539_v40, 0.0 }
 0x25d   : > { %v1549_v59 = vadd.f32 %v1547_v60, %v1527_v61  ;;  %v1553_v3 = vmul.f32 %v1551_v56, %v1543_v20  ;;  %v1941_v60 = vld [vmem:[%s2189_s8 + $0x38] sm:$0xff] }
 0x25f   : > { %v1537_v53 = vpop.permute.xlu0 %1536  ;;  %v1555_v7 = vadd.f32 %v1553_v3, %v1549_v59 }
 0x260   : > { %v1542_v54 = vsel %vm377_vm9, %v1537_v53, 0.0 }
 0x261   : > { %v1552_v62 = vmul.f32 %v1551_v56, %v1542_v54  ;;  %v1940_v56 = vld [vmem:[%s2189_s8 + $0x28] sm:$0xff] }
 0x263   : > { %v1565_v38 = vpop.permute.xlu1 %1564  ;;  %v1554_v1 = vadd.f32 %v1552_v62, %v1548_v29 }
 0x264   : > { %v1570_v22 = vsel %vm406_vm10, %v1565_v38, 0.0  ;;  %v1938_v38 = vld [vmem:[%s2189_s8 + $0x8] sm:$0xff] }
 0x265   : > { %v1580_v2 = vmul.f32 %v1579_v39, %v1570_v22  ;;  %v1576_v6 = vadd.f32 %v1574_v63, %v1554_v1 }
 0x267   : > { %v1582_v11 = vadd.f32 %v1580_v2, %v1576_v6  ;;  %v1559_v13 = vpop.permute.xlu0 %1558 }
 0x268   : > { %v1563_v15 = vsel %vm406_vm10, %v1559_v13, 0.0 }
 0x269   : > { %v1847_v24 = vmul.f32 -1.442695, %v1582_v11  ;;  %v1575_v10 = vmul.f32 %v1573_v43, %v1563_v15 }
 0x26b   : > { %1926 = vpow2.f32 %v1847_v24  ;;  %v1577_v18 = vadd.f32 %v1575_v10, %v1555_v7 }
 0x26d   : > { %v1583_v4 = vadd.f32 %v1581_v16, %v1577_v18 }
 0x26f   : > { %v1848_v48 = vmul.f32 -1.442695, %v1583_v4 }
 0x271   : > { %v1927_v23 = vpop.eup %1926  ;;  %1928 = vpow2.f32 %v1848_v48 }
 0x272   : > { %v1590_v25 = vadd.f32 1.0, %v1927_v23 }
 0x274   : > { %1930 = vrcp.f32 %v1590_v25  ;;  %v1603_v50 = vand.u32 2147483648, %v1590_v25  ;;  %v1601_v34 = vand.u32 2147483647, %v1590_v25  ;;  %vm1597_vm15 = vweird.f32 %v1590_v25 }
 0x276   : > { %v1604_v36 = vor.u32 1.1754944e-38, %v1603_v50  ;;  %vm1602_vm2 = vcmp.eq.f32.partialorder %v1601_v34, 8.507059e+37 }
 0x277   : > { %v1929_v52 = vpop.eup %1928 }
 0x278   : > { %v1591_v5 = vadd.f32 1.0, %v1929_v52 }
 0x27a   : > { %v1931_v58 = vpop.eup %1930  ;;  %1932 = vrcp.f32 %v1591_v5  ;;  %v1618_v41 = vand.u32 2147483648, %v1591_v5  ;;  %v1616_v33 = vand.u32 2147483647, %v1591_v5  ;;  %vm1612_vm4 = vweird.f32 %v1591_v5 }
 0x27b   : > { %v1593_v28 = vmul.f32 %v1931_v58, %v1590_v25  ;;  %vm1598_vm14 = vweird.f32 %v1931_v58 }
 0x27c   : > { %vm1599_vm1 = vmor %vm1597_vm15, %vm1598_vm14  ;;  %v1619_v9 = vor.u32 1.1754944e-38, %v1618_v41  ;;  %vm1617_vm6 = vcmp.eq.f32.partialorder %v1616_v33, 8.507059e+37 }
 0x27d   : > { %v1594_v42 = vsub.f32 1.0, %v1593_v28 }
 0x27f   : > { %v1595_v31 = vmul.f32 %v1931_v58, %v1594_v42 }
 0x280   : > { %v1933_v26 = vpop.eup %1932 }
 0x281   : > { %v1596_v40 = vadd.f32 %v1931_v58, %v1595_v31  ;;  %v1608_v32 = vmul.f32 %v1933_v26, %v1591_v5  ;;  %vm1613_vm3 = vweird.f32 %v1933_v26 }
 0x282   : > { %vm1614_vm5 = vmor %vm1612_vm4, %vm1613_vm3 }
 0x283   : > { %v1600_v27 = vsel %vm1599_vm1, %v1931_v58, %v1596_v40  ;;  %v1609_v35 = vsub.f32 1.0, %v1608_v32 }
 0x284   : > { %v1605_v37 = vsel %vm1602_vm2, %v1604_v36, %v1600_v27 }
 0x285   : > { %v1622_v19 = vmul.f32 %v1934_v55, %v1605_v37  ;;  %v1624_v0 = vmul.f32 %v1935_v17, %v1605_v37  ;;  %v1626_v47 = vmul.f32 %v1936_v12, %v1605_v37  ;;  %v1628_v44 = vmul.f32 %v1937_v14, %v1605_v37 }
 0x286   : > { %v1610_v21 = vmul.f32 %v1933_v26, %v1609_v35 }
 0x287   : > { %1630 = vst.msk [vmem:[%s177_s20] sm:$0xff] %vm186_vm0, %v1622_v19 }
 0x288   : > { %1632 = vst.msk [vmem:[%s177_s20 + $0x10] sm:$0xff] %vm186_vm0, %v1624_v0  ;;  %v1611_v45 = vadd.f32 %v1933_v26, %v1610_v21 }
 0x289   : > { %1634 = vst.msk [vmem:[%s177_s20 + $0x20] sm:$0xff] %vm186_vm0, %v1626_v47 }
 0x28a   : > { %1636 = vst.msk [vmem:[%s177_s20 + $0x30] sm:$0xff] %vm186_vm0, %v1628_v44  ;;  %v1615_v46 = vsel %vm1614_vm5, %v1933_v26, %v1611_v45 }
 0x28b   : > { %v1620_v57 = vsel %vm1617_vm6, %v1619_v9, %v1615_v46 }
 0x28c   : > { %v1623_v43 = vmul.f32 %v1938_v38, %v1620_v57  ;;  %v1625_v30 = vmul.f32 %v1939_v51, %v1620_v57  ;;  %v1627_v53 = vmul.f32 %v1940_v56, %v1620_v57  ;;  %v1629_v54 = vmul.f32 %v1941_v60, %v1620_v57 }
 0x28e   : > { %1631 = vst.msk [vmem:[%s177_s20 + $0x8] sm:$0xff] %vm186_vm0, %v1623_v43 }
 0x28f   : > { %1633 = vst.msk [vmem:[%s177_s20 + $0x18] sm:$0xff] %vm186_vm0, %v1625_v30 }
 0x290   : > { %1635 = vst.msk [vmem:[%s177_s20 + $0x28] sm:$0xff] %vm186_vm0, %v1627_v53 }
 0x291   : > { %1637 = vst.msk [vmem:[%s177_s20 + $0x38] sm:$0xff] %vm186_vm0, %v1629_v54 }
 0x292   : > { %2014 = shalt.err (!%p2011_p8)
}
 0x293   : > { %s2069_s4 = smov 128   ;;  %s2070_s24 = smov 8  }
 0x294   : > { %1862 = dma.vmem_to_hbm [thread:$0]  (%p2138_p11), %s1652_s6, 1024, %s1654_s3, %s1639_s28, %s2069_s4, %s2069_s4, %s2070_s24  }
 0x295 PF: > { %s1668_s25 = sand.u32 1, %s2045_s9   ;;  %p3230_p9 = scmp.ge.s32.totalorder %s2057_s12, 2 }
 0x296   : > { %s1669_s26 = scalar_lea.sflag [#allocation4], %s1668_s25 }
 0x297   : > { %p1873_p10 = pnand %p3230_p9, %p2142_p12 }
 0x299   : > { %p1874_p1 = pneg %p1873_p10 }
 0x29b   : > { %2040 = dma.done.wait (%p1874_p1), %s1669_s26, 1024  }
 0x29c   : > { %2042 = vsyncadd (%p1874_p1), %s1669_s26, 4294966272  ;;  %p16_p2 = scmp.ge.s32.totalorder %s2111_s15, 4   ;;  %s3231_s9 = smov %s2049_s10 }
 0x29d   : > { %s3232_s10 = smov %s2053_s11  ;;  %s3233_s11 = smov %s2123_s18 }
 0x29e   : > { %s3234_s12 = smov %s2111_s15  ;;  %18 = sbr.rel (!%p16_p2) target bundleno = 6 (0x6), region = 78 }
 0x2a3   :  { %1675 = vsyncpa [#allocation3], 1 }
 0x2a4   :  { %1677 = vsyncpa [#allocation3 + $0x1], 1 }
 0x2a5   :  { %1678 = vsyncpa [#allocation4], 1 }
 0x2a6   :  { %1680 = vsyncpa [#allocation4 + $0x1], 1 }
 0x2a7   :  { %1681 = vsyncpa [#allocation5], 1 }
 0x2a8   :  { %1683 = vsyncpa [#allocation5 + $0x1], 1 }

</bundles_post_ra>
